<compile_context>
chip_gen: v5e
topology: v5e:2x2
jax: 0.10.0
libtpu: 0.0.40
codegen_flags: <defaults>
</compile_context>

<pallas_src>
import functools
import math

import jax
import jax.numpy as jnp
from jax import lax
from jax.experimental import pallas as pl
from jax.experimental.pallas import tpu as pltpu


def graphormer_vec_kernel(
    i_ref, j_ref, ev4_ref,                       # per edge-tile
    q_ref, kf_ref,                               # resident node projections (bf16, padded)
    w1_ref, b1_ref, w2_ref, b2_ref, w3r_ref, b3_ref,   # edge-bias MLP weights (f32)
    out_ref,                                     # [4, Np] f32 (rows 0..2 = vec, row 3 junk)
    m_s, acc4_s,                                 # scratch: [1,Np], [4,Np] f32
    *, d,
):
    f32 = jnp.float32
    bf16 = jnp.bfloat16
    NEG = -1e30
    t = pl.program_id(0)
    TE = i_ref.shape[0]
    Np, Dp = q_ref.shape

    # ---- init resident accumulators on the first edge tile ----
    @pl.when(t == 0)
    def _init():
        m_s[...] = jnp.full(m_s.shape, NEG, dtype=f32)
        acc4_s[...] = jnp.zeros(acc4_s.shape, dtype=f32)

    i_col = i_ref[...]                           # [TE, 1] int32 (-1 == padding)
    j_col = j_ref[...]                           # [TE, 1] int32 (-1 == padding)
    ev4 = ev4_ref[...]                           # [TE, 4] = [edge_vec | edge_len]
    valid = j_col >= 0                           # [TE, 1] bool

    # ---- edge-bias MLP (f32, small [TE,D] work): Linear(4,D)-SiLU-Linear(D,D)-SiLU-Linear(D,1)
    h = jnp.dot(ev4, w1_ref[...], preferred_element_type=f32) + b1_ref[...]
    h = h * jax.nn.sigmoid(h)
    h = jnp.dot(h, w2_ref[...], preferred_element_type=f32) + b2_ref[...]
    h = h * jax.nn.sigmoid(h)
    # last layer as a VPU/XLU reduction (avoids a 1-output-lane MXU matmul)
    bias = jnp.sum(h * w3r_ref[...], axis=-1, keepdims=True) + b3_ref[...]    # [TE, 1]

    # ---- one-hot edge->node maps (bf16; padded edges -> all-zero rows) ----
    iota_n = lax.broadcasted_iota(jnp.int32, (1, Np), 1)
    tgt = j_col == iota_n                                                     # [TE, Np] bool
    oh_j = tgt.astype(bf16)
    oh_i = (i_col == iota_n).astype(bf16)

    # ---- fused row gathers on the MXU (bf16 operands, f32 accumulation) ----
    qe = jnp.dot(oh_j, q_ref[...], preferred_element_type=f32)                # [TE, Dp]
    kfe = jnp.dot(oh_i, kf_ref[...], preferred_element_type=f32)              # [TE, Dp]

    # q is zero-padded past column d, so a full-lane reduce gives exactly q.k (scale folded in q)
    s = jnp.sum(qe * kfe, axis=-1, keepdims=True) + bias                      # [TE, 1]
    # f[i_e] lives in column d of kfe; extract with a masked lane reduce (no MXU)
    fcol = lax.broadcasted_iota(jnp.int32, (1, Dp), 1) == d
    fe = jnp.sum(jnp.where(fcol, kfe, 0.0), axis=-1, keepdims=True)           # [TE, 1]

    # ---- online (flash-style) segment softmax over the target node j ----
    tile_max = jnp.max(jnp.where(tgt, s, NEG), axis=0, keepdims=True)         # [1, Np]
    m_old = m_s[...]
    m_new = jnp.maximum(m_old, tile_max)                                      # [1, Np]
    rescale = jnp.exp(m_old - m_new)                                          # [1, Np]
    # gather the running max back to edges with a masked lane reduce (VPU/XLU, not MXU)
    max_e = jnp.max(jnp.where(tgt, m_new, NEG), axis=1, keepdims=True)        # [TE, 1]
    # padded edges are forced to exp(-1e30) == 0 (no inf/NaN can reach the scatter)
    p = jnp.exp(jnp.where(valid, s - max_e, NEG))                             # [TE, 1]

    # ---- fused scatter: one [TE,4] x [TE,Np] matmul produces [p*f*ev | p] per node ----
    col3 = lax.broadcasted_iota(jnp.int32, (1, 4), 1) == 3
    contrib4 = jnp.where(col3, p, p * fe * ev4)                               # [TE, 4]
    seg4 = lax.dot_general(contrib4.astype(bf16), oh_j,
                           (((0,), (0,)), ((), ())),
                           preferred_element_type=f32)                        # [4, Np]

    acc4_s[...] = acc4_s[...] * rescale + seg4
    m_s[...] = m_new

    # ---- last tile: normalise AFTER the scatter, emit lane-dense [4, Np] ----
    # NOTE: out_ref has a constant-index BlockSpec and is only written here; this relies on
    # Pallas output-revisiting semantics (single HBM writeback after the last grid step).
    @pl.when(t == pl.num_programs(0) - 1)
    def _finalize():
        acc4 = acc4_s[...]
        l = acc4[3:4, :]                                                      # [1, Np]
        has_edge = l > 0.0
        inv = pl.reciprocal(jnp.where(has_edge, l, 1.0), approx=False)
        out_ref[...] = jnp.where(has_edge, acc4 * inv, 0.0)


def graphormer_vector_prediction(x, edge_index, edge_vec, params, *, tile_edges=512):
    f32 = jnp.float32
    bf16 = jnp.bfloat16
    x = x.astype(f32)
    N, D = x.shape
    E = edge_index.shape[1]

    def rup(v, m):
        return ((v + m - 1) // m) * m

    # ---- node projections in plain XLA (recommended: frees kernel VMEM / init branch) ----
    q = (x @ params["wq"] + params["bq"]) * (1.0 / math.sqrt(D))      # 1/sqrt(D) folded in
    k = x @ params["wk"] + params["bk"]
    f = x @ (params["wv"] @ params["wf"]) + (params["bv"] @ params["wf"] + params["bf"])
    kf = jnp.concatenate([k, f], axis=1)                              # [N, D+1]

    # ---- pad node / feature axes to lane-dense multiples of 128; cast gather operands bf16 ----
    Np = rup(max(N, 128), 128)
    Dp = rup(max(D + 1, 128), 128)
    q_pad = jnp.zeros((Np, Dp), f32).at[:N, :D].set(q).astype(bf16)
    kf_pad = jnp.zeros((Np, Dp), f32).at[:N, :D + 1].set(kf).astype(bf16)

    # ---- pad edges to a multiple of the edge tile; 4th column carries |edge_vec| ----
    TE = max(8, rup(int(tile_edges), 8))
    T = (E + TE - 1) // TE
    E_pad = T * TE
    pad = E_pad - E
    ev = edge_vec.astype(f32)
    elen = jnp.linalg.norm(ev, axis=-1, keepdims=True)
    ev4 = jnp.pad(jnp.concatenate([ev, elen], axis=1), ((0, pad), (0, 0)))
    i_col = jnp.pad(edge_index[0].astype(jnp.int32), (0, pad),
                    constant_values=-1).reshape(E_pad, 1)
    j_col = jnp.pad(edge_index[1].astype(jnp.int32), (0, pad),
                    constant_values=-1).reshape(E_pad, 1)

    # ---- edge-bias MLP weights (tiny, f32); last layer passed as a row for the VPU reduce ----
    w1 = params["w1"].astype(f32)      # [4, D]
    b1 = params["b1"].astype(f32)      # [1, D]
    w2 = params["w2"].astype(f32)      # [D, D]
    b2 = params["b2"].astype(f32)      # [1, D]
    w3r = params["w3"].astype(f32).T   # [1, D]
    b3 = params["b3"].astype(f32)      # [1, 1]
    weights = (w1, b1, w2, b2, w3r, b3)

    def res_spec(a):
        return pl.BlockSpec(a.shape, lambda t: (0, 0))

    grid_spec = pltpu.PrefetchScalarGridSpec(
        num_scalar_prefetch=0,
        grid=(T,),
        in_specs=[
            pl.BlockSpec((TE, 1), lambda t: (t, 0)),     # i (source nodes)
            pl.BlockSpec((TE, 1), lambda t: (t, 0)),     # j (target nodes)
            pl.BlockSpec((TE, 4), lambda t: (t, 0)),     # [edge_vec | edge_len]
            res_spec(q_pad),                             # resident node q (bf16)
            res_spec(kf_pad),                            # resident node [k | f] (bf16)
        ] + [res_spec(w) for w in weights],
        out_specs=pl.BlockSpec((4, Np), lambda t: (0, 0)),
        scratch_shapes=[
            pltpu.VMEM((1, Np), f32),                    # running per-node max
            pltpu.VMEM((4, Np), f32),                    # running per-node [3-vec | denom]
        ],
    )

    # ---- VMEM limit derived from the real footprint, capped by device VMEM ----
    footprint = (
        4 * Np * Dp * 2                       # q_pad, kf_pad (bf16, double-buffered)
        + 2 * 4 * sum(w.size for w in weights)
        + 2 * 4 * TE * 6                      # edge tiles (double-buffered)
        + 4 * 5 * Np                          # scratch
        + 2 * 2 * TE * Np                     # one-hots (bf16)
        + 4 * 6 * TE * Dp                     # qe / kfe / masked temporaries
        + 4 * 4 * Np                          # output block
    )
    vmem_limit = max(2 * footprint, 32 << 20)
    try:
        cap = pltpu.get_tpu_info().vmem_capacity_bytes
    except Exception:
        cap = 64 << 20                        # conservative (v7x physical VMEM)
    vmem_limit = int(min(vmem_limit, (cap * 7) // 8))

    flops = int(T * TE * (4 * Np * Dp + 16 * Np + 2 * D * (D + 6) + 40))
    transcendentals = int(T * (TE * (2 * D + 1) + Np))
    bytes_accessed = int(4 * (i_col.size + j_col.size + ev4.size + 4 * Np)
                         + 2 * (q_pad.size + kf_pad.size)
                         + 4 * sum(w.size for w in weights))

    out4 = pl.pallas_call(
        functools.partial(graphormer_vec_kernel, d=D),
        out_shape=jax.ShapeDtypeStruct((4, Np), f32),
        grid_spec=grid_spec,
        compiler_params=pltpu.CompilerParams(
            dimension_semantics=("arbitrary",),          # edge axis is a reduction
            vmem_limit_bytes=vmem_limit,
        ),
        cost_estimate=pl.CostEstimate(flops=flops,
                                      transcendentals=transcendentals,
                                      bytes_accessed=bytes_accessed),
    )(i_col, j_col, ev4, q_pad, kf_pad, *weights)

    return out4[:3, :N].T                                # [N, 3]


def reference(x, edge_index, edge_vec, params):
    """Pure-JAX reference matching the PyTorch GraphormerVectorPrediction forward."""
    N, D = x.shape
    i = edge_index[0]
    j = edge_index[1]
    q = (x @ params["wq"] + params["bq"][0])[j]
    k = (x @ params["wk"] + params["bk"][0])[i]
    v = (x @ params["wv"] + params["bv"][0])[i]
    edge_len = jnp.linalg.norm(edge_vec, axis=-1, keepdims=True)
    ea = jnp.concatenate([edge_vec, edge_len], axis=-1)
    h = jax.nn.silu(ea @ params["w1"] + params["b1"][0])
    h = jax.nn.silu(h @ params["w2"] + params["b2"][0])
    bias = (h @ params["w3"] + params["b3"][0])[:, 0]
    scores = (q * k).sum(-1) / math.sqrt(D) + bias                       # [E]
    seg_max = jax.ops.segment_max(scores, j, num_segments=N)
    exps = jnp.exp(scores - seg_max[j])
    seg_sum = jax.ops.segment_sum(exps, j, num_segments=N)
    alpha = exps / seg_sum[j]
    wf_v = v @ params["wf"] + params["bf"][0]                            # [E, 1]
    vec = alpha[:, None] * wf_v * edge_vec                               # [E, 3]
    return jax.ops.segment_sum(vec, j, num_segments=N)                   # [N, 3]


if __name__ == "__main__":
    # Small deterministic config; E > tile_edges so the multi-tile online-softmax path runs.
    N, DIM, E = 64, 32, 600

    key = jax.random.PRNGKey(0)
    ks = jax.random.split(key, 20)

    def lin(kw, kb, fan_in, fan_out):
        bound = 1.0 / math.sqrt(fan_in)
        w = jax.random.uniform(kw, (fan_in, fan_out), jnp.float32, -bound, bound)
        b = jax.random.uniform(kb, (1, fan_out), jnp.float32, -bound, bound)
        return w, b

    wq, bq = lin(ks[0], ks[1], DIM, DIM)
    wk, bk = lin(ks[2], ks[3], DIM, DIM)
    wv, bv = lin(ks[4], ks[5], DIM, DIM)
    w1, b1 = lin(ks[6], ks[7], 4, DIM)       # edge_bias MLP: 4 -> D -> D -> 1, SiLU between
    w2, b2 = lin(ks[8], ks[9], DIM, DIM)
    w3, b3 = lin(ks[10], ks[11], DIM, 1)
    wf, bf = lin(ks[12], ks[13], DIM, 1)     # w_F
    params = dict(wq=wq, bq=bq, wk=wk, bk=bk, wv=wv, bv=bv,
                  w1=w1, b1=b1, w2=w2, b2=b2, w3=w3, b3=b3, wf=wf, bf=bf)

    x = jax.random.normal(ks[14], (N, DIM), jnp.float32)
    edge_index = jax.random.randint(ks[15], (2, E), 0, N, dtype=jnp.int32)
    edge_vec = jax.random.normal(ks[16], (E, 3), jnp.float32)

    out = graphormer_vector_prediction(x, edge_index, edge_vec, params, tile_edges=256)
    out = jax.block_until_ready(out)

    ref = reference(x, edge_index, edge_vec, params)
    assert out.shape == (N, 3)
    # bf16 gather/scatter operands (per the perf review) -> ~1e-2 accuracy; the all-f32
    # variant of this kernel held 1e-4.
    assert jnp.allclose(out, ref, rtol=2e-2, atol=2e-2), "mismatch vs pure-JAX reference"

    print("KERNEL_OK")
</pallas_src>

<mosaic_0001>
module attributes {stable_mosaic.version = 11 : i64} {
  func.func @graphormer_vec_kernel(%arg0: i32, %arg1: memref<256x1xi32, #tpu.memory_space<vmem>>, %arg2: memref<256x1xi32, #tpu.memory_space<vmem>>, %arg3: memref<256x4xf32, #tpu.memory_space<vmem>>, %arg4: memref<128x128xbf16, #tpu.memory_space<vmem>>, %arg5: memref<128x128xbf16, #tpu.memory_space<vmem>>, %arg6: memref<4x32xf32, #tpu.memory_space<vmem>>, %arg7: memref<1x32xf32, #tpu.memory_space<vmem>>, %arg8: memref<32x32xf32, #tpu.memory_space<vmem>>, %arg9: memref<1x32xf32, #tpu.memory_space<vmem>>, %arg10: memref<1x32xf32, #tpu.memory_space<vmem>>, %arg11: memref<1x1xf32, #tpu.memory_space<vmem>>, %arg12: memref<4x128xf32, #tpu.memory_space<vmem>>, %arg13: memref<1x128xf32, #tpu.memory_space<vmem>>, %arg14: memref<4x128xf32, #tpu.memory_space<vmem>>) attributes {dimension_semantics = [#tpu.dimension_semantics<arbitrary>], iteration_bounds = array<i64: 3>, scalar_prefetch = 0 : i64, scratch_operands = 2 : i64, tpu.core_type = #tpu.core_type<tc>, window_params = [{transform_indices = @transform_0, window_bounds = array<i64: 256, 1>}, {transform_indices = @transform_1, window_bounds = array<i64: 256, 1>}, {transform_indices = @transform_2, window_bounds = array<i64: 256, 4>}, {pipeline_mode = #tpu.pipeline_mode<synchronous>, transform_indices = @transform_3, window_bounds = array<i64: 128, 128>}, {pipeline_mode = #tpu.pipeline_mode<synchronous>, transform_indices = @transform_4, window_bounds = array<i64: 128, 128>}, {pipeline_mode = #tpu.pipeline_mode<synchronous>, transform_indices = @transform_5, window_bounds = array<i64: 4, 32>}, {pipeline_mode = #tpu.pipeline_mode<synchronous>, transform_indices = @transform_6, window_bounds = array<i64: 1, 32>}, {pipeline_mode = #tpu.pipeline_mode<synchronous>, transform_indices = @transform_7, window_bounds = array<i64: 32, 32>}, {pipeline_mode = #tpu.pipeline_mode<synchronous>, transform_indices = @transform_8, window_bounds = array<i64: 1, 32>}, {pipeline_mode = #tpu.pipeline_mode<synchronous>, transform_indices = @transform_9, window_bounds = array<i64: 1, 32>}, {pipeline_mode = #tpu.pipeline_mode<synchronous>, transform_indices = @transform_10, window_bounds = array<i64: 1, 1>}, {pipeline_mode = #tpu.pipeline_mode<synchronous>, transform_indices = @transform_11, window_bounds = array<i64: 4, 128>}]} {
    %c0_i32 = arith.constant 0 : i32
    %0 = arith.cmpi eq, %arg0, %c0_i32 : i32
    %1 = arith.extui %0 : i1 to i32
    %c0_i32_0 = arith.constant 0 : i32
    %2 = arith.cmpi ne, %1, %c0_i32_0 : i32
    scf.if %2 {
      %cst_47 = arith.constant -1.000000e+30 : f32
      %110 = vector.broadcast %cst_47 : f32 to vector<1x128xf32>
      %c0_48 = arith.constant 0 : index
      %c0_49 = arith.constant 0 : index
      %111 = vector.load %arg13[%c0_48, %c0_49] : memref<1x128xf32, #tpu.memory_space<vmem>>, vector<1x128xf32>
      tpu.vector_store %arg13[%c0_48, %c0_49], %110 {strides = array<i32>} : memref<1x128xf32, #tpu.memory_space<vmem>>, vector<1x128xf32>,
      %cst_50 = arith.constant 0.000000e+00 : f32
      %112 = vector.broadcast %cst_50 : f32 to vector<4x128xf32>
      %c0_51 = arith.constant 0 : index
      %c0_52 = arith.constant 0 : index
      %113 = vector.load %arg14[%c0_51, %c0_52] : memref<4x128xf32, #tpu.memory_space<vmem>>, vector<4x128xf32>
      tpu.vector_store %arg14[%c0_51, %c0_52], %112 {strides = array<i32>} : memref<4x128xf32, #tpu.memory_space<vmem>>, vector<4x128xf32>,
    } else {
    }
    %c0 = arith.constant 0 : index
    %c0_1 = arith.constant 0 : index
    %3 = vector.load %arg1[%c0, %c0_1] : memref<256x1xi32, #tpu.memory_space<vmem>>, vector<256x1xi32>
    %c0_2 = arith.constant 0 : index
    %c0_3 = arith.constant 0 : index
    %4 = vector.load %arg2[%c0_2, %c0_3] : memref<256x1xi32, #tpu.memory_space<vmem>>, vector<256x1xi32>
    %c0_4 = arith.constant 0 : index
    %c0_5 = arith.constant 0 : index
    %5 = vector.load %arg3[%c0_4, %c0_5] : memref<256x4xf32, #tpu.memory_space<vmem>>, vector<256x4xf32>
    %c0_i32_6 = arith.constant 0 : i32
    %6 = vector.broadcast %c0_i32_6 : i32 to vector<256x1xi32>
    %7 = arith.cmpi sge, %4, %6 : vector<256x1xi32>
    %c0_7 = arith.constant 0 : index
    %c0_8 = arith.constant 0 : index
    %8 = vector.load %arg6[%c0_7, %c0_8] : memref<4x32xf32, #tpu.memory_space<vmem>>, vector<4x32xf32>
    %cst = arith.constant dense<0.000000e+00> : vector<256x32xf32>
    %9 = tpu.matmul %5, %8, %cst {dimension_numbers = #tpu.dot_dimension_numbers<[1], [0], [0], [1], [0, 0, 1, 1], [], []>} : vector<256x4xf32>, vector<4x32xf32>, vector<256x32xf32> -> vector<256x32xf32>
    %c0_9 = arith.constant 0 : index
    %c0_10 = arith.constant 0 : index
    %10 = vector.load %arg7[%c0_9, %c0_10] : memref<1x32xf32, #tpu.memory_space<vmem>>, vector<1x32xf32>
    %11 = vector.broadcast %10 : vector<1x32xf32> to vector<256x32xf32>
    %12 = arith.addf %9, %11 : vector<256x32xf32>
    %13 = arith.negf %12 : vector<256x32xf32>
    %14 = math.exp %13 : vector<256x32xf32>
    %cst_11 = arith.constant 1.000000e+00 : f32
    %15 = vector.broadcast %cst_11 : f32 to vector<256x32xf32>
    %16 = arith.addf %15, %14 : vector<256x32xf32>
    %17 = arith.divf %15, %16 : vector<256x32xf32>
    %18 = arith.mulf %12, %17 : vector<256x32xf32>
    %c0_12 = arith.constant 0 : index
    %c0_13 = arith.constant 0 : index
    %19 = vector.load %arg8[%c0_12, %c0_13] : memref<32x32xf32, #tpu.memory_space<vmem>>, vector<32x32xf32>
    %cst_14 = arith.constant dense<0.000000e+00> : vector<256x32xf32>
    %20 = tpu.matmul %18, %19, %cst_14 {dimension_numbers = #tpu.dot_dimension_numbers<[1], [0], [0], [1], [0, 0, 1, 1], [], []>} : vector<256x32xf32>, vector<32x32xf32>, vector<256x32xf32> -> vector<256x32xf32>
    %c0_15 = arith.constant 0 : index
    %c0_16 = arith.constant 0 : index
    %21 = vector.load %arg9[%c0_15, %c0_16] : memref<1x32xf32, #tpu.memory_space<vmem>>, vector<1x32xf32>
    %22 = vector.broadcast %21 : vector<1x32xf32> to vector<256x32xf32>
    %23 = arith.addf %20, %22 : vector<256x32xf32>
    %24 = arith.negf %23 : vector<256x32xf32>
    %25 = math.exp %24 : vector<256x32xf32>
    %cst_17 = arith.constant 1.000000e+00 : f32
    %26 = vector.broadcast %cst_17 : f32 to vector<256x32xf32>
    %27 = arith.addf %26, %25 : vector<256x32xf32>
    %28 = arith.divf %26, %27 : vector<256x32xf32>
    %29 = arith.mulf %23, %28 : vector<256x32xf32>
    %c0_18 = arith.constant 0 : index
    %c0_19 = arith.constant 0 : index
    %30 = vector.load %arg10[%c0_18, %c0_19] : memref<1x32xf32, #tpu.memory_space<vmem>>, vector<1x32xf32>
    %31 = vector.broadcast %30 : vector<1x32xf32> to vector<256x32xf32>
    %32 = arith.mulf %29, %31 : vector<256x32xf32>
    %cst_20 = arith.constant dense<0.000000e+00> : vector<256xf32>
    %33 = vector.multi_reduction <add>, %32, %cst_20 [1] : vector<256x32xf32> to vector<256xf32>
    %34 = vector.shape_cast %33 : vector<256xf32> to vector<256x1xf32>
    %c0_21 = arith.constant 0 : index
    %c0_22 = arith.constant 0 : index
    %35 = vector.load %arg11[%c0_21, %c0_22] : memref<1x1xf32, #tpu.memory_space<vmem>>, vector<1x1xf32>
    %36 = vector.broadcast %35 : vector<1x1xf32> to vector<256x1xf32>
    %37 = arith.addf %34, %36 : vector<256x1xf32>
    %38 = tpu.iota {dimensions = array<i32: 1>} : vector<1x128xi32>
    %39 = vector.broadcast %4 : vector<256x1xi32> to vector<256x128xi32>
    %40 = vector.broadcast %38 : vector<1x128xi32> to vector<256x128xi32>
    %41 = arith.cmpi eq, %39, %40 : vector<256x128xi32>
    %42 = arith.extui %41 : vector<256x128xi1> to vector<256x128xi32>
    %43 = arith.sitofp %42 : vector<256x128xi32> to vector<256x128xf32>
    %44 = arith.truncf %43 : vector<256x128xf32> to vector<256x128xbf16>
    %45 = vector.broadcast %3 : vector<256x1xi32> to vector<256x128xi32>
    %46 = vector.broadcast %38 : vector<1x128xi32> to vector<256x128xi32>
    %47 = arith.cmpi eq, %45, %46 : vector<256x128xi32>
    %48 = arith.extui %47 : vector<256x128xi1> to vector<256x128xi32>
    %49 = arith.sitofp %48 : vector<256x128xi32> to vector<256x128xf32>
    %50 = arith.truncf %49 : vector<256x128xf32> to vector<256x128xbf16>
    %c0_23 = arith.constant 0 : index
    %c0_24 = arith.constant 0 : index
    %51 = vector.load %arg4[%c0_23, %c0_24] : memref<128x128xbf16, #tpu.memory_space<vmem>>, vector<128x128xbf16>
    %cst_25 = arith.constant dense<0.000000e+00> : vector<256x128xf32>
    %52 = tpu.matmul %44, %51, %cst_25 {dimension_numbers = #tpu.dot_dimension_numbers<[1], [0], [0], [1], [0, 0, 1, 1], [], []>} : vector<256x128xbf16>, vector<128x128xbf16>, vector<256x128xf32> -> vector<256x128xf32>
    %c0_26 = arith.constant 0 : index
    %c0_27 = arith.constant 0 : index
    %53 = vector.load %arg5[%c0_26, %c0_27] : memref<128x128xbf16, #tpu.memory_space<vmem>>, vector<128x128xbf16>
    %cst_28 = arith.constant dense<0.000000e+00> : vector<256x128xf32>
    %54 = tpu.matmul %50, %53, %cst_28 {dimension_numbers = #tpu.dot_dimension_numbers<[1], [0], [0], [1], [0, 0, 1, 1], [], []>} : vector<256x128xbf16>, vector<128x128xbf16>, vector<256x128xf32> -> vector<256x128xf32>
    %55 = arith.mulf %52, %54 : vector<256x128xf32>
    %cst_29 = arith.constant dense<0.000000e+00> : vector<256xf32>
    %56 = vector.multi_reduction <add>, %55, %cst_29 [1] : vector<256x128xf32> to vector<256xf32>
    %57 = vector.shape_cast %56 : vector<256xf32> to vector<256x1xf32>
    %58 = arith.addf %57, %37 : vector<256x1xf32>
    %59 = tpu.iota {dimensions = array<i32: 1>} : vector<1x128xi32>
    %c32_i32 = arith.constant 32 : i32
    %60 = vector.broadcast %c32_i32 : i32 to vector<1x128xi32>
    %61 = arith.cmpi eq, %59, %60 : vector<1x128xi32>
    %cst_30 = arith.constant 0.000000e+00 : f32
    %62 = vector.shape_cast %61 : vector<1x128xi1> to vector<1x128xi1>
    %63 = vector.broadcast %62 : vector<1x128xi1> to vector<256x128xi1>
    %64 = vector.broadcast %cst_30 : f32 to vector<256x128xf32>
    %65 = arith.select %63, %54, %64 : vector<256x128xi1>, vector<256x128xf32>
    %cst_31 = arith.constant dense<0.000000e+00> : vector<256xf32>
    %66 = vector.multi_reduction <add>, %65, %cst_31 [1] : vector<256x128xf32> to vector<256xf32>
    %67 = vector.shape_cast %66 : vector<256xf32> to vector<256x1xf32>
    %cst_32 = arith.constant -1.000000e+30 : f32
    %68 = vector.shape_cast %58 : vector<256x1xf32> to vector<256x1xf32>
    %69 = vector.broadcast %68 : vector<256x1xf32> to vector<256x128xf32>
    %70 = vector.broadcast %cst_32 : f32 to vector<256x128xf32>
    %71 = arith.select %41, %69, %70 : vector<256x128xi1>, vector<256x128xf32>
    %cst_33 = arith.constant dense<0xFF800000> : vector<128xf32>
    %72 = vector.multi_reduction <maximumf>, %71, %cst_33 [0] : vector<256x128xf32> to vector<128xf32>
    %73 = vector.shape_cast %72 : vector<128xf32> to vector<1x128xf32>
    %c0_34 = arith.constant 0 : index
    %c0_35 = arith.constant 0 : index
    %74 = vector.load %arg13[%c0_34, %c0_35] : memref<1x128xf32, #tpu.memory_space<vmem>>, vector<1x128xf32>
    %75 = arith.maximumf %74, %73 : vector<1x128xf32>
    %76 = arith.subf %74, %75 : vector<1x128xf32>
    %77 = math.exp %76 : vector<1x128xf32>
    %cst_36 = arith.constant -1.000000e+30 : f32
    %78 = vector.shape_cast %75 : vector<1x128xf32> to vector<1x128xf32>
    %79 = vector.broadcast %78 : vector<1x128xf32> to vector<256x128xf32>
    %80 = vector.broadcast %cst_36 : f32 to vector<256x128xf32>
    %81 = arith.select %41, %79, %80 : vector<256x128xi1>, vector<256x128xf32>
    %cst_37 = arith.constant dense<0xFF800000> : vector<256xf32>
    %82 = vector.multi_reduction <maximumf>, %81, %cst_37 [1] : vector<256x128xf32> to vector<256xf32>
    %83 = vector.shape_cast %82 : vector<256xf32> to vector<256x1xf32>
    %84 = arith.subf %58, %83 : vector<256x1xf32>
    %cst_38 = arith.constant -1.000000e+30 : f32
    %85 = vector.broadcast %cst_38 : f32 to vector<256x1xf32>
    %86 = arith.select %7, %84, %85 : vector<256x1xi1>, vector<256x1xf32>
    %87 = math.exp %86 : vector<256x1xf32>
    %88 = tpu.iota {dimensions = array<i32: 1>} : vector<1x4xi32>
    %c3_i32 = arith.constant 3 : i32
    %89 = vector.broadcast %c3_i32 : i32 to vector<1x4xi32>
    %90 = arith.cmpi eq, %88, %89 : vector<1x4xi32>
    %91 = arith.mulf %87, %67 : vector<256x1xf32>
    %92 = vector.broadcast %91 : vector<256x1xf32> to vector<256x4xf32>
    %93 = arith.mulf %92, %5 : vector<256x4xf32>
    %94 = vector.shape_cast %90 : vector<1x4xi1> to vector<1x4xi1>
    %95 = vector.broadcast %94 : vector<1x4xi1> to vector<256x4xi1>
    %96 = vector.shape_cast %87 : vector<256x1xf32> to vector<256x1xf32>
    %97 = vector.broadcast %96 : vector<256x1xf32> to vector<256x4xf32>
    %98 = arith.select %95, %97, %93 : vector<256x4xi1>, vector<256x4xf32>
    %99 = arith.truncf %98 : vector<256x4xf32> to vector<256x4xbf16>
    %cst_39 = arith.constant dense<0.000000e+00> : vector<4x128xf32>
    %100 = tpu.matmul %99, %44, %cst_39 {dimension_numbers = #tpu.dot_dimension_numbers<[0], [0], [1], [1], [0, 1, 1, 1], [], []>} : vector<256x4xbf16>, vector<256x128xbf16>, vector<4x128xf32> -> vector<4x128xf32>
    %c0_40 = arith.constant 0 : index
    %c0_41 = arith.constant 0 : index
    %101 = vector.load %arg14[%c0_40, %c0_41] : memref<4x128xf32, #tpu.memory_space<vmem>>, vector<4x128xf32>
    %102 = vector.broadcast %77 : vector<1x128xf32> to vector<4x128xf32>
    %103 = arith.mulf %101, %102 : vector<4x128xf32>
    %104 = arith.addf %103, %100 : vector<4x128xf32>
    %c0_42 = arith.constant 0 : index
    %c0_43 = arith.constant 0 : index
    %105 = vector.load %arg14[%c0_42, %c0_43] : memref<4x128xf32, #tpu.memory_space<vmem>>, vector<4x128xf32>
    tpu.vector_store %arg14[%c0_42, %c0_43], %104 {strides = array<i32>} : memref<4x128xf32, #tpu.memory_space<vmem>>, vector<4x128xf32>,
    %c0_44 = arith.constant 0 : index
    %c0_45 = arith.constant 0 : index
    %106 = vector.load %arg13[%c0_44, %c0_45] : memref<1x128xf32, #tpu.memory_space<vmem>>, vector<1x128xf32>
    tpu.vector_store %arg13[%c0_44, %c0_45], %75 {strides = array<i32>} : memref<1x128xf32, #tpu.memory_space<vmem>>, vector<1x128xf32>,
    %c2_i32 = arith.constant 2 : i32
    %107 = arith.cmpi eq, %arg0, %c2_i32 : i32
    %108 = arith.extui %107 : i1 to i32
    %c0_i32_46 = arith.constant 0 : i32
    %109 = arith.cmpi ne, %108, %c0_i32_46 : i32
    scf.if %109 {
      %c0_47 = arith.constant 0 : index
      %c0_48 = arith.constant 0 : index
      %110 = vector.load %arg14[%c0_47, %c0_48] : memref<4x128xf32, #tpu.memory_space<vmem>>, vector<4x128xf32>
      %111 = vector.extract_strided_slice %110 {offsets = [3, 0], sizes = [1, 128], strides = [1, 1]} : vector<4x128xf32> to vector<1x128xf32>
      %cst_49 = arith.constant 0.000000e+00 : f32
      %112 = vector.broadcast %cst_49 : f32 to vector<1x128xf32>
      %113 = arith.cmpf ogt, %111, %112 : vector<1x128xf32>
      %cst_50 = arith.constant 1.000000e+00 : f32
      %114 = vector.broadcast %cst_50 : f32 to vector<1x128xf32>
      %115 = arith.select %113, %111, %114 : vector<1x128xi1>, vector<1x128xf32>
      %116 = tpu.reciprocal %115 : vector<1x128xf32> -> vector<1x128xf32>
      %117 = vector.broadcast %116 : vector<1x128xf32> to vector<4x128xf32>
      %118 = arith.mulf %110, %117 : vector<4x128xf32>
      %cst_51 = arith.constant 0.000000e+00 : f32
      %119 = vector.shape_cast %113 : vector<1x128xi1> to vector<1x128xi1>
      %120 = vector.broadcast %119 : vector<1x128xi1> to vector<4x128xi1>
      %121 = vector.broadcast %cst_51 : f32 to vector<4x128xf32>
      %122 = arith.select %120, %118, %121 : vector<4x128xi1>, vector<4x128xf32>
      %c0_52 = arith.constant 0 : index
      %c0_53 = arith.constant 0 : index
      %123 = vector.load %arg12[%c0_52, %c0_53] : memref<4x128xf32, #tpu.memory_space<vmem>>, vector<4x128xf32>
      tpu.vector_store %arg12[%c0_52, %c0_53], %122 {strides = array<i32>} : memref<4x128xf32, #tpu.memory_space<vmem>>, vector<4x128xf32>,
    } else {
    }
    return
  }
  func.func @transform_0(%arg0: i32) -> (i32, i32) {
    %c0_i32 = arith.constant 0 : i32
    %c0_i32_0 = arith.constant 0 : i32
    return %arg0, %c0_i32 : i32, i32
  }
  func.func @transform_1(%arg0: i32) -> (i32, i32) {
    %c0_i32 = arith.constant 0 : i32
    %c0_i32_0 = arith.constant 0 : i32
    return %arg0, %c0_i32 : i32, i32
  }
  func.func @transform_2(%arg0: i32) -> (i32, i32) {
    %c0_i32 = arith.constant 0 : i32
    %c0_i32_0 = arith.constant 0 : i32
    return %arg0, %c0_i32 : i32, i32
  }
  func.func @transform_3(%arg0: i32) -> (i32, i32) {
    %c0_i32 = arith.constant 0 : i32
    %c0_i32_0 = arith.constant 0 : i32
    %c0_i32_1 = arith.constant 0 : i32
    return %c0_i32, %c0_i32_0 : i32, i32
  }
  func.func @transform_4(%arg0: i32) -> (i32, i32) {
    %c0_i32 = arith.constant 0 : i32
    %c0_i32_0 = arith.constant 0 : i32
    %c0_i32_1 = arith.constant 0 : i32
    return %c0_i32, %c0_i32_0 : i32, i32
  }
  func.func @transform_5(%arg0: i32) -> (i32, i32) {
    %c0_i32 = arith.constant 0 : i32
    %c0_i32_0 = arith.constant 0 : i32
    %c0_i32_1 = arith.constant 0 : i32
    return %c0_i32, %c0_i32_0 : i32, i32
  }
  func.func @transform_6(%arg0: i32) -> (i32, i32) {
    %c0_i32 = arith.constant 0 : i32
    %c0_i32_0 = arith.constant 0 : i32
    %c0_i32_1 = arith.constant 0 : i32
    return %c0_i32, %c0_i32_0 : i32, i32
  }
  func.func @transform_7(%arg0: i32) -> (i32, i32) {
    %c0_i32 = arith.constant 0 : i32
    %c0_i32_0 = arith.constant 0 : i32
    %c0_i32_1 = arith.constant 0 : i32
    return %c0_i32, %c0_i32_0 : i32, i32
  }
  func.func @transform_8(%arg0: i32) -> (i32, i32) {
    %c0_i32 = arith.constant 0 : i32
    %c0_i32_0 = arith.constant 0 : i32
    %c0_i32_1 = arith.constant 0 : i32
    return %c0_i32, %c0_i32_0 : i32, i32
  }
  func.func @transform_9(%arg0: i32) -> (i32, i32) {
    %c0_i32 = arith.constant 0 : i32
    %c0_i32_0 = arith.constant 0 : i32
    %c0_i32_1 = arith.constant 0 : i32
    return %c0_i32, %c0_i32_0 : i32, i32
  }
  func.func @transform_10(%arg0: i32) -> (i32, i32) {
    %c0_i32 = arith.constant 0 : i32
    %c0_i32_0 = arith.constant 0 : i32
    %c0_i32_1 = arith.constant 0 : i32
    return %c0_i32, %c0_i32_0 : i32, i32
  }
  func.func @transform_11(%arg0: i32) -> (i32, i32) {
    %c0_i32 = arith.constant 0 : i32
    %c0_i32_0 = arith.constant 0 : i32
    %c0_i32_1 = arith.constant 0 : i32
    return %c0_i32, %c0_i32_0 : i32, i32
  }
}

</mosaic_0001>

<bundles_post_ra>
// kernel: tpu_custom_call.1
= control target key start
LH: loop header
LB: loop body
LE: loop exit
PB: predicated region body
PF: predicated region fallthrough
CT: control target
= control target key end

     0   :  { %s8602_s0 = inlined_call_operand.vmem [shape: s32[768,1], index: 0, kind: input, shape index: {}]   ;;  %s8603_s1 = inlined_call_operand.vmem [shape: s32[768,1], index: 1, kind: input, shape index: {}]   ;;  %s8604_s2 = inlined_call_operand.vmem [shape: f32[768,4], index: 2, kind: input, shape index: {}]   ;;  %s8605_s3 = inlined_call_operand.vmem [shape: bf16[128,128], index: 3, kind: input, shape index: {}]   ;;  %s8606_s4 = inlined_call_operand.vmem [shape: bf16[128,128], index: 4, kind: input, shape index: {}]   ;;  %s8607_s5 = inlined_call_operand.vmem [shape: f32[4,32], index: 5, kind: input, shape index: {}]   ;;  %s8608_s6 = inlined_call_operand.vmem [shape: f32[1,32], index: 6, kind: input, shape index: {}]   ;;  %s8609_s7 = inlined_call_operand.vmem [shape: f32[32,32], index: 7, kind: input, shape index: {}]   ;;  %s8610_s8 = inlined_call_operand.vmem [shape: f32[1,32], index: 8, kind: input, shape index: {}]   ;;  %s8611_s9 = inlined_call_operand.vmem [shape: f32[1,32], index: 9, kind: input, shape index: {}]   ;;  %s8612_s10 = inlined_call_operand.<no memory space> [shape: f32[1,1], index: 10, kind: input, shape index: {}]   ;;  %s8613_s11 = inlined_call_operand.hbm [shape: f32[4,128], index: 11, kind: output, shape index: {}]  }
   0x1   :  { %v16_v0 = vstv %s8612_s10 }
   0x2   :  { %17 = vst [vmem:[#allocation4] sm:$0x1] %v16_v0 }
   0x3   :  { %18 = vsyncpa [#allocation6], 0  ;;  %s5479_s19 = smov 0  }
   0x4 LB: > { %s5485_s20 = sadd.s32 4294967295, %s5406_s19   ;;  %p4456_p0 = scmp.ge.s32.totalorder %s5406_s19, 1  ;;  %s5406_s19 = sphi %s5479_s19, %s24_s19  }
   0x5   : > { %p358_p1 = scmp.lt.s32.totalorder %s5406_s19, 4 }
   0x7   : > { %p359_p2 = pnand %p4456_p0, %p358_p1 }
   0x9   : > { %362 = sbr.rel (%p359_p2) target bundleno = 1814 (0x716), region = 64 }
   0xe   : > { %s4457_s10 = sshll.u32 %s5485_s20, 5  ;;  %p4463_p4 = scmp.ne.s32.totalorder %s5485_s20, 0 }
   0xf   : > { %p404_p3 = scmp.lt.s32.totalorder %s4457_s10, 95 }
  0x10   : > { %424 = sbr.rel (%p4463_p4) target bundleno = 24 (0x18), region = 68 }
  0x11   : > { %s9136_s10 = smov (!%p404_p3, %s4457_s10), 95 }
  0x12   : > { %s4458_s21 = sshll.u32 %s9136_s10, 3 }
  0x13   : > { %s5493_s24 = scalar_lea.vmem %s8602_s0, %s4458_s21  ;;  %s5498_s27 = scalar_lea.vmem %s8603_s1, %s4458_s21 }
  0x14   : > { %s5503_s30 = scalar_lea.vmem %s8604_s2, %s4458_s21 }
  0x15   : > { %v5408_v1 = vmov -1e+30   ;;  %v5409_v2 = vmov 0.0  }
  0x16   : > { %425 = vst [vmem:[#allocation2] sm:$0x1] %v5408_v1 }
  0x17   : > { %426 = vst [vmem:[#allocation3] sm:$0xf] %v5409_v2 }
  0x18 PF: > { %v461_v3 = vld [vmem:[%s5498_s27 + $0x10] sm:$0xff]  ;;  %v460_v4 = vld [vmem:[%s5498_s27 + $0x8] sm:$0xff]  ;;  %v459_v5 = vld [vmem:[%s5498_s27] sm:$0xff]  ;;  %v5410_v6 = vmov 0   ;;  %vm657_vm0 = vcmask 1043456   ;;  %vm8642_vm1 = vcmask 31744  }
  0x19   : > { %4888 = vset.pattern.permute.xlu1 %v5410_v6  ;;  %4887 = vset.pattern.permute.xlu0 %v5410_v6  ;;  %v555_v7 = vld [vmem:[%s8607_s5] sm:$0xf]  ;;  %v464_v9 = vld [vmem:[%s5498_s27 + $0x28] sm:$0xff]  ;;  %v462_v11 = vld [vmem:[%s5498_s27 + $0x18] sm:$0xff]  ;;  %p4817_p5 = scmp.ne.s32.totalorder %s5485_s20, 2 }
  0x1a   : > { %4886 = vset.pattern.permute.xlu2 %v5410_v6  ;;  %2449 = vperm.xlu1 %4888, %v461_v3   ;;  %v491_v8 = vld [vmem:[%s5503_s30] sm:$0xff]  ;;  %v492_v12 = vld [vmem:[%s5503_s30 + $0x8] sm:$0xff]  ;;  %v466_v13 = vld [vmem:[%s5498_s27 + $0x38] sm:$0xff] }
  0x1b   : > { %2446 = vperm.xlu0 %4887, %v460_v4   ;;  %2443 = vperm.xlu2 %4886, %v459_v5   ;;  %v467_v10 = vld [vmem:[%s5498_s27 + $0x40] sm:$0xff]  ;;  %v470_v14 = vld [vmem:[%s5498_s27 + $0x58] sm:$0xff]  ;;  %v493_v16 = vld [vmem:[%s5503_s30 + $0x10] sm:$0xff] }
  0x1c   : > { %4464 = vmatpush.msk.msra.mxu0 %vm657_vm0, %v555_v7  ;;  %v463_v15 = vld [vmem:[%s5498_s27 + $0x20] sm:$0xff]  ;;  %v469_v17 = vld [vmem:[%s5498_s27 + $0x50] sm:$0xff]  ;;  %v494_v20 = vld [vmem:[%s5503_s30 + $0x18] sm:$0xff] }
  0x1d   : > { %4465 = vmatmul.msk.f32.vlgmr.msra.gmra.mxu0 %vm8642_vm1, %v491_v8  ;;  %v473_v18 = vld [vmem:[%s5498_s27 + $0x70] sm:$0xff]  ;;  %v472_v21 = vld [vmem:[%s5498_s27 + $0x68] sm:$0xff]  ;;  %v495_v24 = vld [vmem:[%s5503_s30 + $0x20] sm:$0xff]  ;;  %v2440_v8 = vlaneseq }
  0x1e   : > { %v465_v19 = vld [vmem:[%s5498_s27 + $0x30] sm:$0xff]  ;;  %v476_v22 = vld [vmem:[%s5498_s27 + $0x88] sm:$0xff]  ;;  %v475_v25 = vld [vmem:[%s5498_s27 + $0x80] sm:$0xff] }
  0x1f   : > { %v468_v23 = vld [vmem:[%s5498_s27 + $0x48] sm:$0xff]  ;;  %v479_v26 = vld [vmem:[%s5498_s27 + $0xa0] sm:$0xff]  ;;  %v478_v29 = vld [vmem:[%s5498_s27 + $0x98] sm:$0xff] }
  0x20   : > { %v471_v27 = vld [vmem:[%s5498_s27 + $0x60] sm:$0xff]  ;;  %v496_v28 = vld [vmem:[%s5503_s30 + $0x28] sm:$0xff]  ;;  %v482_v30 = vld [vmem:[%s5498_s27 + $0xb8] sm:$0xff] }
  0x21   : > { %v474_v31 = vld [vmem:[%s5498_s27 + $0x78] sm:$0xff]  ;;  %v497_v32 = vld [vmem:[%s5503_s30 + $0x30] sm:$0xff]  ;;  %v4827_v39 = vld [vmem:[%s8605_s3 + $0x28] sm:$0xff] }
  0x22   : > { %2458 = vperm.xlu1 %4888, %v464_v9   ;;  %v4829_v33 = vld [vmem:[%s8605_s3 + $0x38] sm:$0xff]  ;;  %v481_v34 = vld [vmem:[%s5498_s27 + $0xb0] sm:$0xff]  ;;  %v484_v40 = vld [vmem:[%s5498_s27 + $0xc8] sm:$0xff] }
  0x23   : > { %2467 = vperm.xlu0 %4887, %v467_v10   ;;  %2452 = vperm.xlu2 %4886, %v462_v11   ;;  %v485_v35 = vld [vmem:[%s5498_s27 + $0xd0] sm:$0xff]  ;;  %v498_v37 = vld [vmem:[%s5503_s30 + $0x38] sm:$0xff]  ;;  %v488_v41 = vld [vmem:[%s5498_s27 + $0xe8] sm:$0xff] }
  0x24   : > { %2922 = vmatpush.bf16.msra.mxu2 %v4829_v33  ;;  %v477_v36 = vld [vmem:[%s5498_s27 + $0x90] sm:$0xff]  ;;  %v480_v42 = vld [vmem:[%s5498_s27 + $0xa8] sm:$0xff]  ;;  %v499_v43 = vld [vmem:[%s5503_s30 + $0x40] sm:$0xff] }
  0x25   : > { %4466 = vmatmul.msk.f32.gmra.mxu0 %vm8642_vm1, %v492_v12  ;;  %v4828_v38 = vld [vmem:[%s8605_s3 + $0x30] sm:$0xff]  ;;  %v4826_v44 = vld [vmem:[%s8605_s3 + $0x20] sm:$0xff]  ;;  %v4825_v45 = vld [vmem:[%s8605_s3 + $0x18] sm:$0xff]  ;;  %v5612_v12 = vand.u32 127, %v2440_v8 }
  0x26   : > { %v487_v46 = vld [vmem:[%s5498_s27 + $0xe0] sm:$0xff]  ;;  %v500_v49 = vld [vmem:[%s5503_s30 + $0x48] sm:$0xff]  ;;  %v4824_v50 = vld [vmem:[%s8605_s3 + $0x10] sm:$0xff] }
  0x27   : > { %v483_v47 = vld [vmem:[%s5498_s27 + $0xc0] sm:$0xff]  ;;  %v4823_v51 = vld [vmem:[%s8605_s3 + $0x8] sm:$0xff]  ;;  %v490_v52 = vld [vmem:[%s5498_s27 + $0xf8] sm:$0xff] }
  0x28   : > { %2923 = vmatpush.bf16.msra.mxu2 %v4828_v38  ;;  %v427_v48 = vld [vmem:[%s5493_s24] sm:$0xff]  ;;  %v486_v53 = vld [vmem:[%s5498_s27 + $0xd8] sm:$0xff]  ;;  %v501_v55 = vld [vmem:[%s5503_s30 + $0x50] sm:$0xff] }
  0x29   : > { %v430_v54 = vld [vmem:[%s5493_s24 + $0x18] sm:$0xff]  ;;  %v4822_v56 = vld [vmem:[%s8605_s3] sm:$0xff]  ;;  %v429_v57 = vld [vmem:[%s5493_s24 + $0x10] sm:$0xff] }
  0x2a   : > { %2464 = vperm.xlu1 %4888, %v466_v13   ;;  %v489_v58 = vld [vmem:[%s5498_s27 + $0xf0] sm:$0xff]  ;;  %v502_v60 = vld [vmem:[%s5503_s30 + $0x58] sm:$0xff]  ;;  %v432_v62 = vld [vmem:[%s5493_s24 + $0x28] sm:$0xff] }
  0x2b   : > { %2476 = vperm.xlu0 %4887, %v470_v14   ;;  %2455 = vperm.xlu2 %4886, %v463_v15   ;;  %v433_v59 = vld [vmem:[%s5493_s24 + $0x30] sm:$0xff]  ;;  %v428_v63 = vld [vmem:[%s5493_s24 + $0x8] sm:$0xff]  ;;  %v503_v1 = vld [vmem:[%s5503_s30 + $0x60] sm:$0xff] }
  0x2c   : > { %2924 = vmatpush.bf16.msra.mxu2 %v4827_v39  ;;  %v436_v0 = vld [vmem:[%s5493_s24 + $0x48] sm:$0xff]  ;;  %v435_v3 = vld [vmem:[%s5493_s24 + $0x40] sm:$0xff]  ;;  %v438_v9 = vld [vmem:[%s5493_s24 + $0x58] sm:$0xff] }
  0x2d   : > { %4467 = vmatmul.msk.f32.gmra.mxu0 %vm8642_vm1, %v493_v16  ;;  %v431_v4 = vld [vmem:[%s5493_s24 + $0x20] sm:$0xff]  ;;  %v504_v6 = vld [vmem:[%s5503_s30 + $0x68] sm:$0xff]  ;;  %v434_v10 = vld [vmem:[%s5493_s24 + $0x38] sm:$0xff] }
  0x2e   : > { %v439_v5 = vld [vmem:[%s5493_s24 + $0x60] sm:$0xff]  ;;  %v442_v11 = vld [vmem:[%s5493_s24 + $0x78] sm:$0xff]  ;;  %v505_v13 = vld [vmem:[%s5503_s30 + $0x70] sm:$0xff] }
  0x2f   : > { %v1417_v39 = vld [vmem:[%s8609_s7 + $0x18] sm:$0xff] }
  0x30   : > { %2925 = vmatpush.bf16.msra.mxu2 %v4826_v44  ;;  %1531 = vmatpush.msra.mxu1 %v1417_v39  ;;  %v443_v44 = vld [vmem:[%s5493_s24 + $0x80] sm:$0xff] }
  0x31   : > { %v4830_v39 = vld [vmem:[%s8606_s4] sm:$0xff] }
  0x32   : > { %2473 = vperm.xlu1 %4888, %v469_v17  }
  0x33   : > { %2485 = vperm.xlu0 %4887, %v473_v18   ;;  %2461 = vperm.xlu2 %4886, %v465_v19   ;;  %v441_v18 = vld [vmem:[%s5493_s24 + $0x70] sm:$0xff]  ;;  %v8646_v19 = vmov 1.0|1.0  }
  0x34   : > { %2926 = vmatpush.bf16.msra.mxu2 %v4825_v45  ;;  %v451_v45 = vld [vmem:[%s5493_s24 + $0xc0] sm:$0xff] }
  0x35   : > { %4468 = vmatmul.msk.f32.gmra.mxu0 %vm8642_vm1, %v494_v20  ;;  %v437_v20 = vld [vmem:[%s5493_s24 + $0x50] sm:$0xff] }
  0x38   : > { %2927 = vmatpush.bf16.msra.mxu2 %v4824_v50  ;;  %v4834_v50 = vld [vmem:[%s8606_s4 + $0x20] sm:$0xff] }
  0x3a   : > { %2482 = vperm.xlu1 %4888, %v472_v21   ;;  %v445_v21 = vld [vmem:[%s5493_s24 + $0x90] sm:$0xff] }
  0x3b   : > { %2494 = vperm.xlu0 %4887, %v476_v22   ;;  %2470 = vperm.xlu2 %4886, %v468_v23   ;;  %v506_v22 = vld [vmem:[%s5503_s30 + $0x78] sm:$0xff] }
  0x3c   : > { %2928 = vmatpush.bf16.msra.mxu2 %v4823_v51 }
  0x3d   : > { %4469 = vmatmul.msk.f32.gmra.mxu0 %vm8642_vm1, %v495_v24 }
  0x40   : > { %2929 = vmatpush.bf16.msra.mxu2 %v4822_v56 }
  0x42   : > { %2491 = vperm.xlu1 %4888, %v475_v25  }
  0x43   : > { %2503 = vperm.xlu0 %4887, %v479_v26   ;;  %2479 = vperm.xlu2 %4886, %v471_v27   ;;  %v444_v26 = vld [vmem:[%s5493_s24 + $0x88] sm:$0xff]  ;;  %v5654_v27 = vld [vmem:[%s8608_s6] ss:$0 sm:$0xff] }
  0x45   : > { %4470 = vmatmul.msk.f32.gmra.mxu0 %vm8642_vm1, %v496_v28  ;;  %v4837_v28 = vld [vmem:[%s8606_s4 + $0x38] sm:$0xff] }
  0x46   : > { %3075 = vmatpush.bf16.msra.mxu3 %v4837_v28  ;;  %v457_v28 = vld [vmem:[%s5493_s24 + $0xf0] sm:$0xff] }
  0x4a   : > { %2500 = vperm.xlu1 %4888, %v478_v29   ;;  %v440_v29 = vld [vmem:[%s5493_s24 + $0x68] sm:$0xff] }
  0x4b   : > { %2512 = vperm.xlu0 %4887, %v482_v30   ;;  %2488 = vperm.xlu2 %4886, %v474_v31   ;;  %v448_v30 = vld [vmem:[%s5493_s24 + $0xa8] sm:$0xff] }
  0x4d   : > { %4471 = vmatmul.msk.f32.gmra.mxu0 %vm8642_vm1, %v497_v32  ;;  %v507_v32 = vld [vmem:[%s5503_s30 + $0x80] sm:$0xff] }
  0x52   : > { %2509 = vperm.xlu1 %4888, %v481_v34   ;;  %v4836_v34 = vld [vmem:[%s8606_s4 + $0x30] sm:$0xff] }
  0x53   : > { %2521 = vperm.xlu0 %4887, %v485_v35   ;;  %2497 = vperm.xlu2 %4886, %v477_v36  }
  0x54   : > { %3076 = vmatpush.bf16.msra.mxu3 %v4836_v34 }
  0x55   : > { %4472 = vmatmul.msk.f32.gmra.mxu0 %vm8642_vm1, %v498_v37 }
  0x5a   : > { %2518 = vperm.xlu1 %4888, %v484_v40   ;;  %v447_v40 = vld [vmem:[%s5493_s24 + $0xa0] sm:$0xff] }
  0x5b   : > { %2530 = vperm.xlu0 %4887, %v488_v41   ;;  %2506 = vperm.xlu2 %4886, %v480_v42   ;;  %v1416_v42 = vld [vmem:[%s8609_s7 + $0x10] sm:$0xff] }
  0x5c   : > { %1532 = vmatpush.msra.mxu1 %v1416_v42 }
  0x5d   : > { %4473 = vmatmul.msk.f32.gmra.mxu0 %vm8642_vm1, %v499_v43  ;;  %v4835_v43 = vld [vmem:[%s8606_s4 + $0x28] sm:$0xff] }
  0x5e   : > { %3077 = vmatpush.bf16.msra.mxu3 %v4835_v43 }
  0x62   : > { %2527 = vperm.xlu1 %4888, %v487_v46   ;;  %v1415_v46 = vld [vmem:[%s8609_s7 + $0x8] sm:$0xff]  ;;  %3078 = vmatpush.bf16.msra.mxu3 %v4834_v50 }
  0x63   : > { %2515 = vperm.xlu2 %4886, %v483_v47   ;;  %2651 = vperm.xlu0 %4887, %v427_v48  }
  0x64   : > { %1533 = vmatpush.msra.mxu1 %v1415_v46 }
  0x65   : > { %4474 = vmatmul.msk.f32.gmra.mxu0 %vm8642_vm1, %v500_v49  ;;  %v1414_v49 = vld [vmem:[%s8609_s7] sm:$0xff] }
  0x66   : > { %1534 = vmatpush.msra.mxu1 %v1414_v49 }
  0x6a   : > { %2536 = vperm.xlu1 %4888, %v490_v52  }
  0x6b   : > { %2524 = vperm.xlu2 %4886, %v486_v53   ;;  %2660 = vperm.xlu0 %4887, %v430_v54  }
  0x6d   : > { %4475 = vmatmul.msk.f32.gmra.mxu0 %vm8642_vm1, %v501_v55 }
  0x72   : > { %2657 = vperm.xlu1 %4888, %v429_v57  }
  0x73   : > { %2533 = vperm.xlu2 %4886, %v489_v58   ;;  %2669 = vperm.xlu0 %4887, %v433_v59   ;;  %v450_v58 = vld [vmem:[%s5493_s24 + $0xb8] sm:$0xff] }
  0x74   : > { %v4833_v59 = vld [vmem:[%s8606_s4 + $0x18] sm:$0xff] }
  0x75   : > { %v5592_v61 = vpop.permute.xlu2 %2443  ;;  %4476 = vmatmul.msk.f32.gmra.mxu0 %vm8642_vm1, %v502_v60  ;;  %v446_v60 = vld [vmem:[%s5493_s24 + $0x98] sm:$0xff]  ;;  %3079 = vmatpush.bf16.msra.mxu3 %v4833_v59  ;;  %v456_v59 = vld [vmem:[%s5493_s24 + $0xe8] sm:$0xff] }
  0x76   : > { %8711 = vst [vmem:[#allocation8_spill] sm:$0xff] %v5592_v61  ;;  %vm8633_vm2 = vcmp.eq.s32.totalorder %v5592_v61, %v5612_v12 }
  0x7a   : > { %2666 = vperm.xlu1 %4888, %v432_v62   ;;  %v454_v62 = vld [vmem:[%s5493_s24 + $0xd8] sm:$0xff] }
  0x7b   : > { %2654 = vperm.xlu2 %4886, %v428_v63   ;;  %2678 = vperm.xlu0 %4887, %v436_v0  }
  0x7d   : > { %v5599_v2 = vpop.permute.xlu2 %2452  ;;  %4477 = vmatmul.msk.f32.gmra.mxu0 %vm8642_vm1, %v503_v1  ;;  %v4832_v1 = vld [vmem:[%s8606_s4 + $0x10] sm:$0xff] }
  0x7e   : > { %vm8619_vm6 = vcmp.eq.s32.totalorder %v5599_v2, %v5612_v12  ;;  %3080 = vmatpush.bf16.msra.mxu3 %v4832_v1 }
  0x82   : > { %2675 = vperm.xlu1 %4888, %v435_v3  }
  0x83   : > { %2663 = vperm.xlu2 %4886, %v431_v4   ;;  %2687 = vperm.xlu0 %4887, %v439_v5  }
  0x85   : > { %v5606_v7 = vpop.permute.xlu2 %2455  ;;  %4478 = vmatmul.msk.f32.gmra.mxu0 %vm8642_vm1, %v504_v6 }
  0x86   : > { %8712 = vst [vmem:[#allocation9_spill] sm:$0xff] %v5606_v7  ;;  %vm8624_vm14 = vcmp.eq.s32.totalorder %v5606_v7, %v5612_v12 }
  0x8a   : > { %2684 = vperm.xlu1 %4888, %v438_v9  }
  0x8b   : > { %2672 = vperm.xlu2 %4886, %v434_v10   ;;  %2696 = vperm.xlu0 %4887, %v442_v11  }
  0x8c   : > { %v5615_v14 = vpop.permute.xlu1 %2449 }
  0x8d   : > { %v5617_v15 = vpop.permute.xlu0 %2446  ;;  %v5619_v16 = vpop.permute.xlu2 %2461  ;;  %4479 = vmatmul.msk.f32.gmra.mxu0 %vm8642_vm1, %v505_v13  ;;  %vm8618_vm5 = vcmp.eq.s32.totalorder %v5615_v14, %v5612_v12 }
  0x8e   : > { %8713 = vst [vmem:[#allocation10_spill] sm:$0xff] %v5617_v15  ;;  %vm8621_vm3 = vcmp.eq.s32.totalorder %v5617_v15, %v5612_v12  ;;  %vm5690_vm7 = vmpackc.low %vm8619_vm6, %vm8618_vm5 }
  0x8f   : > { %vm5632_vm4 = vmpackc.low %vm8621_vm3, %vm8633_vm2 }
  0x90   : > { %4690 = vmatmul.msk.bf16.vlgmr.msra.gmra.mxu2 %vm5632_vm4, %v8646_v19 }
  0x92   : > { %2693 = vperm.xlu1 %4888, %v441_v18  }
  0x93   : > { %2681 = vperm.xlu2 %4886, %v437_v20   ;;  %2705 = vperm.xlu0 %4887, %v445_v21   ;;  %v453_v20 = vld [vmem:[%s5493_s24 + $0xd0] sm:$0xff]  ;;  %v4831_v21 = vld [vmem:[%s8606_s4 + $0x8] sm:$0xff] }
  0x94   : > { %v5643_v23 = vpop.permute.xlu1 %2458  ;;  %3081 = vmatpush.bf16.msra.mxu3 %v4831_v21 }
  0x95   : > { %8716 = vst [vmem:[#allocation11_spill] sm:$0xff] %v5643_v23  ;;  %v5645_v24 = vpop.permute.xlu0 %2467  ;;  %v5647_v25 = vpop.permute.xlu2 %2470  ;;  %4480 = vmatmul.msk.f32.gmra.mxu0 %vm8642_vm1, %v506_v22  ;;  %vm8620_vm11 = vcmp.eq.s32.totalorder %v5643_v23, %v5612_v12 }
  0x96   : > { %vm5790_vm0 = vmpackc.low %vm8620_vm11, %vm8624_vm14  ;;  %vm8626_vm6 = vcmp.eq.s32.totalorder %v5645_v24, %v5612_v12  ;;  %vm8625_vm11 = vcmp.eq.s32.totalorder %v5647_v25, %v5612_v12 }
  0x98   : > { %3082 = vmatpush.bf16.msra.mxu3 %v4830_v39 }
  0x9a   : > { %2702 = vperm.xlu1 %4888, %v444_v26   ;;  %v678_v31 = vpop.f32.mrf.mxu0  ;;  %v449_v26 = vld [vmem:[%s5493_s24 + $0xb0] sm:$0xff] }
  0x9b   : > { %2690 = vperm.xlu2 %4886, %v440_v29   ;;  %2714 = vperm.xlu0 %4887, %v448_v30   ;;  %v5663_v33 = vadd.f32 %v5654_v27, %v678_v31 }
  0x9c   : > { %v5670_v35 = vpop.permute.xlu1 %2464 }
  0x9d   : > { %v5672_v36 = vpop.permute.xlu0 %2476  ;;  %v5674_v37 = vpop.permute.xlu2 %2479  ;;  %v4497_v38 = vmul.f32 -1.442695, %v5663_v33  ;;  %4481 = vmatmul.msk.f32.gmra.mxu0 %vm8642_vm1, %v507_v32 }
  0x9e   : > { %8717 = vst [vmem:[#allocation12_spill] sm:$0xff] %v5674_v37  ;;  %vm8617_vm12 = vcmp.eq.s32.totalorder %v5674_v37, %v5612_v12 }
  0x9f   : > { %4973 = vpow2.f32 %v4497_v38 }
  0xa0   : > { %4692 = vmatmul.msk.bf16.gmra.mxu2 %vm5690_vm7, %v8646_v19 }
  0xa2   : > { %2711 = vperm.xlu1 %4888, %v447_v40   ;;  %v681_v47 = vpop.f32.mrf.mxu0 }
  0xa3   : > { %2699 = vperm.xlu2 %4886, %v443_v44   ;;  %2723 = vperm.xlu0 %4887, %v451_v45   ;;  %v5709_v48 = vadd.f32 %v5654_v27, %v681_v47 }
  0xa4   : > { %v5717_v51 = vpop.permute.xlu1 %2473 }
  0xa5   : > { %v4974_v52 = vpop.eup %4973  ;;  %v5719_v53 = vpop.permute.xlu0 %2485  ;;  %v4498_v55 = vmul.f32 -1.442695, %v5709_v48 }
  0xa6   : > { %8720 = vst [vmem:[#allocation13_spill] sm:$0xff] %v5719_v53  ;;  %v5721_v54 = vpop.permute.xlu2 %2488  ;;  %v5724_v56 = vadd.f32 1.0, %v4974_v52  ;;  %vm8615_vm8 = vcmp.eq.s32.totalorder %v5719_v53, %v5612_v12 }
  0xa7   : > { %8721 = vst [vmem:[#allocation14_spill] sm:$0xff] %v5721_v54  ;;  %vm8614_vm9 = vcmp.eq.s32.totalorder %v5721_v54, %v5612_v12  ;;  %4975 = vpow2.f32 %v4498_v55 }
  0xa8   : > { %vm5736_vm10 = vmpackc.low %vm8614_vm9, %vm8615_vm8  ;;  %4977 = vrcp.f32 %v5724_v56  ;;  %v913_v22 = vand.u32 2147483648, %v5724_v56  ;;  %vm8623_vm9 = vcmp.eq.s32.totalorder %v5717_v51, %v5612_v12  ;;  %vm907_vm8 = vweird.f32 %v5724_v56 }
  0xa9   : > { %4786 = vmatpush.bf16.msk.msra.mxu0 %vm5736_vm10, %v8646_v19  ;;  %v911_v30 = vand.u32 2147483647, %v5724_v56 }
  0xaa   : > { %2720 = vperm.xlu1 %4888, %v450_v58   ;;  %v684_v63 = vpop.f32.mrf.mxu0  ;;  %v914_v42 = vor.u32 1.1754944e-38, %v913_v22 }
  0xab   : > { %2708 = vperm.xlu2 %4886, %v446_v60   ;;  %2732 = vperm.xlu0 %4887, %v454_v62   ;;  %v5751_v0 = vadd.f32 %v5654_v27, %v684_v63  ;;  %v452_v63 = vld [vmem:[%s5493_s24 + $0xc8] sm:$0xff] }
  0xac   : > { %v5758_v3 = vpop.permute.xlu1 %2482 }
  0xad   : > { %8724 = vst [vmem:[#allocation15_spill] sm:$0xff] %v5758_v3  ;;  %v4976_v4 = vpop.eup %4975  ;;  %vm8616_vm13 = vcmp.eq.s32.totalorder %v5758_v3, %v5612_v12  ;;  %v5764_v5 = vpop.permute.xlu0 %2494  ;;  %v4499_v8 = vmul.f32 -1.442695, %v5751_v0 }
  0xae   : > { %8725 = vst [vmem:[#allocation16_spill] sm:$0xff] %v5764_v5  ;;  %v5766_v6 = vpop.permute.xlu2 %2497  ;;  %v4978_v9 = vpop.eup %4977  ;;  %v5771_v10 = vadd.f32 1.0, %v4976_v4  ;;  %vm5779_vm15 = vmpackc.low %vm8616_vm13, %vm8617_vm12  ;;  %vm8622_vm12 = vcmp.eq.s32.totalorder %v5672_v36, %v5612_v12 }
  0xaf   : > { %8726 = vst [vmem:[#allocation17_spill] sm:$0xff] %v5766_v6  ;;  %v903_v13 = vmul.f32 %v4978_v9, %v5724_v56  ;;  %4788 = vmatpush.bf16.msk.msra.mxu0 %vm5779_vm15, %v8646_v19  ;;  %4979 = vpow2.f32 %v4499_v8  ;;  %vm908_vm13 = vweird.f32 %v4978_v9  ;;  %vm5820_vm5 = vmpackc.low %vm8622_vm12, %vm8623_vm9  ;;  %vm912_vm12 = vcmp.eq.f32.partialorder %v911_v30, 8.507059e+37 }
  0xb0   : > { %4981 = vrcp.f32 %v5771_v10  ;;  %4694 = vmatmul.msk.bf16.gmra.mxu2 %vm5790_vm0, %v8646_v19  ;;  %vm5836_vm3 = vmor %vm907_vm8, %vm908_vm13  ;;  %vm8632_vm8 = vcmp.eq.s32.totalorder %v5670_v35, %v5612_v12  ;;  %vm8643_vm9 = vcmask 261120   ;;  %vm922_vm14 = vweird.f32 %v5771_v10 }
  0xb1   : > { %v904_v29 = vsub.f32 1.0, %v903_v13  ;;  %vm5861_vm13 = vmpackc.low %vm8625_vm11, %vm8626_vm6  ;;  %v928_v62 = vand.u32 2147483648, %v5771_v10  ;;  %v926_v8 = vand.u32 2147483647, %v5771_v10  ;;  %vm8627_vm11 = vcmp.eq.s32.totalorder %v5619_v16, %v5612_v12 }
  0xb2   : > { %2729 = vperm.xlu1 %4888, %v453_v20   ;;  %v687_v31 = vpop.f32.mrf.mxu0 }
  0xb3   : > { %v905_v32 = vmul.f32 %v4978_v9, %v904_v29  ;;  %2717 = vperm.xlu2 %4886, %v449_v26   ;;  %2741 = vperm.xlu0 %4887, %v457_v28   ;;  %v5825_v38 = vadd.f32 %v5654_v27, %v687_v31  ;;  %v929_v22 = vor.u32 1.1754944e-38, %v928_v62 }
  0xb4   : > { %4790 = vmatpush.bf16.msk.msra.mxu0 %vm5820_vm5, %v8646_v19  ;;  %v5843_v43 = vpop.permute.xlu1 %2491 }
  0xb5   : > { %8735 = vst [vmem:[#allocation18_spill] sm:$0xff] %v5843_v43  ;;  %v4980_v44 = vpop.eup %4979  ;;  %v906_v45 = vadd.f32 %v4978_v9, %v905_v32  ;;  %v5845_v46 = vpop.permute.xlu0 %2503  ;;  %v4500_v49 = vmul.f32 -1.442695, %v5825_v38 }
  0xb6   : > { %8736 = vst [vmem:[#allocation19_spill] sm:$0xff] %v5845_v46  ;;  %v5847_v47 = vpop.permute.xlu2 %2506  ;;  %v4982_v50 = vpop.eup %4981  ;;  %v872_v52 = vadd.f32 1.0, %v4980_v44 }
  0xb7   : > { %8737 = vst [vmem:[#allocation20_spill] sm:$0xff] %v5847_v47  ;;  %v910_v55 = vsel %vm5836_vm3, %v4978_v9, %v906_v45  ;;  %v918_v56 = vmul.f32 %v4982_v50, %v5771_v10  ;;  %4983 = vpow2.f32 %v4500_v49  ;;  %vm923_vm3 = vweird.f32 %v4982_v50  ;;  %v455_v49 = vld [vmem:[%s5493_s24 + $0xe0] sm:$0xff] }
  0xb8   : > { %v915_v60 = vsel %vm912_vm12, %v914_v42, %v910_v55  ;;  %4985 = vrcp.f32 %v872_v52  ;;  %4792 = vmatpush.bf16.msk.msra.mxu0 %vm5861_vm13, %v8646_v19  ;;  %vm5882_vm12 = vmpackc.low %vm8632_vm8, %vm8627_vm11  ;;  %vm927_vm11 = vcmp.eq.f32.partialorder %v926_v8, 8.507059e+37  ;;  %v943_v45 = vand.u32 2147483648, %v872_v52 }
  0xb9   : > { %v1382_v1 = vmul.f32 %v915_v60, %v5663_v33  ;;  %v919_v4 = vsub.f32 1.0, %v918_v56  ;;  %vm5892_vm6 = vmor %vm922_vm14, %vm923_vm3  ;;  %vm937_vm14 = vweird.f32 %v872_v52 }
  0xba   : > { %2738 = vperm.xlu1 %4888, %v456_v59   ;;  %v690_v9 = vpop.f32.mrf.mxu0  ;;  %v944_v18 = vor.u32 1.1754944e-38, %v943_v45 }
  0xbb   : > { %v920_v13 = vmul.f32 %v4982_v50, %v919_v4  ;;  %2726 = vperm.xlu2 %4886, %v452_v63   ;;  %v5887_v33 = vadd.f32 %v5654_v27, %v690_v9  ;;  %4529 = vmatmul.msk.f32.vlgmr.msra.gmra.mxu1 %vm8643_vm9, %v1382_v1 }
  0xbc   : > { %4794 = vmatpush.bf16.msk.msra.mxu0 %vm5882_vm12, %v8646_v19  ;;  %v5899_v26 = vpop.permute.xlu1 %2500 }
  0xbd   : > { %8744 = vst [vmem:[#allocation21_spill] sm:$0xff] %v5899_v26  ;;  %v4984_v28 = vpop.eup %4983  ;;  %v921_v29 = vadd.f32 %v4982_v50, %v920_v13  ;;  %v5901_v30 = vpop.permute.xlu0 %2512  ;;  %v4501_v10 = vmul.f32 -1.442695, %v5887_v33 }
  0xbe   : > { %8745 = vst [vmem:[#allocation22_spill] sm:$0xff] %v5901_v30  ;;  %v5903_v31 = vpop.permute.xlu2 %2515  ;;  %v4986_v32 = vpop.eup %4985  ;;  %v873_v39 = vadd.f32 1.0, %v4984_v28 }
  0xbf   : > { %8746 = vst [vmem:[#allocation23_spill] sm:$0xff] %v5903_v31  ;;  %v925_v40 = vsel %vm5892_vm6, %v4982_v50, %v921_v29  ;;  %v933_v42 = vmul.f32 %v4986_v32, %v872_v52  ;;  %4987 = vpow2.f32 %v4501_v10  ;;  %vm938_vm3 = vweird.f32 %v4986_v32  ;;  %v458_v29 = vld [vmem:[%s5493_s24 + $0xf8] sm:$0xff] }
  0xc0   : > { %v930_v44 = vsel %vm927_vm11, %v929_v22, %v925_v40  ;;  %4989 = vrcp.f32 %v873_v39  ;;  %4696 = vmatmul.msk.bf16.gmra.mxu2 %vm5882_vm12, %v8646_v19  ;;  %4796 = vmatpush.bf16.msk.msra.mxu0 %vm5790_vm0, %v8646_v19  ;;  %v941_v50 = vand.u32 2147483647, %v872_v52  ;;  %vm5921_vm6 = vmor %vm937_vm14, %vm938_vm3  ;;  %v958_v28 = vand.u32 2147483648, %v873_v39 }
  0xc1   : > { %v1383_v55 = vmul.f32 %v930_v44, %v5709_v48  ;;  %v934_v56 = vsub.f32 1.0, %v933_v42  ;;  %v956_v42 = vand.u32 2147483647, %v873_v39 }
  0xc2   : > { %v693_v59 = vpop.f32.mrf.mxu0  ;;  %vm942_vm11 = vcmp.eq.f32.partialorder %v941_v50, 8.507059e+37  ;;  %v959_v17 = vor.u32 1.1754944e-38, %v958_v28 }
  0xc3   : > { %v935_v60 = vmul.f32 %v4986_v32, %v934_v56  ;;  %2735 = vperm.xlu2 %4886, %v455_v49   ;;  %4530 = vmatmul.msk.f32.gmra.mxu1 %vm8643_vm9, %v1383_v55  ;;  %v5918_v62 = vadd.f32 %v5654_v27, %v693_v59 }
  0xc4   : > { %4798 = vmatpush.bf16.msk.msra.mxu0 %vm5690_vm7, %v8646_v19  ;;  %v5928_v48 = vpop.permute.xlu1 %2509  ;;  %vm952_vm7 = vweird.f32 %v873_v39 }
  0xc5   : > { %8749 = vst [vmem:[#allocation24_spill] sm:$0xff] %v5928_v48  ;;  %v4988_v1 = vpop.eup %4987  ;;  %v936_v4 = vadd.f32 %v4986_v32, %v935_v60  ;;  %v5930_v8 = vpop.permute.xlu0 %2521  ;;  %v4502_v52 = vmul.f32 -1.442695, %v5918_v62 }
  0xc6   : > { %8750 = vst [vmem:[#allocation25_spill] sm:$0xff] %v5930_v8  ;;  %v5932_v9 = vpop.permute.xlu2 %2524  ;;  %v4990_v13 = vpop.eup %4989  ;;  %v874_v20 = vadd.f32 1.0, %v4988_v1 }
  0xc7   : > { %8751 = vst [vmem:[#allocation26_spill] sm:$0xff] %v5932_v9  ;;  %v940_v21 = vsel %vm5921_vm6, %v4986_v32, %v936_v4  ;;  %v948_v22 = vmul.f32 %v4990_v13, %v873_v39  ;;  %4991 = vpow2.f32 %v4502_v52  ;;  %vm953_vm0 = vweird.f32 %v4990_v13  ;;  %v508_v4 = vld [vmem:[%s5503_s30 + $0x88] sm:$0xff] }
  0xc8   : > { %v945_v41 = vsel %vm942_vm11, %v944_v18, %v940_v21  ;;  %4993 = vrcp.f32 %v874_v20  ;;  %4800 = vmatpush.bf16.msk.msra.mxu0 %vm5632_vm4, %v8646_v19  ;;  %vm5946_vm12 = vmor %vm952_vm7, %vm953_vm0  ;;  %vm957_vm4 = vcmp.eq.f32.partialorder %v956_v42, 8.507059e+37  ;;  %vm967_vm14 = vweird.f32 %v874_v20 }
  0xc9   : > { %v1384_v10 = vmul.f32 %v945_v41, %v5751_v0  ;;  %v949_v40 = vsub.f32 1.0, %v948_v22  ;;  %v973_v21 = vand.u32 2147483648, %v874_v20  ;;  %4482 = vmatmul.msk.f32.gmra.mxu0 %vm8642_vm1, %v508_v4  ;;  %v971_v28 = vand.u32 2147483647, %v874_v20 }
  0xca   : > { %v696_v44 = vpop.f32.mrf.mxu0 }
  0xcb   : > { %v950_v45 = vmul.f32 %v4990_v13, %v949_v40  ;;  %2744 = vperm.xlu2 %4886, %v458_v29   ;;  %4531 = vmatmul.msk.f32.gmra.mxu1 %vm8643_vm9, %v1384_v10  ;;  %v5944_v32 = vadd.f32 %v5654_v27, %v696_v44  ;;  %v974_v58 = vor.u32 1.1754944e-38, %v973_v21 }
  0xcc   : > { %v5950_v55 = vpop.permute.xlu1 %2518 }
  0xcd   : > { %8754 = vst [vmem:[#allocation27_spill] sm:$0xff] %v5950_v55  ;;  %v4992_v0 = vpop.eup %4991  ;;  %v951_v56 = vadd.f32 %v4990_v13, %v950_v45  ;;  %v5952_v39 = vpop.permute.xlu0 %2530  ;;  %v4503_v59 = vmul.f32 -1.442695, %v5944_v32  ;;  %vm8634_vm2 = vcmp.eq.s32.totalorder %v5950_v55, %v5612_v12 }
  0xce   : > { %8755 = vst [vmem:[#allocation28_spill] sm:$0xff] %v5952_v39  ;;  %v5954_v50 = vpop.permute.xlu2 %2533  ;;  %v4994_v60 = vpop.eup %4993  ;;  %v875_v63 = vadd.f32 1.0, %v4992_v0 }
  0xcf   : > { %8756 = vst [vmem:[#allocation29_spill] sm:$0xff] %v5954_v50  ;;  %v955_v18 = vsel %vm5946_vm12, %v4990_v13, %v951_v56  ;;  %v963_v1 = vmul.f32 %v4994_v60, %v874_v20  ;;  %4995 = vpow2.f32 %v4503_v59  ;;  %vm968_vm3 = vweird.f32 %v4994_v60 }
  0xd0   : > { %v960_v52 = vsel %vm957_vm4, %v959_v17, %v955_v18  ;;  %4698 = vmatmul.msk.bf16.gmra.mxu2 %vm5861_vm13, %v8646_v19  ;;  %4997 = vrcp.f32 %v875_v63  ;;  %vm5969_vm6 = vmor %vm967_vm14, %vm968_vm3  ;;  %vm972_vm13 = vcmp.eq.f32.partialorder %v971_v28, 8.507059e+37  ;;  %vm982_vm12 = vweird.f32 %v875_v63 }
  0xd1   : > { %v1385_v22 = vmul.f32 %v960_v52, %v5825_v38  ;;  %v964_v41 = vsub.f32 1.0, %v963_v1  ;;  %v988_v1 = vand.u32 2147483648, %v875_v63  ;;  %v986_v21 = vand.u32 2147483647, %v875_v63 }
  0xd2   : > { %v699_v29 = vpop.f32.mrf.mxu0  ;;  %vm8629_vm14 = vcmp.eq.s32.totalorder %v5954_v50, %v5612_v12 }
  0xd3   : > { %v965_v13 = vmul.f32 %v4994_v60, %v964_v41  ;;  %4532 = vmatmul.msk.f32.gmra.mxu1 %vm8643_vm9, %v1385_v22  ;;  %v5967_v10 = vadd.f32 %v5654_v27, %v699_v29  ;;  %v989_v29 = vor.u32 1.1754944e-38, %v988_v1 }
  0xd4   : > { %v5973_v42 = vpop.permute.xlu1 %2527 }
  0xd5   : > { %8759 = vst [vmem:[#allocation30_spill] sm:$0xff] %v5973_v42  ;;  %v4996_v44 = vpop.eup %4995  ;;  %v966_v45 = vadd.f32 %v4994_v60, %v965_v13  ;;  %v2652_v49 = vpop.permute.xlu0 %2651  ;;  %v4504_v20 = vmul.f32 -1.442695, %v5967_v10 }
  0xd6   : > { %v2655_v38 = vpop.permute.xlu2 %2654  ;;  %v4998_v17 = vpop.eup %4997  ;;  %vm2746_vm7 = vcmp.eq.s32.totalorder %v2652_v49, %v5612_v12  ;;  %v876_v0 = vadd.f32 1.0, %v4996_v44  ;;  %v8763_v44 = vmov 0 }
  0xd7   : > { %vm2747_vm11 = vcmp.eq.s32.totalorder %v2655_v38, %v5612_v12  ;;  %v970_v56 = vsel %vm5969_vm6, %v4994_v60, %v966_v45  ;;  %v978_v59 = vmul.f32 %v4998_v17, %v875_v63  ;;  %4999 = vpow2.f32 %v4504_v20  ;;  %v509_v20 = vld [vmem:[%s5503_s30 + $0x90] sm:$0xff] }
  0xd8   : > { %vm4753_vm0 = vmpackc.low %vm2747_vm11, %vm2746_vm7  ;;  %v975_v18 = vsel %vm972_vm13, %v974_v58, %v970_v56  ;;  %5001 = vrcp.f32 %v876_v0  ;;  %vm983_vm4 = vweird.f32 %v4998_v17  ;;  %vm987_vm6 = vcmp.eq.f32.partialorder %v986_v21, 8.507059e+37  ;;  %4483 = vmatmul.msk.f32.gmra.mxu0 %vm8642_vm1, %v509_v20 }
  0xd9   : > { %4754 = vmatmul.msk.bf16.vlgmr.msra.gmra.mxu3 %vm4753_vm0, %v8646_v19  ;;  %v1386_v4 = vmul.f32 %v975_v18, %v5887_v33  ;;  %v979_v52 = vsub.f32 1.0, %v978_v59  ;;  %vm5988_vm3 = vmor %vm982_vm12, %vm983_vm4  ;;  %vm8630_vm11 = vcmp.eq.s32.totalorder %v5952_v39, %v5612_v12  ;;  %vm8631_vm0 = vcmp.eq.s32.totalorder %v5973_v42, %v5612_v12 }
  0xda   : > { %v702_v22 = vpop.f32.mrf.mxu0  ;;  %v1001_v59 = vand.u32 2147483647, %v876_v0  ;;  %v1003_v18 = vand.u32 2147483648, %v876_v0  ;;  %vm997_vm12 = vweird.f32 %v876_v0  ;;  %v8789_v39 = vmov 1.0|1.0  }
  0xdb   : > { %v980_v41 = vmul.f32 %v4998_v17, %v979_v52  ;;  %4533 = vmatmul.msk.f32.gmra.mxu1 %vm8643_vm9, %v1386_v4  ;;  %v5984_v60 = vadd.f32 %v5654_v27, %v702_v22 }
  0xdc   : > { %v5992_v33 = vpop.permute.xlu1 %2536 }
  0xdd   : > { %8762 = vst [vmem:[#allocation31_spill] sm:$0xff] %v5992_v33  ;;  %v5000_v13 = vpop.eup %4999  ;;  %v981_v63 = vadd.f32 %v4998_v17, %v980_v41  ;;  %vm8628_vm13 = vcmp.eq.s32.totalorder %v5992_v33, %v5612_v12  ;;  %v4505_v40 = vmul.f32 -1.442695, %v5984_v60  ;;  %v2661_v4 = vpop.permute.xlu0 %2660  ;;  %v1004_v41 = vor.u32 1.1754944e-38, %v1003_v18 }
  0xde   : > { %v5002_v58 = vpop.eup %5001  ;;  %vm6005_vm7 = vmpackc.low %vm8628_vm13, %vm8629_vm14  ;;  %v6009_v45 = vadd.f32 1.0, %v5000_v13  ;;  %vm6049_vm14 = vcmp.eq.f32.partialorder %v1001_v59, 8.507059e+37  ;;  %v510_v59 = vld [vmem:[%s5503_s30 + $0x98] sm:$0xff] }
  0xdf   : > { %v8764_v44 = vsel %vm6005_vm7, 4294967295, %v8763_v44  ;;  %v985_v38 = vsel %vm5988_vm3, %v4998_v17, %v981_v63  ;;  %v993_v49 = vmul.f32 %v5002_v58, %v876_v0  ;;  %4802 = vmatpush.bf16.msk.msra.mxu1 %vm6005_vm7, %v8646_v19  ;;  %5003 = vpow2.f32 %v4505_v40 }
  0xe0   : > { %v990_v56 = vsel %vm987_vm6, %v989_v29, %v985_v38  ;;  %4700 = vmatmul.msk.bf16.gmra.mxu2 %vm5820_vm5, %v8646_v19  ;;  %5005 = vrcp.f32 %v6009_v45  ;;  %vm998_vm4 = vweird.f32 %v5002_v58  ;;  %vm8637_vm3 = vcmp.eq.s32.totalorder %v5930_v8, %v5612_v12  ;;  %vm6035_vm5 = vmpackc.low %vm8630_vm11, %vm8631_vm0  ;;  %4484 = vmatmul.msk.f32.gmra.mxu0 %vm8642_vm1, %v510_v59 }
  0xe1   : > { %v1387_v17 = vmul.f32 %v990_v56, %v5918_v62  ;;  %v994_v1 = vsub.f32 1.0, %v993_v49  ;;  %vm8636_vm6 = vcmp.eq.s32.totalorder %v5932_v9, %v5612_v12  ;;  %vm6045_vm13 = vmor %vm997_vm12, %vm998_vm4  ;;  %vm2749_vm11 = vcmp.eq.s32.totalorder %v2661_v4, %v5612_v12 }
  0xe2   : > { %v705_v62 = vpop.f32.mrf.mxu0  ;;  %vm6062_vm12 = vmpackc.low %vm8636_vm6, %vm8637_vm3  ;;  %vm8635_vm4 = vcmp.eq.s32.totalorder %v5903_v31, %v5612_v12  ;;  %v1016_v4 = vand.u32 2147483647, %v6009_v45  ;;  %vm8640_vm6 = vcmp.eq.s32.totalorder %v5845_v46, %v5612_v12 }
  0xe3   : > { %v995_v0 = vmul.f32 %v5002_v58, %v994_v1  ;;  %4804 = vmatpush.bf16.msk.msra.mxu1 %vm6035_vm5, %v8646_v19  ;;  %v6043_v52 = vadd.f32 %v5654_v27, %v705_v62 }
  0xe4   : > { %v2658_v28 = vpop.permute.xlu1 %2657  ;;  %4534 = vmatmul.msk.f32.gmra.mxu1 %vm8643_vm9, %v1387_v17  ;;  %v1018_v17 = vand.u32 2147483648, %v6009_v45 }
  0xe5   : > { %v5004_v29 = vpop.eup %5003  ;;  %v996_v13 = vadd.f32 %v5002_v58, %v995_v0  ;;  %vm2748_vm0 = vcmp.eq.s32.totalorder %v2658_v28, %v5612_v12  ;;  %v4506_v40 = vmul.f32 -1.442695, %v6043_v52 }
  0xe6   : > { %v5006_v38 = vpop.eup %5005  ;;  %vm4755_vm8 = vmpackc.low %vm2749_vm11, %vm2748_vm0  ;;  %v6069_v49 = vadd.f32 1.0, %v5004_v29  ;;  %vm1012_vm11 = vweird.f32 %v6009_v45 }
  0xe7   : > { %v1000_v20 = vsel %vm6045_vm13, %v5002_v58, %v996_v13  ;;  %v1008_v56 = vmul.f32 %v5006_v38, %v6009_v45  ;;  %4806 = vmatpush.bf16.msk.msra.mxu1 %vm6062_vm12, %v8646_v19  ;;  %5007 = vpow2.f32 %v4506_v40  ;;  %vm1013_vm13 = vweird.f32 %v5006_v38 }
  0xe8   : > { %v1005_v18 = vsel %vm6049_vm14, %v1004_v41, %v1000_v20  ;;  %5009 = vrcp.f32 %v6069_v49  ;;  %vm6095_vm14 = vmpackc.low %vm8634_vm2, %vm8635_vm4  ;;  %v1019_v41 = vor.u32 1.1754944e-38, %v1018_v17  ;;  %vm8641_vm2 = vcmp.eq.s32.totalorder %v5901_v30, %v5612_v12 }
  0xe9   : > { %4756 = vmatmul.msk.bf16.gmra.mxu3 %vm4755_vm8, %v8646_v19  ;;  %v1388_v58 = vmul.f32 %v1005_v18, %v5944_v32  ;;  %v1009_v1 = vsub.f32 1.0, %v1008_v56  ;;  %vm8638_vm8 = vcmp.eq.s32.totalorder %v5928_v48, %v5612_v12  ;;  %vm6109_vm0 = vmor %vm1012_vm11, %vm1013_vm13  ;;  %vm1017_vm4 = vcmp.eq.f32.partialorder %v1016_v4, 8.507059e+37 }
  0xea   : > { %v708_v0 = vpop.f32.mrf.mxu0  ;;  %vm6125_vm11 = vmpackc.low %vm8641_vm2, %vm8638_vm8  ;;  %vm8639_vm13 = vcmp.eq.s32.totalorder %v5847_v47, %v5612_v12  ;;  %vm1027_vm3 = vweird.f32 %v6069_v49  ;;  %v1033_v17 = vand.u32 2147483648, %v6069_v49 }
  0xeb   : > { %v1010_v21 = vmul.f32 %v5006_v38, %v1009_v1  ;;  %4808 = vmatpush.bf16.msk.msra.mxu1 %vm6095_vm14, %v8646_v19  ;;  %v6105_v32 = vadd.f32 %v5654_v27, %v708_v0  ;;  %v1031_v1 = vand.u32 2147483647, %v6069_v49 }
  0xec   : > { %4535 = vmatmul.msk.f32.gmra.mxu1 %vm8643_vm9, %v1388_v58  ;;  %v2667_v4 = vpop.permute.xlu1 %2666 }
  0xed   : > { %v5008_v28 = vpop.eup %5007  ;;  %v1011_v29 = vadd.f32 %v5006_v38, %v1010_v21  ;;  %v4507_v13 = vmul.f32 -1.442695, %v6105_v32  ;;  %vm1032_vm2 = vcmp.eq.f32.partialorder %v1031_v1, 8.507059e+37 }
  0xee   : > { %v5010_v40 = vpop.eup %5009  ;;  %v879_v20 = vadd.f32 1.0, %v5008_v28  ;;  %v1034_v28 = vor.u32 1.1754944e-38, %v1033_v17 }
  0xef   : > { %v1015_v56 = vsel %vm6109_vm0, %v5006_v38, %v1011_v29  ;;  %v1023_v59 = vmul.f32 %v5010_v40, %v6069_v49  ;;  %4810 = vmatpush.bf16.msk.msra.mxu1 %vm6125_vm11, %v8646_v19  ;;  %5011 = vpow2.f32 %v4507_v13  ;;  %vm1028_vm0 = vweird.f32 %v5010_v40 }
  0xf0   : > { %v1020_v18 = vsel %vm1017_vm4, %v1019_v41, %v1015_v56  ;;  %4702 = vmatmul.msk.bf16.gmra.mxu2 %vm5779_vm15, %v8646_v19  ;;  %5013 = vrcp.f32 %v879_v20  ;;  %vm6150_vm4 = vmpackc.low %vm8639_vm13, %vm8640_vm6  ;;  %vm8645_vm15 = vcmp.eq.s32.totalorder %v5899_v26, %v5612_v12  ;;  %vm2751_vm13 = vcmp.eq.s32.totalorder %v2667_v4, %v5612_v12 }
  0xf1   : > { %v1389_v58 = vmul.f32 %v1020_v18, %v5967_v10  ;;  %v1024_v38 = vsub.f32 1.0, %v1023_v59  ;;  %v2664_v10 = vpop.permute.xlu2 %2663  ;;  %vm6164_vm8 = vmor %vm1027_vm3, %vm1028_vm0  ;;  %vm8644_vm6 = vcmp.eq.s32.totalorder %v5766_v6, %v5612_v12  ;;  %v1048_v1 = vand.u32 2147483648, %v879_v20 }
  0xf2   : > { %v711_v11 = vpop.f32.mrf.mxu0  ;;  %vm2750_vm0 = vcmp.eq.s32.totalorder %v2664_v10, %v5612_v12  ;;  %vm6182_vm1 = vmpackc.low %vm8645_vm15, %vm8644_vm6  ;;  %vm1042_vm6 = vweird.f32 %v879_v20 }
  0xf3   : > { %v1025_v21 = vmul.f32 %v5010_v40, %v1024_v38  ;;  %4812 = vmatpush.bf16.msk.msra.mxu1 %vm6150_vm4, %v8646_v19  ;;  %v6160_v22 = vadd.f32 %v5654_v27, %v711_v11  ;;  %vm4757_vm3 = vmpackc.low %vm2751_vm13, %vm2750_vm0 }
  0xf4   : > { %4536 = vmatmul.msk.f32.gmra.mxu1 %vm8643_vm9, %v1389_v58  ;;  %vm8652_vm9 = vcmp.eq.s32.totalorder %v5843_v43, %v5612_v12 }
  0xf5   : > { %v5012_v29 = vpop.eup %5011  ;;  %v1026_v13 = vadd.f32 %v5010_v40, %v1025_v21  ;;  %v4508_v56 = vmul.f32 -1.442695, %v6160_v22 }
  0xf6   : > { %v5014_v59 = vpop.eup %5013  ;;  %v880_v18 = vadd.f32 1.0, %v5012_v29 }
  0xf7   : > { %v1030_v17 = vsel %vm6164_vm8, %v5010_v40, %v1026_v13  ;;  %v1038_v58 = vmul.f32 %v5014_v59, %v879_v20  ;;  %4814 = vmatpush.bf16.msk.msra.mxu1 %vm6182_vm1, %v8646_v19  ;;  %5015 = vpow2.f32 %v4508_v56  ;;  %vm1043_vm15 = vweird.f32 %v5014_v59 }
  0xf8   : > { %v1035_v38 = vsel %vm1032_vm2, %v1034_v28, %v1030_v17  ;;  %5017 = vrcp.f32 %v880_v18  ;;  %v1046_v40 = vand.u32 2147483647, %v879_v20  ;;  %vm8785_vm8 = vcmp.eq.s32.totalorder %v5764_v5, %v5612_v12  ;;  %vm1044_vm2 = vmor %vm1042_vm6, %vm1043_vm15 }
  0xf9   : > { %4758 = vmatmul.msk.bf16.gmra.mxu3 %vm4757_vm3, %v8646_v19  ;;  %v1390_v11 = vmul.f32 %v1035_v38, %v5984_v60  ;;  %v1039_v10 = vsub.f32 1.0, %v1038_v58  ;;  %vm6203_vm13 = vmpackc.low %vm8785_vm8, %vm8652_vm9  ;;  %v1049_v20 = vor.u32 1.1754944e-38, %v1048_v1  ;;  %vm8788_vm3 = vcmask 261120   ;;  %v2673_v1 = vpop.permute.xlu2 %2672 }
  0xfa   : > { %v714_v21 = vpop.f32.mrf.mxu0  ;;  %vm1047_vm0 = vcmp.eq.f32.partialorder %v1046_v40, 8.507059e+37  ;;  %vm1057_vm8 = vweird.f32 %v880_v18  ;;  %vm2753_vm15 = vcmp.eq.s32.totalorder %v2673_v1, %v5612_v12 }
  0xfb   : > { %v1040_v41 = vmul.f32 %v5014_v59, %v1039_v10  ;;  %4816 = vmatpush.bf16.msk.msra.mxu1 %vm6203_vm13, %v8646_v19  ;;  %v6211_v60 = vadd.f32 %v5654_v27, %v714_v21  ;;  %v1063_v19 = vand.u32 2147483648, %v880_v18 }
  0xfc   : > { %4537 = vmatmul.msk.f32.gmra.mxu1 %vm8788_vm3, %v1390_v11  ;;  %v2670_v11 = vpop.permute.xlu0 %2669 }
  0xfd   : > { %v5016_v28 = vpop.eup %5015  ;;  %v1041_v29 = vadd.f32 %v5014_v59, %v1040_v41  ;;  %v4509_v13 = vmul.f32 -1.442695, %v6211_v60  ;;  %v1061_v41 = vand.u32 2147483647, %v880_v18  ;;  %v1064_v57 = vor.u32 1.1754944e-38, %v1063_v19 }
  0xfe   : > { %v5018_v56 = vpop.eup %5017  ;;  %v881_v17 = vadd.f32 1.0, %v5016_v28 }
  0xff   : > { %v1045_v58 = vsel %vm1044_vm2, %v5014_v59, %v1041_v29  ;;  %v1053_v38 = vmul.f32 %v5018_v56, %v880_v18  ;;  %5019 = vpow2.f32 %v4509_v13  ;;  %vm1058_vm6 = vweird.f32 %v5018_v56 }
 0x100   : > { %v1050_v10 = vsel %vm1047_vm0, %v1049_v20, %v1045_v58  ;;  %4704 = vmatmul.msk.bf16.gmra.mxu2 %vm5736_vm10, %v8789_v39  ;;  %5021 = vrcp.f32 %v881_v17  ;;  %vm2752_vm2 = vcmp.eq.s32.totalorder %v2670_v11, %v5612_v12  ;;  %vm1059_vm3 = vmor %vm1057_vm8, %vm1058_vm6  ;;  %vm8790_vm10 = vcmask 261120  }
 0x101   : > { %v1391_v21 = vmul.f32 %v1050_v10, %v6043_v52  ;;  %v1054_v40 = vsub.f32 1.0, %v1053_v38  ;;  %vm1062_vm0 = vcmp.eq.f32.partialorder %v1061_v41, 8.507059e+37  ;;  %vm4759_vm9 = vmpackc.low %vm2753_vm15, %vm2752_vm2  ;;  %vm1072_vm7 = vweird.f32 %v881_v17 }
 0x102   : > { %v717_v42 = vpop.f32.mrf.mxu0  ;;  %v1078_v1 = vand.u32 2147483648, %v881_v17  ;;  %v1076_v11 = vand.u32 2147483647, %v881_v17  ;;  %vm8791_vm15 = vmmov %vm8790_vm10 }
 0x103   : > { %v1055_v28 = vmul.f32 %v5018_v56, %v1054_v40  ;;  %v6220_v59 = vadd.f32 %v5654_v27, %v717_v42 }
 0x104   : > { %4538 = vmatmul.msk.f32.gmra.mxu1 %vm8790_vm10, %v1391_v21  ;;  %vm1077_vm2 = vcmp.eq.f32.partialorder %v1076_v11, 8.507059e+37 }
 0x105   : > { %v5020_v20 = vpop.eup %5019  ;;  %v1056_v29 = vadd.f32 %v5018_v56, %v1055_v28  ;;  %v4510_v52 = vmul.f32 -1.442695, %v6220_v59 }
 0x106   : > { %v5022_v13 = vpop.eup %5021  ;;  %v882_v58 = vadd.f32 1.0, %v5020_v20 }
 0x107   : > { %v1060_v38 = vsel %vm1059_vm3, %v5018_v56, %v1056_v29  ;;  %v1068_v10 = vmul.f32 %v5022_v13, %v881_v17  ;;  %5023 = vpow2.f32 %v4510_v52  ;;  %vm1073_vm8 = vweird.f32 %v5022_v13 }
 0x108   : > { %v1065_v42 = vsel %vm1062_vm0, %v1064_v57, %v1060_v38  ;;  %5025 = vrcp.f32 %v882_v58  ;;  %vm1074_vm6 = vmor %vm1072_vm7, %vm1073_vm8  ;;  %v1079_v56 = vor.u32 1.1754944e-38, %v1078_v1 }
 0x109   : > { %4760 = vmatmul.msk.bf16.gmra.mxu3 %vm4759_vm9, %v8789_v39  ;;  %v1392_v19 = vmul.f32 %v1065_v42, %v6105_v32  ;;  %v1069_v18 = vsub.f32 1.0, %v1068_v10  ;;  %vm1087_vm9 = vweird.f32 %v882_v58  ;;  %v1093_v10 = vand.u32 2147483648, %v882_v58  ;;  %v2676_v42 = vpop.permute.xlu1 %2675  ;;  %vm8792_vm0 = vmmov %vm8791_vm15 }
 0x10a   : > { %v720_v21 = vpop.f32.mrf.mxu0  ;;  %vm2754_vm3 = vcmp.eq.s32.totalorder %v2676_v42, %v5612_v12 }
 0x10b   : > { %v1070_v40 = vmul.f32 %v5022_v13, %v1069_v18  ;;  %v6230_v41 = vadd.f32 %v5654_v27, %v720_v21  ;;  %v1091_v18 = vand.u32 2147483647, %v882_v58  ;;  %v2679_v21 = vpop.permute.xlu0 %2678 }
 0x10c   : > { %4539 = vmatmul.msk.f32.gmra.mxu1 %vm8791_vm15, %v1392_v19  ;;  %vm2755_vm8 = vcmp.eq.s32.totalorder %v2679_v21, %v5612_v12 }
 0x10d   : > { %v5024_v28 = vpop.eup %5023  ;;  %v1071_v57 = vadd.f32 %v5022_v13, %v1070_v40  ;;  %v4511_v20 = vmul.f32 -1.442695, %v6230_v41 }
 0x10e   : > { %v5026_v29 = vpop.eup %5025  ;;  %v883_v52 = vadd.f32 1.0, %v5024_v28 }
 0x10f   : > { %v1075_v32 = vsel %vm1074_vm6, %v5022_v13, %v1071_v57  ;;  %v1083_v38 = vmul.f32 %v5026_v29, %v882_v58  ;;  %5027 = vpow2.f32 %v4511_v20  ;;  %vm1088_vm7 = vweird.f32 %v5026_v29  ;;  %vm4761_vm6 = vmpackc.low %vm2755_vm8, %vm2754_vm3 }
 0x110   : > { %v1080_v17 = vsel %vm1077_vm2, %v1079_v56, %v1075_v32  ;;  %4706 = vmatmul.msk.bf16.gmra.mxu2 %vm6203_vm13, %v8789_v39  ;;  %5029 = vrcp.f32 %v883_v52  ;;  %vm1089_vm10 = vmor %vm1087_vm9, %vm1088_vm7  ;;  %v1094_v56 = vor.u32 1.1754944e-38, %v1093_v10  ;;  %vm1092_vm13 = vcmp.eq.f32.partialorder %v1091_v18, 8.507059e+37 }
 0x111   : > { %v1393_v1 = vmul.f32 %v1080_v17, %v6160_v22  ;;  %v1084_v19 = vsub.f32 1.0, %v1083_v38  ;;  %vm1102_vm15 = vweird.f32 %v883_v52  ;;  %v1108_v38 = vand.u32 2147483648, %v883_v52  ;;  %vm8793_vm7 = vmmov %vm8792_vm0 }
 0x112   : > { %v723_v11 = vpop.f32.mrf.mxu0  ;;  %v1106_v42 = vand.u32 2147483647, %v883_v52 }
 0x113   : > { %v1085_v40 = vmul.f32 %v5026_v29, %v1084_v19  ;;  %v6239_v13 = vadd.f32 %v5654_v27, %v723_v11  ;;  %v1109_v11 = vor.u32 1.1754944e-38, %v1108_v38 }
 0x114   : > { %4540 = vmatmul.msk.f32.gmra.mxu1 %vm8792_vm0, %v1393_v1  ;;  %vm1107_vm3 = vcmp.eq.f32.partialorder %v1106_v42, 8.507059e+37 }
 0x115   : > { %v5028_v4 = vpop.eup %5027  ;;  %v1086_v28 = vadd.f32 %v5026_v29, %v1085_v40  ;;  %v4512_v22 = vmul.f32 -1.442695, %v6239_v13 }
 0x116   : > { %v5030_v57 = vpop.eup %5029  ;;  %v884_v58 = vadd.f32 1.0, %v5028_v4 }
 0x117   : > { %v1090_v20 = vsel %vm1089_vm10, %v5026_v29, %v1086_v28  ;;  %v1098_v32 = vmul.f32 %v5030_v57, %v883_v52  ;;  %5031 = vpow2.f32 %v4512_v22  ;;  %vm1103_vm2 = vweird.f32 %v5030_v57  ;;  %v6250_v29 = vld [vmem:[%s8608_s6] ss:$0 sm:$0xff] }
 0x118   : > { %v1095_v27 = vsel %vm1092_vm13, %v1094_v56, %v1090_v20  ;;  %5033 = vrcp.f32 %v884_v58  ;;  %vm1104_vm9 = vmor %vm1102_vm15, %vm1103_vm2  ;;  %vm1117_vm10 = vweird.f32 %v884_v58  ;;  %v1123_v20 = vand.u32 2147483648, %v884_v58 }
 0x119   : > { %4762 = vmatmul.msk.bf16.gmra.mxu3 %vm4761_vm6, %v8789_v39  ;;  %v1394_v17 = vmul.f32 %v1095_v27, %v6211_v60  ;;  %v1099_v10 = vsub.f32 1.0, %v1098_v32  ;;  %v511_v32 = vld [vmem:[%s5503_s30 + $0xa0] sm:$0xff]  ;;  %v2685_v27 = vpop.permute.xlu1 %2684  ;;  %vm8794_vm13 = vcmask 31744   ;;  %vm8795_vm15 = vmmov %vm8793_vm7 }
 0x11a   : > { %v726_v1 = vpop.f32.mrf.mxu0  ;;  %4485 = vmatmul.msk.f32.gmra.mxu0 %vm8794_vm13, %v511_v32  ;;  %vm2757_vm8 = vcmp.eq.s32.totalorder %v2685_v27, %v5612_v12 }
 0x11b   : > { %v1100_v19 = vmul.f32 %v5030_v57, %v1099_v10  ;;  %v6253_v18 = vadd.f32 %v6250_v29, %v726_v1  ;;  %v1121_v10 = vand.u32 2147483647, %v884_v58  ;;  %v1124_v1 = vor.u32 1.1754944e-38, %v1123_v20  ;;  %v6268_v20 = vpop.f32.mrf.mxu2 }
 0x11c   : > { %4541 = vmatmul.msk.f32.gmra.mxu1 %vm8793_vm7, %v1394_v17 }
 0x11d   : > { %v5032_v21 = vpop.eup %5031  ;;  %v1101_v60 = vadd.f32 %v5030_v57, %v1100_v19  ;;  %v4513_v52 = vmul.f32 -1.442695, %v6253_v18 }
 0x11e   : > { %v5034_v40 = vpop.eup %5033  ;;  %v885_v56 = vadd.f32 1.0, %v5032_v21 }
 0x11f   : > { %v1105_v4 = vsel %vm1104_vm9, %v5030_v57, %v1101_v60  ;;  %v1113_v28 = vmul.f32 %v5034_v40, %v884_v58  ;;  %5035 = vpow2.f32 %v4513_v52  ;;  %vm1118_vm0 = vweird.f32 %v5034_v40  ;;  %v2682_v57 = vpop.permute.xlu2 %2681 }
 0x120   : > { %v1110_v22 = vsel %vm1107_vm3, %v1109_v11, %v1105_v4  ;;  %4708 = vmatmul.msk.bf16.gmra.mxu2 %vm6182_vm1, %v8789_v39  ;;  %5037 = vrcp.f32 %v885_v56  ;;  %vm1119_vm6 = vmor %vm1117_vm10, %vm1118_vm0  ;;  %vm1122_vm1 = vcmp.eq.f32.partialorder %v1121_v10, 8.507059e+37  ;;  %vm2756_vm2 = vcmp.eq.s32.totalorder %v2682_v57, %v5612_v12 }
 0x121   : > { %v1395_v38 = vmul.f32 %v1110_v22, %v6220_v59  ;;  %v1114_v17 = vsub.f32 1.0, %v1113_v28  ;;  %vm4763_vm9 = vmpackc.low %vm2757_vm8, %vm2756_vm2  ;;  %vm1132_vm7 = vweird.f32 %v885_v56  ;;  %v1138_v52 = vand.u32 2147483648, %v885_v56 }
 0x122   : > { %v1136_v22 = vand.u32 2147483647, %v885_v56  ;;  %vm8796_vm0 = vmmov %vm8795_vm15 }
 0x123   : > { %v1115_v42 = vmul.f32 %v5034_v40, %v1114_v17  ;;  %v1139_v27 = vor.u32 1.1754944e-38, %v1138_v52  ;;  %v2933_v0 = vpop.f32.mrf.mxu2 }
 0x124   : > { %4542 = vmatmul.msk.f32.gmra.mxu1 %vm8795_vm15, %v1395_v38  ;;  %vm1137_vm13 = vcmp.eq.f32.partialorder %v1136_v22, 8.507059e+37  ;;  %vm8797_vm15 = vcmask 31744   ;;  %v2694_v22 = vpop.permute.xlu1 %2693 }
 0x125   : > { %v5036_v49 = vpop.eup %5035  ;;  %v1116_v19 = vadd.f32 %v5034_v40, %v1115_v42  ;;  %v2688_v42 = vpop.permute.xlu0 %2687 }
 0x126   : > { %v5038_v11 = vpop.eup %5037  ;;  %v886_v59 = vadd.f32 1.0, %v5036_v49  ;;  %vm2758_vm2 = vcmp.eq.s32.totalorder %v2688_v42, %v5612_v12 }
 0x127   : > { %v1120_v21 = vsel %vm1119_vm6, %v5034_v40, %v1116_v19  ;;  %v1128_v58 = vmul.f32 %v5038_v11, %v885_v56  ;;  %vm1133_vm3 = vweird.f32 %v5038_v11  ;;  %v2691_v56 = vpop.permute.xlu2 %2690 }
 0x128   : > { %v1125_v60 = vsel %vm1122_vm1, %v1124_v1, %v1120_v21  ;;  %5039 = vrcp.f32 %v886_v59  ;;  %vm1134_vm10 = vmor %vm1132_vm7, %vm1133_vm3  ;;  %vm1147_vm8 = vweird.f32 %v886_v59  ;;  %v1151_v19 = vand.u32 2147483647, %v886_v59  ;;  %v512_v21 = vld [vmem:[%s5503_s30 + $0xa8] sm:$0xff] }
 0x129   : > { %4764 = vmatmul.msk.bf16.gmra.mxu3 %vm4763_vm9, %v8789_v39  ;;  %v1396_v4 = vmul.f32 %v1125_v60, %v6230_v41  ;;  %v1129_v28 = vsub.f32 1.0, %v1128_v58  ;;  %v1153_v41 = vand.u32 2147483648, %v886_v59  ;;  %4486 = vmatmul.msk.f32.gmra.mxu0 %vm8797_vm15, %v512_v21  ;;  %vm2759_vm1 = vcmp.eq.s32.totalorder %v2691_v56, %v5612_v12  ;;  %vm8798_vm9 = vmmov %vm8796_vm0 }
 0x12a   : > { %vm1152_vm7 = vcmp.eq.f32.partialorder %v1151_v19, 8.507059e+37  ;;  %vm4765_vm3 = vmpackc.low %vm2759_vm1, %vm2758_vm2  ;;  %vm3292_vm2 = vcmp.eq.s32.totalorder %v5612_v12, 32 }
 0x12b   : > { %v1130_v32 = vmul.f32 %v5038_v11, %v1129_v28  ;;  %v1154_v58 = vor.u32 1.1754944e-38, %v1153_v41  ;;  %v6285_v28 = vpop.f32.mrf.mxu2 }
 0x12c   : > { %4543 = vmatmul.msk.f32.gmra.mxu1 %vm8796_vm0, %v1396_v4  ;;  %v513_v4 = vld [vmem:[%s5503_s30 + $0xb0] sm:$0xff]  ;;  %v2703_v45 = vpop.permute.xlu1 %2702 }
 0x12d   : > { %v1131_v40 = vadd.f32 %v5038_v11, %v1130_v32  ;;  %v2697_v32 = vpop.permute.xlu0 %2696 }
 0x12e   : > { %v5040_v38 = vpop.eup %5039 }
 0x12f   : > { %v1135_v17 = vsel %vm1134_vm10, %v5038_v11, %v1131_v40  ;;  %v1143_v10 = vmul.f32 %v5040_v38, %v886_v59  ;;  %vm1148_vm6 = vweird.f32 %v5040_v38  ;;  %vm8799_vm10 = vmmov %vm8797_vm15  ;;  %v2700_v41 = vpop.permute.xlu2 %2699 }
 0x130   : > { %v1140_v57 = vsel %vm1137_vm13, %v1139_v27, %v1135_v17  ;;  %4710 = vmatmul.msk.bf16.gmra.mxu2 %vm6150_vm4, %v8789_v39  ;;  %vm1149_vm4 = vmor %vm1147_vm8, %vm1148_vm6  ;;  %vm2760_vm13 = vcmp.eq.s32.totalorder %v2694_v22, %v5612_v12  ;;  %vm2761_vm8 = vcmp.eq.s32.totalorder %v2697_v32, %v5612_v12  ;;  %vm2762_vm15 = vcmp.eq.s32.totalorder %v2700_v41, %v5612_v12 }
 0x131   : > { %v1397_v1 = vmul.f32 %v1140_v57, %v6239_v13  ;;  %v1144_v49 = vsub.f32 1.0, %v1143_v10  ;;  %4487 = vmatmul.msk.f32.gmra.mxu0 %vm8799_vm10, %v513_v4  ;;  %vm4767_vm6 = vmpackc.low %vm2761_vm8, %vm2760_vm13  ;;  %v6328_v4 = vld [vmem:[%s8610_s8] ss:$0 sm:$0xff]  ;;  %vm8800_vm13 = vcmask 31744  }
 0x133   : > { %v1145_v11 = vmul.f32 %v5040_v38, %v1144_v49  ;;  %v6292_v27 = vpop.f32.mrf.mxu2 }
 0x134   : > { %4544 = vmatmul.msk.f32.gmra.mxu1 %vm8798_vm9, %v1397_v1 }
 0x135   : > { %v1146_v60 = vadd.f32 %v5040_v38, %v1145_v11 }
 0x137   : > { %v1150_v13 = vsel %vm1149_vm4, %v5040_v38, %v1146_v60  ;;  %v2706_v60 = vpop.permute.xlu0 %2705 }
 0x138   : > { %v1155_v52 = vsel %vm1152_vm7, %v1154_v58, %v1150_v13  ;;  %v2709_v58 = vpop.permute.xlu2 %2708  ;;  %vm2764_vm4 = vcmp.eq.s32.totalorder %v2706_v60, %v5612_v12 }
 0x139   : > { %4766 = vmatmul.msk.bf16.gmra.mxu3 %vm4765_vm3, %v8789_v39  ;;  %v1398_v59 = vmul.f32 %v1155_v52, %v6253_v18  ;;  %v1536_v18 = vpop.f32.mrf.mxu1 }
 0x13b   : > { %v6302_v10 = vpop.f32.mrf.mxu2 }
 0x13c   : > { %4545 = vmatmul.msk.f32.gmra.mxu1 %vm8796_vm0, %v1398_v59 }
 0x140   : > { %4712 = vmatmul.msk.bf16.gmra.mxu2 %vm6125_vm11, %v8789_v39  ;;  %vm2763_vm11 = vcmp.eq.s32.totalorder %v2703_v45, %v5612_v12 }
 0x141   : > { %v6304_v57 = vpop.f32.mrf.mxu1  ;;  %vm4769_vm1 = vmpackc.low %vm2763_vm11, %vm2762_vm15 }
 0x142   : > { %vm8801_vm11 = vmmov %vm8800_vm13 }
 0x143   : > { %v6310_v1 = vpop.f32.mrf.mxu2 }
 0x146   : > { %v729_v40 = vpop.f32.mrf.mxu0 }
 0x147   : > { %v6296_v38 = vadd.f32 %v6250_v29, %v729_v40 }
 0x149   : > { %4768 = vmatmul.msk.bf16.gmra.mxu3 %vm4767_vm6, %v8789_v39  ;;  %v4514_v17 = vmul.f32 -1.442695, %v6296_v38  ;;  %v6312_v49 = vpop.f32.mrf.mxu1 }
 0x14b   : > { %5041 = vpow2.f32 %v4514_v17 }
 0x150   : > { %4714 = vmatmul.msk.bf16.gmra.mxu2 %vm6095_vm14, %v8789_v39  ;;  %vm2765_vm14 = vcmp.eq.s32.totalorder %v2709_v58, %v5612_v12 }
 0x151   : > { %v5042_v56 = vpop.eup %5041  ;;  %vm4771_vm7 = vmpackc.low %vm2765_vm14, %vm2764_vm4 }
 0x152   : > { %v887_v62 = vadd.f32 1.0, %v5042_v56  ;;  %v6333_v56 = vpop.f32.mrf.mxu2 }
 0x154   : > { %5043 = vrcp.f32 %v887_v62  ;;  %v1168_v32 = vand.u32 2147483648, %v887_v62  ;;  %v1166_v45 = vand.u32 2147483647, %v887_v62 }
 0x155   : > { %v732_v11 = vpop.f32.mrf.mxu0 }
 0x156   : > { %v6321_v13 = vadd.f32 %v6250_v29, %v732_v11  ;;  %vm1167_vm10 = vcmp.eq.f32.partialorder %v1166_v45, 8.507059e+37 }
 0x158   : > { %v4515_v17 = vmul.f32 -1.442695, %v6321_v13 }
 0x159   : > { %4770 = vmatmul.msk.bf16.gmra.mxu3 %vm4769_vm1, %v8789_v39 }
 0x15a   : > { %v5044_v52 = vpop.eup %5043  ;;  %5045 = vpow2.f32 %v4515_v17  ;;  %v6355_v45 = vpop.f32.mrf.mxu2 }
 0x15b   : > { %vm1163_vm9 = vweird.f32 %v5044_v52 }
 0x15c   : > { %v3084_v42 = vpop.f32.mrf.mxu3 }
 0x15d   : > { %v3295_v19 = vsel %vm3292_vm2, %v3084_v42, 0.0  ;;  %v3164_v21 = vmul.f32 %v3084_v42, %v6268_v20  ;;  %v1158_v20 = vmul.f32 %v5044_v52, %v887_v62  ;;  %v735_v41 = vpop.f32.mrf.mxu0  ;;  %v6335_v42 = vpop.f32.mrf.mxu1 }
 0x15e   : > { %3327 = vadd.xlane.f32.xlu0 %v3295_v19  ;;  %v1169_v19 = vor.u32 1.1754944e-38, %v1168_v32 }
 0x15f   : > { %3196 = vadd.xlane.f32.xlu1 %v3164_v21  ;;  %v1159_v40 = vsub.f32 1.0, %v1158_v20  ;;  %v6346_v21 = vadd.f32 %v6328_v4, %v1536_v18  ;;  %v514_v18 = vld [vmem:[%s5503_s30 + $0xb8] sm:$0xff] }
 0x160   : > { %4716 = vmatmul.msk.bf16.gmra.mxu2 %vm6062_vm12, %v8789_v39  ;;  %vm1162_vm12 = vweird.f32 %v887_v62  ;;  %v6343_v62 = vadd.f32 %v6250_v29, %v735_v41  ;;  %4488 = vmatmul.msk.f32.gmra.mxu0 %vm8800_vm13, %v514_v18  ;;  %v2712_v41 = vpop.permute.xlu1 %2711 }
 0x161   : > { %vm1164_vm3 = vmor %vm1162_vm12, %vm1163_vm9  ;;  %vm2766_vm8 = vcmp.eq.s32.totalorder %v2712_v41, %v5612_v12  ;;  %vm8804_vm12 = vnez %v8764_v44 }
 0x162   : > { %v4516_v58 = vmul.f32 -1.442695, %v6343_v62  ;;  %v6386_v18 = vpop.f32.mrf.mxu2 }
 0x164   : > { %v3086_v59 = vpop.f32.mrf.mxu3  ;;  %5047 = vpow2.f32 %v4516_v58 }
 0x165   : > { %v3296_v22 = vsel %vm3292_vm2, %v3086_v59, 0.0  ;;  %v3165_v63 = vmul.f32 %v3086_v59, %v2933_v0  ;;  %v1160_v0 = vmul.f32 %v5044_v52, %v1159_v40  ;;  %v5046_v40 = vpop.eup %5045  ;;  %v1548_v17 = vpop.f32.mrf.mxu1 }
 0x167   : > { %3329 = vadd.xlane.f32.xlu1 %v3296_v22  ;;  %3198 = vadd.xlane.f32.xlu0 %v3165_v63  ;;  %v1161_v11 = vadd.f32 %v5044_v52, %v1160_v0  ;;  %v4561_v63 = vmul.f32 -1.442695, %v6346_v21 }
 0x169   : > { %4772 = vmatmul.msk.bf16.gmra.mxu3 %vm4771_vm7, %v8789_v39  ;;  %v1165_v60 = vsel %vm1164_vm3, %v5044_v52, %v1161_v11  ;;  %v888_v52 = vadd.f32 1.0, %v5046_v40  ;;  %5049 = vpow2.f32 %v4561_v63  ;;  %v6365_v11 = vadd.f32 %v6328_v4, %v6304_v57 }
 0x16a   : > { %v1170_v20 = vsel %vm1167_vm10, %v1169_v19, %v1165_v60  ;;  %v5048_v58 = vpop.eup %5047  ;;  %v6377_v63 = vadd.f32 %v6328_v4, %v6312_v49  ;;  %vm8805_vm10 = vmmov %vm8796_vm0 }
 0x16b   : > { %v1399_v32 = vmul.f32 %v1170_v20, %v6296_v38  ;;  %5051 = vrcp.f32 %v888_v52  ;;  %v2715_v38 = vpop.permute.xlu0 %2714  ;;  %v6371_v20 = vadd.f32 1.0, %v5048_v58  ;;  %v4562_v57 = vmul.f32 -1.442695, %v6365_v11 }
 0x16c   : > { %v3089_v59 = vpop.f32.mrf.mxu3  ;;  %v1183_v41 = vand.u32 2147483648, %v888_v52  ;;  %vm1177_vm15 = vweird.f32 %v888_v52  ;;  %v1181_v49 = vand.u32 2147483647, %v888_v52 }
 0x16d   : > { %v3297_v22 = vsel %vm3292_vm2, %v3089_v59, 0.0  ;;  %4546 = vmatmul.msk.f32.gmra.mxu1 %vm8796_vm0, %v1399_v32  ;;  %v3166_v19 = vmul.f32 %v3089_v59, %v6285_v28  ;;  %v515_v59 = vld [vmem:[%s5503_s30 + $0xc0] sm:$0xff]  ;;  %v6379_v32 = vpop.f32.mrf.mxu1  ;;  %5053 = vrcp.f32 %v6371_v20  ;;  %vm1192_vm9 = vweird.f32 %v6371_v20 }
 0x16e   : > { %3331 = vadd.xlane.f32.xlu2 %v3297_v22  ;;  %4489 = vmatmul.msk.f32.gmra.mxu0 %vm8801_vm11, %v515_v59  ;;  %5055 = vpow2.f32 %v4562_v57  ;;  %vm1182_vm4 = vcmp.eq.f32.partialorder %v1181_v49, 8.507059e+37  ;;  %v1196_v59 = vand.u32 2147483647, %v6371_v20 }
 0x16f   : > { %v5050_v28 = vpop.eup %5049 }
 0x170   : > { %4718 = vmatmul.msk.bf16.gmra.mxu2 %vm6035_vm5, %v8789_v39  ;;  %vm2767_vm5 = vcmp.eq.s32.totalorder %v2715_v38, %v5612_v12  ;;  %v6384_v40 = vadd.f32 1.0, %v5050_v28  ;;  %v6395_v28 = vadd.f32 %v6328_v4, %v6335_v42 }
 0x171   : > { %vm4773_vm6 = vmpackc.low %vm2767_vm5, %vm2766_vm8  ;;  %v5052_v22 = vpop.eup %5051  ;;  %vm1197_vm8 = vcmp.eq.f32.partialorder %v1196_v59, 8.507059e+37 }
 0x172   : > { %vm1178_vm1 = vweird.f32 %v5052_v22  ;;  %5057 = vrcp.f32 %v6384_v40 }
 0x173   : > { %vm6397_vm14 = vmor %vm1177_vm15, %vm1178_vm1  ;;  %v5054_v57 = vpop.eup %5053  ;;  %vm1765_vm15 = vweird.f32 %v6384_v40 }
 0x174   : > { %v3091_v0 = vpop.f32.mrf.mxu3  ;;  %v1188_v42 = vmul.f32 %v5054_v57, %v6371_v20  ;;  %vm1193_vm7 = vweird.f32 %v5054_v57 }
 0x175   : > { %v3298_v34 = vsel %vm3292_vm2, %v3091_v0, 0.0  ;;  %v3167_v60 = vmul.f32 %v3091_v0, %v6292_v27  ;;  %v1173_v27 = vmul.f32 %v5052_v22, %v888_v52  ;;  %v1184_v52 = vor.u32 1.1754944e-38, %v1183_v41  ;;  %v5056_v41 = vpop.eup %5055  ;;  %vm6433_vm13 = vmor %vm1192_vm9, %vm1193_vm7 }
 0x176   : > { %3200 = vadd.xlane.f32.xlu2 %v3166_v19  ;;  %3333 = vadd.xlane.f32.xlu0 %v3298_v34  ;;  %v4563_v19 = vmul.f32 -1.442695, %v6377_v63  ;;  %v1189_v55 = vsub.f32 1.0, %v1188_v42  ;;  %v6426_v47 = vadd.f32 1.0, %v5056_v41  ;;  %v516_v42 = vld [vmem:[%s5503_s30 + $0xc8] sm:$0xff] }
 0x177   : > { %3202 = vadd.xlane.f32.xlu1 %v3167_v60  ;;  %v1174_v0 = vsub.f32 1.0, %v1173_v27 }
 0x178   : > { %5059 = vpow2.f32 %v4563_v19  ;;  %v2718_v19 = vpop.permute.xlu2 %2717 }
 0x179   : > { %4774 = vmatmul.msk.bf16.gmra.mxu3 %vm4773_vm6, %v8789_v39  ;;  %v1175_v58 = vmul.f32 %v5052_v22, %v1174_v0  ;;  %vm2768_vm0 = vcmp.eq.s32.totalorder %v2718_v19, %v5612_v12  ;;  %vm8808_vm6 = vmmov %vm8801_vm11 }
 0x17a   : > { %4490 = vmatmul.msk.f32.gmra.mxu0 %vm8808_vm6, %v516_v42  ;;  %vm8809_vm11 = vmmov %vm8805_vm10 }
 0x17b   : > { %v1176_v27 = vadd.f32 %v5052_v22, %v1175_v58 }
 0x17c   : > { %v3094_v38 = vpop.f32.mrf.mxu3 }
 0x17d   : > { %v3299_v34 = vsel %vm3292_vm2, %v3094_v38, 0.0  ;;  %v3168_v60 = vmul.f32 %v3094_v38, %v6302_v10  ;;  %v6402_v10 = vadd.f32 %v6328_v4, %v1548_v17  ;;  %v2721_v38 = vpop.permute.xlu1 %2720  ;;  %v1180_v0 = vsel %vm6397_vm14, %v5052_v22, %v1176_v27  ;;  %v6417_v22 = vpop.eup %5057 }
 0x17e   : > { %v1185_v49 = vsel %vm1182_vm4, %v1184_v52, %v1180_v0  ;;  %v1198_v17 = vand.u32 2147483648, %v6371_v20  ;;  %vm2769_vm3 = vcmp.eq.s32.totalorder %v2721_v38, %v5612_v12  ;;  %v6420_v27 = vpop.f32.mrf.mxu2  ;;  %vm1766_vm1 = vweird.f32 %v6417_v22 }
 0x17f   : > { %3335 = vadd.xlane.f32.xlu1 %v3299_v34  ;;  %3204 = vadd.xlane.f32.xlu2 %v3168_v60  ;;  %v4564_v34 = vmul.f32 -1.442695, %v6395_v28  ;;  %v6411_v60 = vpop.f32.mrf.mxu1  ;;  %v1400_v44 = vmul.f32 %v1185_v49, %v6321_v13  ;;  %v4565_v52 = vmul.f32 -1.442695, %v6402_v10  ;;  %v1190_v13 = vmul.f32 %v5054_v57, %v1189_v55  ;;  %v5060_v49 = vpop.eup %5059  ;;  %vm4775_vm5 = vmpackc.low %vm2769_vm3, %vm2768_vm0 }
 0x180   : > { %4720 = vmatmul.msk.bf16.gmra.mxu2 %vm8804_vm12, %v8789_v39  ;;  %v1199_v50 = vor.u32 1.1754944e-38, %v1198_v17  ;;  %v6444_v20 = vadd.f32 1.0, %v5060_v49  ;;  %v1771_v49 = vand.u32 2147483648, %v6384_v40  ;;  %vm6481_vm12 = vmor %vm1765_vm15, %vm1766_vm1  ;;  %vm1780_vm3 = vweird.f32 %v6426_v47 }
 0x181   : > { %4547 = vmatmul.msk.f32.gmra.mxu1 %vm8805_vm10, %v1400_v44  ;;  %5061 = vpow2.f32 %v4564_v34  ;;  %v1191_v55 = vadd.f32 %v5054_v57, %v1190_v13  ;;  %v2724_v13 = vpop.permute.xlu0 %2723 }
 0x182   : > { %5063 = vpow2.f32 %v4565_v52  ;;  %vm2770_vm4 = vcmp.eq.s32.totalorder %v2724_v13, %v5612_v12 }
 0x183   : > { %5065 = vrcp.f32 %v6426_v47 }
 0x184   : > { %v3096_v58 = vpop.f32.mrf.mxu3  ;;  %5067 = vrcp.f32 %v6444_v20 }
 0x185   : > { %v3300_v0 = vsel %vm3292_vm2, %v3096_v58, 0.0  ;;  %v3169_v31 = vmul.f32 %v3096_v58, %v6310_v1  ;;  %v1761_v1 = vmul.f32 %v6417_v22, %v6384_v40  ;;  %v2730_v46 = vpop.permute.xlu1 %2729 }
 0x186   : > { %v6456_v33 = vpop.f32.mrf.mxu2 }
 0x187   : > { %3337 = vadd.xlane.f32.xlu2 %v3300_v0  ;;  %3206 = vadd.xlane.f32.xlu0 %v3169_v31  ;;  %v1195_v31 = vsel %vm6433_vm13, %v5054_v57, %v1191_v55  ;;  %v1762_v17 = vsub.f32 1.0, %v1761_v1  ;;  %v6449_v44 = vpop.f32.mrf.mxu1  ;;  %v5062_v59 = vpop.eup %5061  ;;  %v6463_v57 = vadd.f32 %v6328_v4, %v6379_v32  ;;  %vm1795_vm13 = vweird.f32 %v6444_v20 }
 0x188   : > { %v1200_v41 = vsel %vm1197_vm8, %v1199_v50, %v1195_v31  ;;  %v5064_v52 = vpop.eup %5063  ;;  %v2727_v0 = vpop.permute.xlu2 %2726  ;;  %v1769_v31 = vand.u32 2147483647, %v6384_v40 }
 0x189   : > { %4776 = vmatmul.msk.bf16.gmra.mxu3 %vm4775_vm5, %v8789_v39  ;;  %v1401_v34 = vmul.f32 %v1200_v41, %v6343_v62  ;;  %v6458_v50 = vpop.eup %5065  ;;  %v1763_v62 = vmul.f32 %v6417_v22, %v1762_v17  ;;  %v6469_v42 = vadd.f32 1.0, %v5064_v52  ;;  %vm2771_vm14 = vcmp.eq.s32.totalorder %v2727_v0, %v5612_v12 }
 0x18a   : > { %v1776_v1 = vmul.f32 %v6458_v50, %v6426_v47  ;;  %v6474_v55 = vpop.eup %5067  ;;  %v4566_v41 = vmul.f32 -1.442695, %v6463_v57  ;;  %v6494_v52 = vadd.f32 %v6328_v4, %v6411_v60  ;;  %vm4777_vm9 = vmpackc.low %vm2771_vm14, %vm2770_vm4  ;;  %vm1770_vm7 = vcmp.eq.f32.partialorder %v1769_v31, 8.507059e+37 }
 0x18b   : > { %4548 = vmatmul.msk.f32.gmra.mxu1 %vm8809_vm11, %v1401_v34  ;;  %v1764_v32 = vadd.f32 %v6417_v22, %v1763_v62  ;;  %vm1781_vm10 = vweird.f32 %v6458_v50  ;;  %v1784_v34 = vand.u32 2147483647, %v6426_v47  ;;  %vm1796_vm8 = vweird.f32 %v6474_v55 }
 0x18c   : > { %v3099_v19 = vpop.f32.mrf.mxu3  ;;  %v1777_v40 = vsub.f32 1.0, %v1776_v1  ;;  %vm6535_vm0 = vmor %vm1780_vm3, %vm1781_vm10  ;;  %vm2772_vm11 = vcmp.eq.s32.totalorder %v2730_v46, %v5612_v12  ;;  %vm8820_vm14 = vcmask 261120  }
 0x18d   : > { %v3301_v38 = vsel %vm3292_vm2, %v3099_v19, 0.0  ;;  %v3170_v58 = vmul.f32 %v3099_v19, %v6333_v56  ;;  %v6465_v56 = vadd.f32 1.0, %v5062_v59  ;;  %v1791_v59 = vmul.f32 %v6474_v55, %v6444_v20  ;;  %vm6572_vm15 = vmor %vm1795_vm13, %vm1796_vm8 }
 0x18e   : > { %v6503_v13 = vpop.f32.mrf.mxu2  ;;  %v1778_v1 = vmul.f32 %v6458_v50, %v1777_v40  ;;  %vm6554_vm5 = vcmp.eq.f32.partialorder %v1784_v34, 8.507059e+37 }
 0x18f   : > { %3339 = vadd.xlane.f32.xlu0 %v3301_v38  ;;  %3208 = vadd.xlane.f32.xlu1 %v3170_v58  ;;  %5069 = vrcp.f32 %v6465_v56  ;;  %v1772_v58 = vor.u32 1.1754944e-38, %v1771_v49  ;;  %v6496_v62 = vpop.f32.mrf.mxu1  ;;  %vm1810_vm4 = vweird.f32 %v6465_v56 }
 0x190   : > { %5071 = vrcp.f32 %v6469_v42 }
 0x191   : > { %5073 = vpow2.f32 %v4566_v41 }
 0x194   : > { %v3101_v17 = vpop.f32.mrf.mxu3 }
 0x195   : > { %v3302_v19 = vsel %vm3292_vm2, %v3101_v17, 0.0  ;;  %v3171_v38 = vmul.f32 %v3101_v17, %v6355_v45  ;;  %v1768_v45 = vsel %vm6481_vm12, %v6417_v22, %v1764_v32  ;;  %v6506_v49 = vpop.eup %5069  ;;  %v1792_v17 = vsub.f32 1.0, %v1791_v59  ;;  %v6525_v59 = vld [vmem:[%s8611_s9] ss:$0 sm:$0xff] }
 0x196   : > { %v1773_v60 = vsel %vm1770_vm7, %v1772_v58, %v1768_v45  ;;  %v6510_v0 = vpop.eup %5071  ;;  %v1786_v58 = vand.u32 2147483648, %v6426_v47  ;;  %v1806_v40 = vmul.f32 %v6506_v49, %v6465_v56  ;;  %v1779_v45 = vadd.f32 %v6458_v50, %v1778_v1  ;;  %v6563_v6 = vpop.f32.mrf.mxu2 }
 0x197   : > { %3341 = vadd.xlane.f32.xlu1 %v3302_v19  ;;  %3210 = vadd.xlane.f32.xlu2 %v3171_v38  ;;  %v4567_v19 = vmul.f32 -1.442695, %v6494_v52  ;;  %v5074_v31 = vpop.eup %5073  ;;  %v2240_v41 = vmul.f32 %v1773_v60, %v6346_v21  ;;  %v1793_v9 = vmul.f32 %v6474_v55, %v1792_v17  ;;  %v2733_v21 = vpop.permute.xlu0 %2732  ;;  %v1799_v1 = vand.u32 2147483647, %v6444_v20 }
 0x198   : > { %v1801_v17 = vand.u32 2147483648, %v6444_v20  ;;  %v6549_v47 = vpop.f32.mrf.mxu1  ;;  %v1787_v5 = vor.u32 1.1754944e-38, %v1786_v58  ;;  %v1807_v43 = vsub.f32 1.0, %v1806_v40  ;;  %vm2773_vm6 = vcmp.eq.s32.totalorder %v2733_v21, %v5612_v12 }
 0x199   : > { %4778 = vmatmul.msk.bf16.gmra.mxu3 %vm4777_vm9, %v8789_v39  ;;  %5075 = vpow2.f32 %v4567_v19  ;;  %v6543_v19 = vadd.f32 1.0, %v5074_v31  ;;  %v2276_v48 = vmul.f32 %v6525_v59, %v2240_v41  ;;  %v1783_v31 = vsel %vm6535_vm0, %v6458_v50, %v1779_v45  ;;  %vm4779_vm12 = vmpackc.low %vm2773_vm6, %vm2772_vm11 }
 0x19a   : > { %vm6576_vm1 = vcmp.eq.f32.partialorder %v1799_v1, 8.507059e+37  ;;  %v1802_v58 = vor.u32 1.1754944e-38, %v1801_v17  ;;  %v1788_v20 = vsel %vm6554_vm5, %v1787_v5, %v1783_v31  ;;  %v1814_v17 = vand.u32 2147483647, %v6465_v56  ;;  %vm8828_vm11 = vmmov %vm8820_vm14 }
 0x19b   : > { %5077 = vrcp.f32 %v6543_v19  ;;  %v2308_v60 = vsel %vm8820_vm14, %v2276_v48, 0.0  ;;  %vm1811_vm9 = vweird.f32 %v6506_v49  ;;  %v1816_v5 = vand.u32 2147483648, %v6465_v56 }
 0x19c   : > { %v3104_v38 = vpop.f32.mrf.mxu3  ;;  %v6603_v48 = vadd.f32 %v6328_v4, %v6496_v62  ;;  %vm1825_vm7 = vweird.f32 %v6469_v42  ;;  %vm1826_vm3 = vweird.f32 %v6510_v0  ;;  %vm6617_vm10 = vmor %vm1810_vm4, %vm1811_vm9  ;;  %v1829_v31 = vand.u32 2147483647, %v6469_v42 }
 0x19d   : > { %v3303_v22 = vsel %vm3292_vm2, %v3104_v38, 0.0  ;;  %v3172_v32 = vmul.f32 %v3104_v38, %v6386_v18  ;;  %v1821_v18 = vmul.f32 %v6510_v0, %v6469_v42  ;;  %v738_v38 = vpop.f32.mrf.mxu0  ;;  %vm6625_vm0 = vcmp.eq.f32.partialorder %v1814_v17, 8.507059e+37  ;;  %vm6633_vm13 = vmor %vm1825_vm7, %vm1826_vm3 }
 0x19e   : > { %v1817_v50 = vor.u32 1.1754944e-38, %v1816_v5  ;;  %vm1830_vm8 = vcmp.eq.f32.partialorder %v1829_v31, 8.507059e+37  ;;  %vm8827_vm5 = vcmask 31744   ;;  %v2736_v31 = vpop.permute.xlu2 %2735  ;;  %v1846_v41 = vand.u32 2147483648, %v6543_v19 }
 0x19f   : > { %3343 = vadd.xlane.f32.xlu2 %v3303_v22  ;;  %3212 = vadd.xlane.f32.xlu0 %v3172_v32  ;;  %v6547_v22 = vadd.f32 %v6328_v4, %v6449_v44  ;;  %v6552_v32 = vadd.f32 %v6250_v29, %v738_v38  ;;  %v1794_v44 = vadd.f32 %v6474_v55, %v1793_v9  ;;  %v1822_v30 = vsub.f32 1.0, %v1821_v18  ;;  %v5076_v34 = vpop.eup %5075  ;;  %vm8832_vm7 = vmmov %vm8827_vm5 }
 0x1a0   : > { %v1808_v18 = vmul.f32 %v6506_v49, %v1807_v43  ;;  %v6599_v43 = vadd.f32 1.0, %v5076_v34  ;;  %vm1840_vm14 = vweird.f32 %v6543_v19 }
 0x1a1   : > { %v4517_v38 = vmul.f32 -1.442695, %v6552_v32  ;;  %v4568_v40 = vmul.f32 -1.442695, %v6547_v22  ;;  %v1798_v1 = vsel %vm6572_vm15, %v6474_v55, %v1794_v44  ;;  %v1823_v26 = vmul.f32 %v6510_v0, %v1822_v30  ;;  %v6623_v44 = vpop.f32.mrf.mxu1  ;;  %vm8829_vm15 = vmmov %vm8828_vm11 }
 0x1a2   : > { %v1831_v30 = vand.u32 2147483648, %v6469_v42  ;;  %v1803_v46 = vsel %vm6576_vm1, %v1802_v58, %v1798_v1  ;;  %v1809_v8 = vadd.f32 %v6506_v49, %v1808_v18  ;;  %v2241_v55 = vmul.f32 %v1788_v20, %v6365_v11 }
 0x1a3   : > { %5079 = vpow2.f32 %v4517_v38  ;;  %v1824_v21 = vadd.f32 %v6510_v0, %v1823_v26  ;;  %v4569_v26 = vmul.f32 -1.442695, %v6603_v48  ;;  %v2242_v34 = vmul.f32 %v1803_v46, %v6377_v63 }
 0x1a4   : > { %v3106_v9 = vpop.f32.mrf.mxu3  ;;  %5081 = vpow2.f32 %v4568_v40  ;;  %v1832_v58 = vor.u32 1.1754944e-38, %v1831_v30  ;;  %v6640_v40 = vpop.f32.mrf.mxu2  ;;  %v1813_v20 = vsel %vm6617_vm10, %v6506_v49, %v1809_v8  ;;  %v6660_v49 = vadd.f32 %v6328_v4, %v6549_v47 }
 0x1a5   : > { %v3173_v45 = vmul.f32 %v3106_v9, %v6420_v27  ;;  %v6612_v27 = vpop.eup %5077  ;;  %5083 = vrcp.f32 %v6599_v43  ;;  %v1828_v17 = vsel %vm6633_vm13, %v6510_v0, %v1824_v21  ;;  %v1818_v5 = vsel %vm6625_vm0, %v1817_v50, %v1813_v20 }
 0x1a6   : > { %v1836_v18 = vmul.f32 %v6612_v27, %v6543_v19  ;;  %5085 = vpow2.f32 %v4569_v26  ;;  %v2277_v30 = vmul.f32 %v6525_v59, %v2241_v55  ;;  %v741_v0 = vpop.f32.mrf.mxu0  ;;  %v1833_v8 = vsel %vm1830_vm8, %v1832_v58, %v1828_v17 }
 0x1a7   : > { %2309 = vadd.xlane.f32.xlu0 %v2308_v60  ;;  %3214 = vadd.xlane.f32.xlu1 %v3173_v45  ;;  %v3304_v60 = vsel %vm3292_vm2, %v3106_v9, 0.0  ;;  %v2739_v9 = vpop.permute.xlu1 %2738  ;;  %v2278_v47 = vmul.f32 %v6525_v59, %v2242_v34  ;;  %v6674_v11 = vadd.f32 %v6250_v29, %v741_v0  ;;  %v2243_v55 = vmul.f32 %v1818_v5, %v6395_v28 }
 0x1a8   : > { %v1837_v62 = vsub.f32 1.0, %v1836_v18  ;;  %vm2775_vm6 = vcmp.eq.s32.totalorder %v2739_v9, %v5612_v12  ;;  %v4570_v50 = vmul.f32 -1.442695, %v6660_v49  ;;  %vm2774_vm1 = vcmp.eq.s32.totalorder %v2736_v31, %v5612_v12 }
 0x1a9   : > { %4780 = vmatmul.msk.bf16.gmra.mxu3 %vm4779_vm12, %v8789_v39  ;;  %v5080_v38 = vpop.eup %5079  ;;  %v6683_v58 = vpop.f32.mrf.mxu1  ;;  %v2314_v18 = vsel %vm8829_vm15, %v2278_v47, 0.0  ;;  %vm4781_vm12 = vmpackc.low %vm2775_vm6, %vm2774_vm1  ;;  %vm1841_vm9 = vweird.f32 %v6612_v27  ;;  %v1847_v5 = vor.u32 1.1754944e-38, %v1846_v41  ;;  %v6717_v31 = vadd.f32 %v6328_v4, %v6623_v44 }
 0x1aa   : > { %v6652_v1 = vadd.f32 1.0, %v5080_v38  ;;  %v5082_v63 = vpop.eup %5081  ;;  %v1844_v38 = vand.u32 2147483647, %v6543_v19  ;;  %v1838_v28 = vmul.f32 %v6612_v27, %v1837_v62  ;;  %vm6724_vm3 = vmor %vm1840_vm14, %vm1841_vm9  ;;  %vm1855_vm13 = vweird.f32 %v6599_v43 }
 0x1ab   : > { %v6667_v46 = vpop.eup %5083  ;;  %v6669_v21 = vadd.f32 1.0, %v5082_v63  ;;  %v1861_v41 = vand.u32 2147483648, %v6599_v43  ;;  %v6787_v63 = vadd.f32 %v6328_v4, %v6683_v58 }
 0x1ac   : > { %v3109_v56 = vpop.f32.mrf.mxu3  ;;  %5087 = vrcp.f32 %v6652_v1  ;;  %v1851_v34 = vmul.f32 %v6667_v46, %v6599_v43  ;;  %v5086_v20 = vpop.eup %5085  ;;  %vm6696_vm4 = vcmp.eq.f32.partialorder %v1844_v38, 8.507059e+37  ;;  %v1839_v47 = vadd.f32 %v6612_v27, %v1838_v28 }
 0x1ad   : > { %v3305_v45 = vsel %vm3292_vm2, %v3109_v56, 0.0  ;;  %v3174_v42 = vmul.f32 %v3109_v56, %v6456_v33  ;;  %v517_v33 = vld [vmem:[%s5503_s30 + $0xd0] sm:$0xff]  ;;  %v2244_v56 = vmul.f32 %v1833_v8, %v6402_v10  ;;  %5089 = vrcp.f32 %v6669_v21  ;;  %v6700_v17 = vpop.f32.mrf.mxu2 }
 0x1ae   : > { %4491 = vmatmul.msk.f32.gmra.mxu0 %vm8827_vm5, %v517_v33  ;;  %v4518_v10 = vmul.f32 -1.442695, %v6674_v11  ;;  %v518_v33 = vld [vmem:[%s5503_s30 + $0xd8] sm:$0xff]  ;;  %5091 = vpow2.f32 %v4570_v50  ;;  %v1852_v0 = vsub.f32 1.0, %v1851_v34  ;;  %v6708_v8 = vadd.f32 1.0, %v5086_v20  ;;  %vm8835_vm5 = vmmov %vm8828_vm11 }
 0x1af   : > { %3345 = vadd.xlane.f32.xlu0 %v3304_v60  ;;  %3347 = vadd.xlane.f32.xlu1 %v3305_v45  ;;  %v2311_v45 = vsel %vm8828_vm11, %v2277_v30, 0.0  ;;  %v2279_v30 = vmul.f32 %v6525_v59, %v2243_v55  ;;  %v2280_v9 = vmul.f32 %v6525_v59, %v2244_v56  ;;  %v1213_v38 = vand.u32 2147483648, %v6652_v1  ;;  %v744_v55 = vpop.f32.mrf.mxu0  ;;  %vm8838_vm11 = vmmov %vm8835_vm5 }
 0x1b0   : > { %3216 = vadd.xlane.f32.xlu2 %v3174_v42  ;;  %5093 = vpow2.f32 %v4518_v10  ;;  %vm1207_vm10 = vweird.f32 %v6652_v1  ;;  %v1211_v44 = vand.u32 2147483647, %v6652_v1  ;;  %vm1856_vm8 = vweird.f32 %v6667_v46  ;;  %vm8845_vm9 = vmmov %vm8835_vm5 }
 0x1b1   : > { %v2317_v19 = vsel %vm8835_vm5, %v2279_v30, 0.0  ;;  %v1853_v20 = vmul.f32 %v6667_v46, %v1852_v0  ;;  %5095 = vrcp.f32 %v6708_v8  ;;  %v1214_v30 = vor.u32 1.1754944e-38, %v1213_v38  ;;  %v2742_v38 = vpop.permute.xlu0 %2741  ;;  %vm6781_vm14 = vmor %vm1855_vm13, %vm1856_vm8 }
 0x1b2   : > { %v6692_v60 = vpop.eup %5087  ;;  %v2320_v0 = vsel %vm8838_vm11, %v2280_v9, 0.0  ;;  %vm6759_vm15 = vcmp.eq.f32.partialorder %v1211_v44, 8.507059e+37  ;;  %v1859_v9 = vand.u32 2147483647, %v6599_v43  ;;  %v1862_v58 = vor.u32 1.1754944e-38, %v1861_v41  ;;  %vm8851_vm11 = vmmov %vm8845_vm9 }
 0x1b3   : > { %v1203_v62 = vmul.f32 %v6692_v60, %v6652_v1  ;;  %vm1208_vm0 = vweird.f32 %v6692_v60  ;;  %v6731_v56 = vpop.eup %5089  ;;  %v1854_v44 = vadd.f32 %v6667_v46, %v1853_v20  ;;  %vm8848_vm13 = vcmask 31744  }
 0x1b4   : > { %v3111_v26 = vpop.f32.mrf.mxu3  ;;  %v5092_v10 = vpop.eup %5091  ;;  %vm6751_vm6 = vmor %vm1207_vm10, %vm1208_vm0  ;;  %vm1871_vm10 = vweird.f32 %v6731_v56 }
 0x1b5   : > { %v3306_v42 = vsel %vm3292_vm2, %v3111_v26, 0.0  ;;  %v1204_v50 = vsub.f32 1.0, %v1203_v62  ;;  %v4571_v62 = vmul.f32 -1.442695, %v6717_v31 }
 0x1b6   : > { %4492 = vmatmul.msk.f32.gmra.mxu0 %vm8832_vm7, %v518_v33  ;;  %v1843_v33 = vsel %vm6724_vm3, %v6612_v27, %v1839_v47  ;;  %v5094_v47 = vpop.eup %5093  ;;  %vm1870_vm3 = vweird.f32 %v6669_v21 }
 0x1b7   : > { %2312 = vadd.xlane.f32.xlu0 %v2311_v45  ;;  %2315 = vadd.xlane.f32.xlu1 %v2314_v18  ;;  %v6737_v45 = vadd.f32 %v6250_v29, %v744_v55  ;;  %v1205_v28 = vmul.f32 %v6692_v60, %v1204_v50  ;;  %v3175_v18 = vmul.f32 %v3111_v26, %v6503_v13  ;;  %v1572_v26 = vpop.f32.mrf.mxu1  ;;  %5097 = vpow2.f32 %v4571_v62  ;;  %vm6852_vm8 = vmor %vm1870_vm3, %vm1871_vm10 }
 0x1b8   : > { %3349 = vadd.xlane.f32.xlu2 %v3306_v42  ;;  %v2745_v42 = vpop.permute.xlu2 %2744  ;;  %v1866_v13 = vmul.f32 %v6731_v56, %v6669_v21  ;;  %v1848_v50 = vsel %vm6696_vm4, %v1847_v5, %v1843_v33  ;;  %v6791_v20 = vadd.f32 1.0, %v5094_v47  ;;  %vm2776_vm4 = vcmp.eq.s32.totalorder %v2742_v38, %v5612_v12  ;;  %vm8856_vm3 = vmmov %vm8851_vm11 }
 0x1b9   : > { %4782 = vmatmul.msk.bf16.gmra.mxu3 %vm4781_vm12, %v8789_v39  ;;  %v1206_v55 = vadd.f32 %v6692_v60, %v1205_v28  ;;  %v4519_v1 = vmul.f32 -1.442695, %v6737_v45  ;;  %vm2777_vm1 = vcmp.eq.s32.totalorder %v2745_v42, %v5612_v12  ;;  %v6770_v28 = vpop.f32.mrf.mxu2  ;;  %v2245_v33 = vmul.f32 %v1848_v50, %v6463_v57  ;;  %v519_v42 = vld [vmem:[%s5503_s30 + $0xe0] sm:$0xff] }
 0x1ba   : > { %vm6798_vm12 = vcmp.eq.f32.partialorder %v1859_v9, 8.507059e+37  ;;  %vm4783_vm7 = vmpackc.low %vm2777_vm1, %vm2776_vm4  ;;  %v6834_v50 = vadd.f32 %v6328_v4, %v1572_v26  ;;  %vm1222_vm5 = vweird.f32 %v6791_v20 }
 0x1bb   : > { %5099 = vpow2.f32 %v4519_v1  ;;  %v2281_v38 = vmul.f32 %v6525_v59, %v2245_v33 }
 0x1bc   : > { %v3114_v34 = vpop.f32.mrf.mxu3  ;;  %5101 = vrcp.f32 %v6791_v20 }
 0x1bd   : > { %v3307_v27 = vsel %vm3292_vm2, %v3114_v34, 0.0 }
 0x1be   : > { %4493 = vmatmul.msk.f32.gmra.mxu0 %vm8848_vm13, %v519_v42  ;;  %vm8861_vm13 = vmmov %vm8856_vm3 }
 0x1bf   : > { %2318 = vadd.xlane.f32.xlu1 %v2317_v19  ;;  %3218 = vadd.xlane.f32.xlu0 %v3175_v18  ;;  %v6772_v19 = vadd.f32 1.0, %v5092_v10  ;;  %v1210_v18 = vsel %vm6751_vm6, %v6692_v60, %v1206_v55  ;;  %v6793_v10 = vpop.eup %5095  ;;  %v1867_v60 = vsub.f32 1.0, %v1866_v13  ;;  %v3176_v13 = vmul.f32 %v3114_v34, %v6563_v6  ;;  %v1575_v47 = vpop.f32.mrf.mxu1 }
 0x1c0   : > { %2321 = vadd.xlane.f32.xlu2 %v2320_v0  ;;  %v1215_v5 = vsel %vm6759_vm15, %v1214_v30, %v1210_v18  ;;  %v1858_v30 = vsel %vm6781_vm14, %v6667_v46, %v1854_v44  ;;  %v1874_v0 = vand.u32 2147483647, %v6669_v21  ;;  %v1881_v57 = vmul.f32 %v6793_v10, %v6708_v8  ;;  %v5098_v6 = vpop.eup %5097 }
 0x1c1   : > { %v1402_v43 = vmul.f32 %v1215_v5, %v6552_v32  ;;  %5103 = vrcp.f32 %v6772_v19  ;;  %v4572_v55 = vmul.f32 -1.442695, %v6787_v63  ;;  %v1868_v54 = vmul.f32 %v6731_v56, %v1867_v60  ;;  %v6840_v60 = vpop.f32.mrf.mxu2 }
 0x1c2   : > { %v1876_v46 = vand.u32 2147483648, %v6669_v21  ;;  %v1863_v34 = vsel %vm6798_vm12, %v1862_v58, %v1858_v30  ;;  %vm6826_vm0 = vcmp.eq.f32.partialorder %v1874_v0, 8.507059e+37  ;;  %v1882_v41 = vsub.f32 1.0, %v1881_v57 }
 0x1c3   : > { %4549 = vmatmul.msk.f32.gmra.mxu1 %vm8845_vm9, %v1402_v43  ;;  %5105 = vpow2.f32 %v4572_v55  ;;  %v1869_v18 = vadd.f32 %v6731_v56, %v1868_v54  ;;  %v6842_v43 = vadd.f32 1.0, %v5098_v6  ;;  %v2246_v62 = vmul.f32 %v1863_v34, %v6494_v52 }
 0x1c4   : > { %v3116_v29 = vpop.f32.mrf.mxu3  ;;  %v1877_v5 = vor.u32 1.1754944e-38, %v1876_v46  ;;  %v1228_v30 = vand.u32 2147483648, %v6791_v20  ;;  %v1226_v52 = vand.u32 2147483647, %v6791_v20  ;;  %v4573_v21 = vmul.f32 -1.442695, %v6834_v50 }
 0x1c5   : > { %v3177_v32 = vmul.f32 %v3116_v29, %v6640_v40  ;;  %v5100_v40 = vpop.eup %5099  ;;  %v3308_v57 = vsel %vm3292_vm2, %v3116_v29, 0.0  ;;  %v2323_v55 = vsel %vm8851_vm11, %v2281_v38, 0.0  ;;  %vm1885_vm15 = vweird.f32 %v6708_v8 }
 0x1c6   : > { %v5102_v9 = vpop.eup %5101  ;;  %v6836_v44 = vadd.f32 1.0, %v5100_v40  ;;  %v1889_v6 = vand.u32 2147483647, %v6708_v8  ;;  %v1891_v29 = vand.u32 2147483648, %v6708_v8  ;;  %v1229_v40 = vor.u32 1.1754944e-38, %v1228_v30 }
 0x1c7   : > { %3351 = vadd.xlane.f32.xlu0 %v3307_v27  ;;  %3220 = vadd.xlane.f32.xlu1 %v3176_v13  ;;  %v6845_v33 = vpop.eup %5103  ;;  %vm1223_vm6 = vweird.f32 %v5102_v9  ;;  %v1873_v27 = vsel %vm6852_vm8, %v6731_v56, %v1869_v18  ;;  %vm1886_vm14 = vweird.f32 %v6793_v10  ;;  %vm1227_vm4 = vcmp.eq.f32.partialorder %v1226_v52, 8.507059e+37  ;;  %v1578_v30 = vpop.f32.mrf.mxu1 }
 0x1c8   : > { %3222 = vadd.xlane.f32.xlu2 %v3177_v32  ;;  %5107 = vrcp.f32 %v6836_v44  ;;  %v1883_v32 = vmul.f32 %v6793_v10, %v1882_v41  ;;  %vm6878_vm1 = vmor %vm1222_vm5, %vm1223_vm6  ;;  %v2282_v38 = vmul.f32 %v6525_v59, %v2246_v62  ;;  %v1878_v41 = vsel %vm6826_vm0, %v1877_v5, %v1873_v27 }
 0x1c9   : > { %4784 = vmatmul.msk.bf16.gmra.mxu3 %vm4783_vm7, %v8789_v39  ;;  %v1218_v39 = vmul.f32 %v5102_v9, %v6791_v20  ;;  %5109 = vrcp.f32 %v6842_v43  ;;  %v5106_v46 = vpop.eup %5105  ;;  %v6888_v20 = vadd.f32 %v6328_v4, %v1575_v47  ;;  %vm1237_vm12 = vweird.f32 %v6836_v44  ;;  %v6900_v4 = vpop.f32.mrf.mxu2  ;;  %vm6909_vm7 = vmor %vm1885_vm15, %vm1886_vm14 }
 0x1ca   : > { %v1884_v18 = vadd.f32 %v6793_v10, %v1883_v32  ;;  %5111 = vpow2.f32 %v4573_v21  ;;  %v6890_v26 = vadd.f32 1.0, %v5106_v46  ;;  %v1241_v1 = vand.u32 2147483647, %v6836_v44  ;;  %vm8864_vm15 = vmmov %vm8856_vm3 }
 0x1cb   : > { %v1219_v13 = vsub.f32 1.0, %v1218_v39  ;;  %v1243_v5 = vand.u32 2147483648, %v6836_v44  ;;  %v4574_v27 = vmul.f32 -1.442695, %v6888_v20  ;;  %vm6915_vm10 = vcmp.eq.f32.partialorder %v1889_v6, 8.507059e+37  ;;  %vm8865_vm14 = vmmov %vm8856_vm3 }
 0x1cc   : > { %v3119_v58 = vpop.f32.mrf.mxu3  ;;  %5113 = vrcp.f32 %v6890_v26  ;;  %vm1900_vm8 = vweird.f32 %v6772_v19  ;;  %vm1242_vm5 = vcmp.eq.f32.partialorder %v1241_v1, 8.507059e+37  ;;  %vm1901_vm6 = vweird.f32 %v6845_v33 }
 0x1cd   : > { %v3178_v0 = vmul.f32 %v3119_v58, %v6700_v17  ;;  %v1896_v17 = vmul.f32 %v6845_v33, %v6772_v19  ;;  %v1220_v54 = vmul.f32 %v5102_v9, %v1219_v13  ;;  %5115 = vpow2.f32 %v4574_v27  ;;  %vm6960_vm11 = vmor %vm1900_vm8, %vm1901_vm6 }
 0x1ce   : > { %v5108_v42 = vpop.eup %5107 }
 0x1cf   : > { %3353 = vadd.xlane.f32.xlu1 %v3308_v57  ;;  %3224 = vadd.xlane.f32.xlu0 %v3178_v0  ;;  %v1221_v34 = vadd.f32 %v5102_v9, %v1220_v54  ;;  %v1897_v39 = vsub.f32 1.0, %v1896_v17  ;;  %v1233_v13 = vmul.f32 %v5108_v42, %v6836_v44  ;;  %v6898_v32 = vpop.eup %5109  ;;  %vm1238_vm9 = vweird.f32 %v5108_v42  ;;  %v6941_v44 = vld [vmem:[%s8610_s8] ss:$0 sm:$0xff] }
 0x1d0   : > { %2324 = vadd.xlane.f32.xlu2 %v2323_v55  ;;  %v2326_v17 = vsel %vm8856_vm3, %v2282_v38, 0.0  ;;  %v5112_v8 = vpop.eup %5111  ;;  %v1911_v56 = vmul.f32 %v6898_v32, %v6842_v43  ;;  %vm6928_vm0 = vmor %vm1237_vm12, %vm1238_vm9  ;;  %vm1916_vm12 = vweird.f32 %v6898_v32 }
 0x1d1   : > { %v1225_v0 = vsel %vm6878_vm1, %v5102_v9, %v1221_v34  ;;  %v1234_v57 = vsub.f32 1.0, %v1233_v13  ;;  %v2247_v9 = vmul.f32 %v1878_v41, %v6547_v22  ;;  %v3309_v22 = vsel %vm3292_vm2, %v3119_v58, 0.0 }
 0x1d2   : > { %v1230_v62 = vsel %vm1227_vm4, %v1229_v40, %v1225_v0  ;;  %v1898_v46 = vmul.f32 %v6845_v33, %v1897_v39  ;;  %v1244_v58 = vor.u32 1.1754944e-38, %v1243_v5  ;;  %v6944_v34 = vadd.f32 %v6941_v44, %v1578_v30  ;;  %v1581_v39 = vpop.f32.mrf.mxu1 }
 0x1d3   : > { %v1403_v47 = vmul.f32 %v1230_v62, %v6674_v11  ;;  %v1235_v54 = vmul.f32 %v5108_v42, %v1234_v57  ;;  %v2283_v38 = vmul.f32 %v6525_v59, %v2247_v9  ;;  %v1904_v41 = vand.u32 2147483647, %v6772_v19  ;;  %v6966_v57 = vpop.eup %5113  ;;  %v2976_v11 = vpop.f32.mrf.mxu2 }
 0x1d4   : > { %v3121_v52 = vpop.f32.mrf.mxu3  ;;  %v1899_v62 = vadd.f32 %v6845_v33, %v1898_v46  ;;  %v1912_v1 = vsub.f32 1.0, %v1911_v56  ;;  %v4575_v9 = vmul.f32 -1.442695, %v6944_v34  ;;  %vm1915_vm4 = vweird.f32 %v6842_v43 }
 0x1d5   : > { %v3179_v21 = vmul.f32 %v3121_v52, %v6770_v28  ;;  %v1892_v28 = vor.u32 1.1754944e-38, %v1891_v29  ;;  %4550 = vmatmul.msk.f32.gmra.mxu1 %vm8861_vm13, %v1403_v47  ;;  %v1888_v29 = vsel %vm6909_vm7, %v6793_v10, %v1884_v18  ;;  %v1236_v40 = vadd.f32 %v5108_v42, %v1235_v54  ;;  %vm6995_vm9 = vmor %vm1915_vm4, %vm1916_vm12 }
 0x1d6   : > { %v1906_v10 = vand.u32 2147483648, %v6772_v19  ;;  %v6949_v18 = vadd.f32 1.0, %v5112_v8  ;;  %v3310_v55 = vsel %vm3292_vm2, %v3121_v52, 0.0  ;;  %v2329_v27 = vsel %vm8864_vm15, %v2283_v38, 0.0  ;;  %vm8878_vm4 = vmmov %vm8856_vm3 }
 0x1d7   : > { %2327 = vadd.xlane.f32.xlu0 %v2326_v17  ;;  %3226 = vadd.xlane.f32.xlu1 %v3179_v21  ;;  %v1240_v0 = vsel %vm6928_vm0, %v5108_v42, %v1236_v40  ;;  %v1893_v13 = vsel %vm6915_vm10, %v1892_v28, %v1888_v29  ;;  %vm1905_vm1 = vcmp.eq.f32.partialorder %v1904_v41, 8.507059e+37  ;;  %v1913_v28 = vmul.f32 %v6898_v32, %v1912_v1 }
 0x1d8   : > { %3355 = vadd.xlane.f32.xlu2 %v3309_v22  ;;  %v1245_v30 = vsel %vm1242_vm5, %v1244_v58, %v1240_v0  ;;  %v2248_v17 = vmul.f32 %v1893_v13, %v6603_v48  ;;  %v1907_v19 = vor.u32 1.1754944e-38, %v1906_v10  ;;  %5117 = vrcp.f32 %v6949_v18  ;;  %vm8874_vm5 = vmmov %vm8856_vm3 }
 0x1d9   : > { %v1404_v21 = vmul.f32 %v1245_v30, %v6737_v45  ;;  %v5116_v45 = vpop.eup %5115  ;;  %v6979_v52 = vadd.f32 %v6941_v44, %v1581_v39  ;;  %v1926_v48 = vmul.f32 %v6966_v57, %v6890_v26  ;;  %v1919_v22 = vand.u32 2147483647, %v6842_v43 }
 0x1da   : > { %5119 = vpow2.f32 %v4575_v9  ;;  %v1921_v54 = vand.u32 2147483648, %v6842_v43  ;;  %v6988_v8 = vadd.f32 1.0, %v5116_v45  ;;  %v2284_v46 = vmul.f32 %v6525_v59, %v2248_v17  ;;  %v1584_v41 = vpop.f32.mrf.mxu1  ;;  %v520_v45 = vld [vmem:[%s5503_s30 + $0xe8] sm:$0xff] }
 0x1db   : > { %v1914_v56 = vadd.f32 %v6898_v32, %v1913_v28  ;;  %v4576_v6 = vmul.f32 -1.442695, %v6979_v52  ;;  %v1927_v38 = vsub.f32 1.0, %v1926_v48  ;;  %vm7003_vm7 = vcmp.eq.f32.partialorder %v1919_v22, 8.507059e+37 }
 0x1dc   : > { %v3124_v5 = vpop.f32.mrf.mxu3  ;;  %v1922_v13 = vor.u32 1.1754944e-38, %v1921_v54  ;;  %5121 = vrcp.f32 %v6988_v8  ;;  %v7015_v30 = vadd.f32 %v6941_v44, %v1584_v41  ;;  %vm1930_vm10 = vweird.f32 %v6890_v26 }
 0x1dd   : > { %v3180_v42 = vmul.f32 %v3124_v5, %v6840_v60  ;;  %v1903_v60 = vsel %vm6960_vm11, %v6845_v33, %v1899_v62  ;;  %4551 = vmatmul.msk.f32.gmra.mxu1 %vm8865_vm14, %v1404_v21  ;;  %v3311_v39 = vsel %vm3292_vm2, %v3124_v5, 0.0  ;;  %v2332_v62 = vsel %vm8856_vm3, %v2284_v46, 0.0  ;;  %v7017_v5 = vpop.xlane.xlu0 %3327  ;;  %v2978_v21 = vpop.f32.mrf.mxu2 }
 0x1de   : > { %v1908_v33 = vsel %vm1905_vm1, %v1907_v19, %v1903_v60  ;;  %v6993_v29 = vpop.eup %5117  ;;  %5123 = vpow2.f32 %v4576_v6  ;;  %8870 = vst [vmem:[#allocation32_spill] sm:$0xff] %v7017_v5  ;;  %v1928_v47 = vmul.f32 %v6966_v57, %v1927_v38  ;;  %vm1931_vm0 = vweird.f32 %v6966_v57  ;;  %v747_v6 = vpop.f32.mrf.mxu0 }
 0x1df   : > { %3357 = vadd.xlane.f32.xlu0 %v3310_v55  ;;  %2330 = vadd.xlane.f32.xlu1 %v2329_v27  ;;  %v2249_v43 = vmul.f32 %v1908_v33, %v6660_v49  ;;  %v1941_v49 = vmul.f32 %v6993_v29, %v6949_v18  ;;  %v1936_v55 = vand.u32 2147483648, %v6890_v26  ;;  %v4577_v17 = vmul.f32 -1.442695, %v7015_v30  ;;  %vm7038_vm8 = vmor %vm1930_vm10, %vm1931_vm0 }
 0x1e0   : > { %3228 = vadd.xlane.f32.xlu2 %v3180_v42  ;;  %v5120_v1 = vpop.eup %5119  ;;  %v1929_v28 = vadd.f32 %v6966_v57, %v1928_v47  ;;  %v1934_v48 = vand.u32 2147483647, %v6890_v26  ;;  %vm8871_vm13 = vcmask 31744   ;;  %vm1945_vm11 = vweird.f32 %v6949_v18  ;;  %vm8884_vm10 = vmmov %vm8878_vm4 }
 0x1e1   : > { %v2285_v42 = vmul.f32 %v6525_v59, %v2249_v43  ;;  %v1942_v27 = vsub.f32 1.0, %v1941_v49  ;;  %4494 = vmatmul.msk.f32.gmra.mxu0 %vm8871_vm13, %v520_v45  ;;  %vm1946_vm15 = vweird.f32 %v6993_v29  ;;  %vm8877_vm14 = vmmov %vm8871_vm13 }
 0x1e2   : > { %v7030_v60 = vpop.eup %5121  ;;  %vm1935_vm6 = vcmp.eq.f32.partialorder %v1934_v48, 8.507059e+37  ;;  %vm7074_vm1 = vmor %vm1945_vm11, %vm1946_vm15 }
 0x1e3   : > { %v1943_v38 = vmul.f32 %v6993_v29, %v1942_v27  ;;  %v1956_v41 = vmul.f32 %v7030_v60, %v6988_v8  ;;  %v7079_v27 = vpop.xlane.xlu1 %3196 }
 0x1e4   : > { %v3126_v58 = vpop.f32.mrf.mxu3  ;;  %v5124_v33 = vpop.eup %5123 }
 0x1e5   : > { %v3181_v10 = vmul.f32 %v3126_v58, %v6900_v4  ;;  %v1918_v4 = vsel %vm6995_vm9, %v6898_v32, %v1914_v56  ;;  %v7025_v32 = vadd.f32 1.0, %v5120_v1  ;;  %v2335_v56 = vsel %vm8874_vm5, %v2285_v42, 0.0  ;;  %v521_v42 = vld [vmem:[%s5503_s30 + $0xf0] sm:$0xff] }
 0x1e6   : > { %v1923_v9 = vsel %vm7003_vm7, %v1922_v13, %v1918_v4  ;;  %v3312_v40 = vsel %vm3292_vm2, %v3126_v58, 0.0  ;;  %v1933_v58 = vsel %vm7038_vm8, %v6966_v57, %v1929_v28  ;;  %v1951_v13 = vand.u32 2147483648, %v6949_v18 }
 0x1e7   : > { %3359 = vadd.xlane.f32.xlu1 %v3311_v39  ;;  %3230 = vadd.xlane.f32.xlu0 %v3181_v10  ;;  %v2250_v54 = vmul.f32 %v1923_v9, %v6717_v31  ;;  %5125 = vrcp.f32 %v7025_v32  ;;  %v7049_v31 = vld [vmem:[%s8608_s6] ss:$0 sm:$0xff]  ;;  %v7060_v10 = vadd.f32 1.0, %v5124_v33  ;;  %v7065_v39 = vpop.xlane.xlu0 %3198  ;;  %v1944_v57 = vadd.f32 %v6993_v29, %v1943_v38 }
 0x1e8   : > { %2333 = vadd.xlane.f32.xlu2 %v2332_v62  ;;  %v7052_v26 = vadd.f32 %v7049_v31, %v747_v6  ;;  %5127 = vpow2.f32 %v4577_v17  ;;  %v2981_v62 = vpop.f32.mrf.mxu2  ;;  %v1949_v4 = vand.u32 2147483647, %v6949_v18  ;;  %v1957_v49 = vsub.f32 1.0, %v1956_v41 }
 0x1e9   : > { %v2286_v0 = vmul.f32 %v6525_v59, %v2250_v54  ;;  %4495 = vmatmul.msk.f32.gmra.mxu0 %vm8877_vm14, %v521_v42  ;;  %v1952_v33 = vor.u32 1.1754944e-38, %v1951_v13  ;;  %vm1960_vm9 = vweird.f32 %v6988_v8  ;;  %vm1961_vm7 = vweird.f32 %v7030_v60 }
 0x1ea   : > { %v4520_v43 = vmul.f32 -1.442695, %v7052_v26  ;;  %vm1950_vm12 = vcmp.eq.f32.partialorder %v1949_v4, 8.507059e+37  ;;  %v1958_v46 = vmul.f32 %v7030_v60, %v1957_v49  ;;  %v1966_v41 = vand.u32 2147483648, %v6988_v8  ;;  %vm7111_vm3 = vmor %vm1960_vm9, %vm1961_vm7 }
 0x1eb   : > { %v2338_v28 = vsel %vm8878_vm4, %v2286_v0, 0.0  ;;  %v750_v48 = vpop.f32.mrf.mxu0  ;;  %v1964_v0 = vand.u32 2147483647, %v6988_v8  ;;  %v1979_v4 = vand.u32 2147483647, %v7025_v32  ;;  %v7120_v8 = vpop.xlane.xlu2 %3331  ;;  %vm1975_vm13 = vweird.f32 %v7025_v32 }
 0x1ec   : > { %v3129_v19 = vpop.f32.mrf.mxu3  ;;  %5129 = vpow2.f32 %v4520_v43  ;;  %v7087_v54 = vadd.f32 %v7049_v31, %v750_v48  ;;  %v1959_v43 = vadd.f32 %v7030_v60, %v1958_v46  ;;  %8882 = vst [vmem:[#allocation34_spill] sm:$0xff] %v7120_v8  ;;  %v7125_v48 = vpop.xlane.xlu1 %3329  ;;  %vm1990_vm14 = vweird.f32 %v7060_v10 }
 0x1ed   : > { %v3182_v22 = vmul.f32 %v3129_v19, %v2976_v11  ;;  %v1937_v11 = vor.u32 1.1754944e-38, %v1936_v55  ;;  %v7072_v9 = vpop.eup %5125  ;;  %5131 = vrcp.f32 %v7060_v10  ;;  %v3313_v18 = vsel %vm3292_vm2, %v3129_v19, 0.0  ;;  %8883 = vst [vmem:[#allocation35_spill] sm:$0xff] %v7125_v48 }
 0x1ee   : > { %v5128_v45 = vpop.eup %5127  ;;  %v1971_v19 = vmul.f32 %v7072_v9, %v7025_v32  ;;  %vm1965_vm0 = vcmp.eq.f32.partialorder %v1964_v0, 8.507059e+37  ;;  %vm7133_vm8 = vcmp.eq.f32.partialorder %v1979_v4, 8.507059e+37  ;;  %vm1976_vm5 = vweird.f32 %v7072_v9 }
 0x1ef   : > { %2336 = vadd.xlane.f32.xlu0 %v2335_v56  ;;  %3232 = vadd.xlane.f32.xlu1 %v3182_v22  ;;  %v1938_v1 = vsel %vm1935_vm6, %v1937_v11, %v1933_v58  ;;  %v7095_v6 = vadd.f32 1.0, %v5128_v45  ;;  %vm7155_vm15 = vmor %vm1975_vm13, %vm1976_vm5 }
 0x1f0   : > { %3361 = vadd.xlane.f32.xlu2 %v3312_v40  ;;  %v2251_v22 = vmul.f32 %v1938_v1, %v6787_v63  ;;  %v7099_v63 = vpop.xlane.xlu0 %3333  ;;  %v1972_v13 = vsub.f32 1.0, %v1971_v19  ;;  %v2983_v49 = vpop.f32.mrf.mxu2 }
 0x1f1   : > { %8879 = vst [vmem:[#allocation33_spill] sm:$0xff] %v7099_v63 }
 0x1f2   : > { %v5130_v56 = vpop.eup %5129  ;;  %v2287_v58 = vmul.f32 %v6525_v59, %v2251_v22 }
 0x1f3   : > { %v7101_v40 = vadd.f32 1.0, %v5130_v56  ;;  %v7104_v11 = vpop.eup %5131 }
 0x1f4   : > { %v3131_v47 = vpop.f32.mrf.mxu3  ;;  %v2341_v22 = vsel %vm8884_vm10, %v2287_v58, 0.0 }
 0x1f5   : > { %v3183_v17 = vmul.f32 %v3131_v47, %v2978_v21  ;;  %v1948_v21 = vsel %vm7074_vm1, %v6993_v29, %v1944_v57  ;;  %v4521_v29 = vmul.f32 -1.442695, %v7087_v54  ;;  %5133 = vrcp.f32 %v7101_v40  ;;  %vm8889_vm1 = vmmov %vm8878_vm4 }
 0x1f6   : > { %v1953_v38 = vsel %vm1950_vm12, %v1952_v33, %v1948_v21  ;;  %5135 = vrcp.f32 %v7095_v6  ;;  %v3314_v45 = vsel %vm3292_vm2, %v3131_v47, 0.0  ;;  %vm1252_vm6 = vweird.f32 %v7101_v40  ;;  %v522_v47 = vld [vmem:[%s5503_s30 + $0xf8] sm:$0xff]  ;;  %vm8897_vm10 = vmmov %vm8889_vm1 }
 0x1f7   : > { %3363 = vadd.xlane.f32.xlu0 %v3313_v18  ;;  %2339 = vadd.xlane.f32.xlu1 %v2338_v28  ;;  %v2252_v55 = vmul.f32 %v1953_v38, %v6834_v50  ;;  %5137 = vpow2.f32 %v4521_v29  ;;  %v1967_v18 = vor.u32 1.1754944e-38, %v1966_v41  ;;  %v1981_v28 = vand.u32 2147483648, %v7025_v32  ;;  %vm8899_vm5 = vmmov %vm8889_vm1 }
 0x1f8   : > { %3234 = vadd.xlane.f32.xlu2 %v3183_v17  ;;  %v1986_v17 = vmul.f32 %v7104_v11, %v7060_v10  ;;  %v1963_v50 = vsel %vm7111_vm3, %v7030_v60, %v1959_v43  ;;  %v1256_v0 = vand.u32 2147483647, %v7101_v40  ;;  %vm1991_vm12 = vweird.f32 %v7104_v11 }
 0x1f9   : > { %v2288_v19 = vmul.f32 %v6525_v59, %v2252_v55  ;;  %v1968_v29 = vsel %vm1965_vm0, %v1967_v18, %v1963_v50  ;;  %v1982_v60 = vor.u32 1.1754944e-38, %v1981_v28  ;;  %v2986_v28 = vpop.f32.mrf.mxu2  ;;  %vm7201_vm7 = vmor %vm1990_vm14, %vm1991_vm12  ;;  %vm8898_vm0 = vcmask 31744  }
 0x1fa   : > { %v1987_v21 = vsub.f32 1.0, %v1986_v17  ;;  %v7137_v46 = vpop.xlane.xlu0 %3206  ;;  %v2253_v55 = vmul.f32 %v1968_v29, %v6888_v20  ;;  %v7166_v20 = vpop.xlane.xlu1 %3202  ;;  %vm1257_vm9 = vcmp.eq.f32.partialorder %v1256_v0, 8.507059e+37  ;;  %4496 = vmatmul.msk.f32.gmra.mxu0 %vm8898_vm0, %v522_v47 }
 0x1fb   : > { %v5134_v33 = vpop.eup %5133  ;;  %v2344_v18 = vsel %vm8889_vm1, %v2288_v19, 0.0 }
 0x1fc   : > { %v3134_v1 = vpop.f32.mrf.mxu3  ;;  %v7140_v56 = vpop.eup %5135  ;;  %v1248_v38 = vmul.f32 %v5134_v33, %v7101_v40  ;;  %vm1253_vm11 = vweird.f32 %v5134_v33 }
 0x1fd   : > { %v3184_v42 = vmul.f32 %v3134_v1, %v2981_v62  ;;  %v1973_v62 = vmul.f32 %v7072_v9, %v1972_v13  ;;  %v5138_v41 = vpop.eup %5137  ;;  %v1258_v13 = vand.u32 2147483648, %v7101_v40  ;;  %v3315_v32 = vsel %vm3292_vm2, %v3134_v1, 0.0  ;;  %vm7178_vm4 = vmor %vm1252_vm6, %vm1253_vm11  ;;  %v7191_v40 = vld [vmem:[%s8611_s9] ss:$0 sm:$0xff] }
 0x1fe   : > { %v1249_v59 = vsub.f32 1.0, %v1248_v38  ;;  %v7148_v4 = vadd.f32 1.0, %v5138_v41  ;;  %vm2005_vm6 = vweird.f32 %v7095_v6  ;;  %vm2006_vm11 = vweird.f32 %v7140_v56 }
 0x1ff   : > { %3365 = vadd.xlane.f32.xlu1 %v3314_v45  ;;  %3236 = vadd.xlane.f32.xlu0 %v3184_v42  ;;  %v1974_v58 = vadd.f32 %v7072_v9, %v1973_v62  ;;  %v753_v42 = vpop.f32.mrf.mxu0  ;;  %v1988_v45 = vmul.f32 %v7104_v11, %v1987_v21  ;;  %v1994_v62 = vand.u32 2147483647, %v7060_v10  ;;  %v7173_v21 = vpop.xlane.xlu2 %3200  ;;  %v1259_v1 = vor.u32 1.1754944e-38, %v1258_v13  ;;  %vm7249_vm14 = vmor %vm2005_vm6, %vm2006_vm11 }
 0x200   : > { %2342 = vadd.xlane.f32.xlu2 %v2341_v22  ;;  %v2001_v22 = vmul.f32 %v7140_v56, %v7095_v6  ;;  %v1250_v50 = vmul.f32 %v5134_v33, %v1249_v59  ;;  %5139 = vrcp.f32 %v7148_v4  ;;  %v2289_v13 = vmul.f32 %v7191_v40, %v2253_v55 }
 0x201   : > { %v1978_v38 = vsel %vm7155_vm15, %v7072_v9, %v1974_v58  ;;  %v1989_v59 = vadd.f32 %v7104_v11, %v1988_v45  ;;  %vm7207_vm3 = vcmp.eq.f32.partialorder %v1994_v62, 8.507059e+37  ;;  %vm1267_vm13 = vweird.f32 %v7148_v4 }
 0x202   : > { %v1251_v41 = vadd.f32 %v5134_v33, %v1250_v50  ;;  %v1983_v58 = vsel %vm7133_vm8, %v1982_v60, %v1978_v38  ;;  %v7205_v17 = vpop.xlane.xlu0 %3339  ;;  %v2347_v50 = vsel %vm8897_vm10, %v2289_v13, 0.0  ;;  %v1271_v38 = vand.u32 2147483647, %v7148_v4 }
 0x203   : > { %8894 = vst [vmem:[#allocation36_spill] sm:$0xff] %v7205_v17  ;;  %v1993_v62 = vsel %vm7201_vm7, %v7104_v11, %v1989_v59  ;;  %v7228_v11 = vpop.xlane.xlu1 %3335 }
 0x204   : > { %v3136_v43 = vpop.f32.mrf.mxu3  ;;  %v1255_v9 = vsel %vm7178_vm4, %v5134_v33, %v1251_v41  ;;  %8900 = vst [vmem:[#allocation37_spill] sm:$0xff] %v7228_v11  ;;  %v2009_v41 = vand.u32 2147483647, %v7095_v6  ;;  %vm1272_vm1 = vcmp.eq.f32.partialorder %v1271_v38, 8.507059e+37  ;;  %vm8905_vm4 = vmmov %vm8899_vm5 }
 0x205   : > { %v3185_v57 = vmul.f32 %v3136_v43, %v2983_v49  ;;  %v7162_v49 = vadd.f32 %v7049_v31, %v753_v42  ;;  %v2002_v42 = vsub.f32 1.0, %v2001_v22  ;;  %v1260_v55 = vsel %vm1257_vm9, %v1259_v1, %v1255_v9  ;;  %vm8906_vm9 = vmmov %vm8905_vm4 }
 0x206   : > { %v1405_v33 = vmul.f32 %v1260_v55, %v7052_v26  ;;  %v2254_v1 = vmul.f32 %v1983_v58, %v6944_v34  ;;  %v2988_v34 = vpop.f32.mrf.mxu2  ;;  %vm2010_vm12 = vcmp.eq.f32.partialorder %v2009_v41, 8.507059e+37  ;;  %vm8908_vm10 = vmmov %vm8905_vm4 }
 0x207   : > { %2345 = vadd.xlane.f32.xlu0 %v2344_v18  ;;  %3238 = vadd.xlane.f32.xlu1 %v3185_v57  ;;  %v4522_v29 = vmul.f32 -1.442695, %v7162_v49  ;;  %v1996_v57 = vand.u32 2147483648, %v7060_v10  ;;  %v3316_v10 = vsel %vm3292_vm2, %v3136_v43, 0.0  ;;  %v2003_v26 = vmul.f32 %v7140_v56, %v2002_v42 }
 0x208   : > { %3367 = vadd.xlane.f32.xlu2 %v3315_v32  ;;  %v5140_v32 = vpop.eup %5139  ;;  %4552 = vmatmul.msk.f32.gmra.mxu1 %vm8899_vm5, %v1405_v33  ;;  %v2290_v0 = vmul.f32 %v7191_v40, %v2254_v1  ;;  %vm8912_vm5 = vmmov %vm8905_vm4 }
 0x209   : > { %5141 = vpow2.f32 %v4522_v29  ;;  %v1997_v60 = vor.u32 1.1754944e-38, %v1996_v57  ;;  %v1263_v19 = vmul.f32 %v5140_v32, %v7148_v4  ;;  %vm1268_vm8 = vweird.f32 %v5140_v32  ;;  %v7232_v57 = vpop.xlane.xlu2 %3204 }
 0x20a   : > { %vm7237_vm15 = vmor %vm1267_vm13, %vm1268_vm8  ;;  %v2004_v55 = vadd.f32 %v7140_v56, %v2003_v26  ;;  %v2350_v26 = vsel %vm8905_vm4, %v2290_v0, 0.0 }
 0x20b   : > { %v1264_v43 = vsub.f32 1.0, %v1263_v19  ;;  %v1998_v42 = vsel %vm7207_vm3, %v1997_v60, %v1993_v62  ;;  %vm8910_vm8 = vmmov %vm8905_vm4 }
 0x20c   : > { %v3139_v18 = vpop.f32.mrf.mxu3 }
 0x20d   : > { %v3186_v22 = vmul.f32 %v3139_v18, %v2986_v28  ;;  %v1273_v28 = vand.u32 2147483648, %v7148_v4  ;;  %v1265_v13 = vmul.f32 %v5140_v32, %v1264_v43  ;;  %v2011_v4 = vand.u32 2147483648, %v7095_v6 }
 0x20e   : > { %v3317_v19 = vsel %vm3292_vm2, %v3139_v18, 0.0  ;;  %v2008_v6 = vsel %vm7249_vm14, %v7140_v56, %v2004_v55  ;;  %v2991_v43 = vpop.f32.mrf.mxu2 }
 0x20f   : > { %3369 = vadd.xlane.f32.xlu0 %v3316_v10  ;;  %2348 = vadd.xlane.f32.xlu1 %v2347_v50  ;;  %v5142_v29 = vpop.eup %5141  ;;  %v1274_v58 = vor.u32 1.1754944e-38, %v1273_v28  ;;  %v1266_v47 = vadd.f32 %v5140_v32, %v1265_v13  ;;  %v2255_v10 = vmul.f32 %v1998_v42, %v6979_v52  ;;  %v2012_v1 = vor.u32 1.1754944e-38, %v2011_v4  ;;  %v7263_v52 = vpop.xlane.xlu1 %3208 }
 0x210   : > { %3240 = vadd.xlane.f32.xlu2 %v3186_v22  ;;  %v895_v59 = vadd.f32 1.0, %v5142_v29 }
 0x211   : > { %v1270_v50 = vsel %vm7237_vm15, %v5140_v32, %v1266_v47  ;;  %v2291_v29 = vmul.f32 %v7191_v40, %v2255_v10  ;;  %v2013_v18 = vsel %vm2010_vm12, %v2012_v1, %v2008_v6  ;;  %vm8921_vm12 = vmmov %vm8912_vm5 }
 0x212   : > { %v7243_v33 = vpop.xlane.xlu0 %3212  ;;  %5143 = vrcp.f32 %v895_v59  ;;  %v1275_v62 = vsel %vm1272_vm1, %v1274_v58, %v1270_v50  ;;  %vm1282_vm7 = vweird.f32 %v895_v59  ;;  %v1288_v42 = vand.u32 2147483648, %v895_v59 }
 0x213   : > { %v1406_v28 = vmul.f32 %v1275_v62, %v7087_v54  ;;  %v1286_v54 = vand.u32 2147483647, %v895_v59  ;;  %v2256_v4 = vmul.f32 %v2013_v18, %v7015_v30  ;;  %v2353_v58 = vsel %vm8908_vm10, %v2291_v29, 0.0 }
 0x214   : > { %v3141_v22 = vpop.f32.mrf.mxu3  ;;  %v1289_v47 = vor.u32 1.1754944e-38, %v1288_v42 }
 0x215   : > { %v3187_v60 = vmul.f32 %v3141_v22, %v2988_v34  ;;  %4553 = vmatmul.msk.f32.gmra.mxu1 %vm8906_vm9, %v1406_v28  ;;  %v7267_v34 = vpop.xlane.xlu2 %3337  ;;  %v3318_v0 = vsel %vm3292_vm2, %v3141_v22, 0.0  ;;  %vm1287_vm13 = vcmp.eq.f32.partialorder %v1286_v54, 8.507059e+37 }
 0x216   : > { %8907 = vst [vmem:[#allocation38_spill] sm:$0xff] %v7267_v34 }
 0x217   : > { %3371 = vadd.xlane.f32.xlu1 %v3317_v19  ;;  %3242 = vadd.xlane.f32.xlu0 %v3187_v60  ;;  %v2292_v60 = vmul.f32 %v7191_v40, %v2256_v4  ;;  %v7274_v10 = vpop.xlane.xlu1 %3341  ;;  %v1587_v19 = vpop.f32.mrf.mxu1 }
 0x218   : > { %2351 = vadd.xlane.f32.xlu2 %v2350_v26  ;;  %v5144_v32 = vpop.eup %5143  ;;  %8909 = vst [vmem:[#allocation39_spill] sm:$0xff] %v7274_v10 }
 0x219   : > { %v1278_v38 = vmul.f32 %v5144_v32, %v895_v59  ;;  %vm1283_vm3 = vweird.f32 %v5144_v32  ;;  %v2356_v62 = vsel %vm8910_vm8, %v2292_v60, 0.0 }
 0x21a   : > { %v2310_v9 = vpop.xlane.xlu0 %2309  ;;  %vm1284_vm0 = vmor %vm1282_vm7, %vm1283_vm3 }
 0x21b   : > { %v1279_v41 = vsub.f32 1.0, %v1278_v38 }
 0x21c   : > { %v3144_v13 = vpop.f32.mrf.mxu3 }
 0x21d   : > { %v3188_v56 = vmul.f32 %v3144_v13, %v2991_v43  ;;  %v1280_v55 = vmul.f32 %v5144_v32, %v1279_v41  ;;  %v7276_v30 = vpop.xlane.xlu2 %3210  ;;  %v3319_v22 = vsel %vm3292_vm2, %v3144_v13, 0.0  ;;  %v7294_v43 = vld [vmem:[#allocation4] ss:$0 sm:$0xff] }
 0x21e   : > { %v2408_v54 = vadd.f32 %v7294_v43, %v2310_v9 }
 0x21f   : > { %2354 = vadd.xlane.f32.xlu0 %v2353_v58  ;;  %3244 = vadd.xlane.f32.xlu1 %v3188_v56  ;;  %v1281_v45 = vadd.f32 %v5144_v32, %v1280_v55  ;;  %v7285_v6 = vpop.xlane.xlu1 %3214  ;;  %v1590_v29 = vpop.f32.mrf.mxu1 }
 0x220   : > { %3373 = vadd.xlane.f32.xlu2 %v3318_v0  ;;  %v7304_v56 = vadd.f32 %v6941_v44, %v1590_v29 }
 0x221   : > { %v1285_v59 = vsel %vm1284_vm0, %v5144_v32, %v1281_v45  ;;  %v7290_v32 = vadd.f32 %v6941_v44, %v1587_v19  ;;  %v7313_v45 = vadd.f32 %v7079_v27, %v2408_v54  ;;  %vm8922_vm0 = vmmov %vm8912_vm5 }
 0x222   : > { %v1290_v50 = vsel %vm1287_vm13, %v1289_v47, %v1285_v59  ;;  %v7282_v26 = vpop.xlane.xlu0 %3345  ;;  %v4579_v58 = vmul.f32 -1.442695, %v7304_v56 }
 0x223   : > { %v1407_v1 = vmul.f32 %v1290_v50, %v7162_v49  ;;  %8911 = vst [vmem:[#allocation40_spill] sm:$0xff] %v7282_v26  ;;  %v4578_v42 = vmul.f32 -1.442695, %v7290_v32 }
 0x224   : > { %v7287_v28 = vpop.f32.mrf.mxu3  ;;  %8915 = vst [vmem:[#allocation43_spill] sm:$0xff] %v7313_v45 }
 0x225   : > { %4554 = vmatmul.msk.f32.gmra.mxu1 %vm8912_vm5, %v1407_v1  ;;  %v7292_v18 = vpop.xlane.xlu2 %3343  ;;  %v3320_v38 = vsel %vm3292_vm2, %v7287_v28, 0.0 }
 0x226   : > { %8913 = vst [vmem:[#allocation41_spill] sm:$0xff] %v7292_v18 }
 0x227   : > { %3375 = vadd.xlane.f32.xlu0 %v3319_v22  ;;  %2357 = vadd.xlane.f32.xlu1 %v2356_v62  ;;  %v7309_v0 = vpop.xlane.xlu1 %3347  ;;  %v1593_v50 = vpop.f32.mrf.mxu1 }
 0x228   : > { %8914 = vst [vmem:[#allocation42_spill] sm:$0xff] %v7309_v0  ;;  %v7326_v27 = vadd.f32 %v6941_v44, %v1593_v50 }
 0x22a   : > { %v2313_v4 = vpop.xlane.xlu0 %2312 }
 0x22b   : > { %v756_v49 = vpop.f32.mrf.mxu0  ;;  %v2409_v55 = vadd.f32 %v7294_v43, %v2313_v4 }
 0x22c   : > { %v7300_v13 = vadd.f32 %v7049_v31, %v756_v49 }
 0x22d   : > { %v7315_v60 = vpop.xlane.xlu2 %3216  ;;  %v7323_v1 = vadd.f32 %v7065_v39, %v2409_v55 }
 0x22e   : > { %v4523_v41 = vmul.f32 -1.442695, %v7300_v13 }
 0x22f   : > { %3377 = vadd.xlane.f32.xlu1 %v3320_v38  ;;  %8916 = vst [vmem:[#allocation44_spill] sm:$0xff] %v7323_v1  ;;  %v4580_v38 = vmul.f32 -1.442695, %v7326_v27 }
 0x230   : > { %5145 = vpow2.f32 %v4523_v41 }
 0x231   : > { %5147 = vpow2.f32 %v4578_v42  ;;  %v2316_v42 = vpop.xlane.xlu1 %2315 }
 0x232   : > { %5149 = vpow2.f32 %v4579_v58  ;;  %v2410_v58 = vadd.f32 %v7294_v43, %v2316_v42 }
 0x233   : > { %v759_v47 = vpop.f32.mrf.mxu0 }
 0x234   : > { %v7318_v59 = vadd.f32 %v7049_v31, %v759_v47 }
 0x235   : > { %v7332_v54 = vpop.xlane.xlu2 %3349 }
 0x236   : > { %v5146_v9 = vpop.eup %5145  ;;  %v4524_v19 = vmul.f32 -1.442695, %v7318_v59  ;;  %8917 = vst [vmem:[#allocation45_spill] sm:$0xff] %v7332_v54 }
 0x237   : > { %v896_v22 = vadd.f32 1.0, %v5146_v9  ;;  %v5148_v62 = vpop.eup %5147 }
 0x238   : > { %3393 = vperm.xlu2 %4886, %v7313_v45   ;;  %5151 = vpow2.f32 %v4524_v19  ;;  %v7329_v29 = vadd.f32 1.0, %v5148_v62  ;;  %v5150_v49 = vpop.eup %5149  ;;  %v7340_v19 = vadd.f32 %v7173_v21, %v2410_v58 }
 0x239   : > { %5153 = vrcp.f32 %v896_v22  ;;  %v7335_v4 = vadd.f32 1.0, %v5150_v49  ;;  %v1303_v47 = vand.u32 2147483648, %v896_v22  ;;  %vm1297_vm6 = vweird.f32 %v896_v22 }
 0x23a   : > { %5155 = vrcp.f32 %v7329_v29  ;;  %v1301_v9 = vand.u32 2147483647, %v896_v22  ;;  %8918 = vst [vmem:[#allocation46_spill] sm:$0xff] %v7340_v19  ;;  %vm2020_vm3 = vweird.f32 %v7329_v29 }
 0x23b   : > { %3398 = vperm.xlu0 %4887, %v7323_v1   ;;  %5157 = vpow2.f32 %v4580_v38  ;;  %v1304_v38 = vor.u32 1.1754944e-38, %v1303_v47  ;;  %v762_v42 = vpop.f32.mrf.mxu0  ;;  %vm2035_vm8 = vweird.f32 %v7335_v4 }
 0x23c   : > { %vm1302_vm1 = vcmp.eq.f32.partialorder %v1301_v9, 8.507059e+37 }
 0x23d   : > { %v7354_v58 = vpop.xlane.xlu2 %2321 }
 0x23e   : > { %v5152_v41 = vpop.eup %5151 }
 0x23f   : > { %v5154_v39 = vpop.eup %5153  ;;  %v897_v44 = vadd.f32 1.0, %v5152_v41 }
 0x240   : > { %v1293_v55 = vmul.f32 %v5154_v39, %v896_v22  ;;  %vm1298_vm11 = vweird.f32 %v5154_v39  ;;  %v7342_v26 = vpop.eup %5155  ;;  %v7350_v22 = vadd.f32 %v7049_v31, %v762_v42 }
 0x241   : > { %5159 = vrcp.f32 %v897_v44  ;;  %vm7344_vm15 = vmor %vm1297_vm6, %vm1298_vm11  ;;  %v5158_v41 = vpop.eup %5157  ;;  %v2016_v21 = vmul.f32 %v7342_v26, %v7329_v29  ;;  %vm1312_vm14 = vweird.f32 %v897_v44  ;;  %v1316_v9 = vand.u32 2147483647, %v897_v44 }
 0x242   : > { %v1294_v50 = vsub.f32 1.0, %v1293_v55  ;;  %5161 = vrcp.f32 %v7335_v4  ;;  %v4525_v47 = vmul.f32 -1.442695, %v7350_v22  ;;  %v7362_v5 = vadd.f32 1.0, %v5158_v41 }
 0x243   : > { %v2017_v10 = vsub.f32 1.0, %v2016_v21  ;;  %vm1317_vm7 = vcmp.eq.f32.partialorder %v1316_v9, 8.507059e+37  ;;  %vm2021_vm10 = vweird.f32 %v7342_v26  ;;  %v7375_v9 = vpop.xlane.xlu1 %2318 }
 0x244   : > { %v1295_v62 = vmul.f32 %v5154_v39, %v1294_v50  ;;  %5163 = vpow2.f32 %v4525_v47  ;;  %v2026_v47 = vand.u32 2147483648, %v7329_v29  ;;  %vm2022_vm13 = vmor %vm2020_vm3, %vm2021_vm10 }
 0x245   : > { %5165 = vrcp.f32 %v7362_v5  ;;  %v7371_v21 = vpop.xlane.xlu2 %3222  ;;  %vm8928_vm10 = vmmov %vm8922_vm0 }
 0x246   : > { %v1296_v55 = vadd.f32 %v5154_v39, %v1295_v62  ;;  %v1318_v62 = vand.u32 2147483648, %v897_v44 }
 0x247   : > { %v5160_v17 = vpop.eup %5159 }
 0x248   : > { %3403 = vperm.xlu1 %4888, %v7340_v19   ;;  %v1300_v50 = vsel %vm7344_vm15, %v5154_v39, %v1296_v55  ;;  %v1308_v54 = vmul.f32 %v5160_v17, %v897_v44  ;;  %v7359_v63 = vpop.eup %5161  ;;  %vm1313_vm4 = vweird.f32 %v5160_v17  ;;  %v1319_v55 = vor.u32 1.1754944e-38, %v1318_v62 }
 0x249   : > { %v1305_v0 = vsel %vm1302_vm1, %v1304_v38, %v1300_v50  ;;  %v2031_v39 = vmul.f32 %v7359_v63, %v7335_v4  ;;  %vm1314_vm9 = vmor %vm1312_vm14, %vm1313_vm4  ;;  %vm2036_vm5 = vweird.f32 %v7359_v63 }
 0x24a   : > { %v1408_v42 = vmul.f32 %v1305_v0, %v7300_v13  ;;  %v1309_v18 = vsub.f32 1.0, %v1308_v54  ;;  %v5164_v44 = vpop.eup %5163  ;;  %v2018_v13 = vmul.f32 %v7342_v26, %v2017_v10  ;;  %v2024_v10 = vand.u32 2147483647, %v7329_v29  ;;  %vm7391_vm11 = vmor %vm2035_vm8, %vm2036_vm5 }
 0x24b   : > { %v2032_v0 = vsub.f32 1.0, %v2031_v39  ;;  %v898_v50 = vadd.f32 1.0, %v5164_v44  ;;  %v2993_v39 = vpop.f32.mrf.mxu2  ;;  %vm8930_vm8 = vmmov %vm8922_vm0 }
 0x24c   : > { %v1310_v49 = vmul.f32 %v5160_v17, %v1309_v18  ;;  %4555 = vmatmul.msk.f32.gmra.mxu1 %vm8921_vm12, %v1408_v42  ;;  %v2019_v62 = vadd.f32 %v7342_v26, %v2018_v13  ;;  %v7381_v42 = vpop.eup %5165  ;;  %vm2025_vm6 = vcmp.eq.f32.partialorder %v2024_v10, 8.507059e+37  ;;  %vm8931_vm5 = vmmov %vm8922_vm0 }
 0x24d   : > { %5167 = vrcp.f32 %v898_v50  ;;  %v2046_v44 = vmul.f32 %v7381_v42, %v7362_v5  ;;  %v1333_v10 = vand.u32 2147483648, %v898_v50  ;;  %vm1327_vm1 = vweird.f32 %v898_v50 }
 0x24e   : > { %v1311_v38 = vadd.f32 %v5160_v17, %v1310_v49  ;;  %v2039_v49 = vand.u32 2147483647, %v7335_v4  ;;  %v2023_v29 = vsel %vm2022_vm13, %v7342_v26, %v2019_v62  ;;  %v3189_v62 = vmul.f32 %v7287_v28, %v2993_v39 }
 0x24f   : > { %v2047_v26 = vsub.f32 1.0, %v2046_v44  ;;  %v1331_v11 = vand.u32 2147483647, %v898_v50 }
 0x250   : > { %v1315_v54 = vsel %vm1314_vm9, %v5160_v17, %v1311_v38  ;;  %v2033_v17 = vmul.f32 %v7359_v63, %v2032_v0  ;;  %vm2040_vm15 = vcmp.eq.f32.partialorder %v2039_v49, 8.507059e+37  ;;  %v3149_v49 = vpop.f32.mrf.mxu3  ;;  %vm2050_vm9 = vweird.f32 %v7362_v5 }
 0x251   : > { %v1320_v41 = vsel %vm1317_vm7, %v1319_v55, %v1315_v54  ;;  %v2041_v55 = vand.u32 2147483648, %v7335_v4  ;;  %vm1332_vm12 = vcmp.eq.f32.partialorder %v1331_v11, 8.507059e+37  ;;  %vm2051_vm7 = vweird.f32 %v7381_v42  ;;  %v7447_v11 = vpop.xlane.xlu0 %3218 }
 0x252   : > { %v1409_v18 = vmul.f32 %v1320_v41, %v7318_v59  ;;  %v2027_v59 = vor.u32 1.1754944e-38, %v2026_v47  ;;  %v2034_v38 = vadd.f32 %v7359_v63, %v2033_v17  ;;  %v7398_v47 = vpop.xlane.xlu2 %2324  ;;  %v7401_v17 = vpop.xlane.xlu1 %3220  ;;  %vm7413_vm3 = vmor %vm2050_vm9, %vm2051_vm7 }
 0x253   : > { %v5168_v0 = vpop.eup %5167  ;;  %v2042_v41 = vor.u32 1.1754944e-38, %v2041_v55  ;;  %v2996_v13 = vpop.f32.mrf.mxu2 }
 0x254   : > { %4556 = vmatmul.msk.f32.gmra.mxu1 %vm8922_vm0, %v1409_v18  ;;  %v2028_v54 = vsel %vm2025_vm6, %v2027_v59, %v2023_v29  ;;  %v1323_v18 = vmul.f32 %v5168_v0, %v898_v50  ;;  %v2038_v4 = vsel %vm7391_vm11, %v7359_v63, %v2034_v38  ;;  %vm1328_vm14 = vweird.f32 %v5168_v0 }
 0x255   : > { %v2257_v59 = vmul.f32 %v2028_v54, %v7290_v32  ;;  %v2043_v55 = vsel %vm2040_vm15, %v2042_v41, %v2038_v4  ;;  %vm1329_vm4 = vmor %vm1327_vm1, %vm1328_vm14  ;;  %v1334_v63 = vor.u32 1.1754944e-38, %v1333_v10  ;;  %v2048_v38 = vmul.f32 %v7381_v42, %v2047_v26 }
 0x256   : > { %v1324_v34 = vsub.f32 1.0, %v1323_v18  ;;  %v3190_v44 = vmul.f32 %v3149_v49, %v2996_v13  ;;  %v2258_v39 = vmul.f32 %v2043_v55, %v7304_v56  ;;  %v2054_v41 = vand.u32 2147483647, %v7362_v5 }
 0x257   : > { %v2293_v18 = vmul.f32 %v7191_v40, %v2257_v59  ;;  %v2049_v54 = vadd.f32 %v7381_v42, %v2048_v38 }
 0x258   : > { %v1325_v29 = vmul.f32 %v5168_v0, %v1324_v34  ;;  %v2056_v34 = vand.u32 2147483648, %v7362_v5  ;;  %vm2055_vm13 = vcmp.eq.f32.partialorder %v2054_v41, 8.507059e+37 }
 0x259   : > { %v2359_v26 = vsel %vm8928_vm10, %v2293_v18, 0.0  ;;  %v2053_v5 = vsel %vm7413_vm3, %v7381_v42, %v2049_v54  ;;  %v1596_v18 = vpop.f32.mrf.mxu1  ;;  %vm8939_vm3 = vmmov %vm8922_vm0 }
 0x25a   : > { %v1326_v28 = vadd.f32 %v5168_v0, %v1325_v29  ;;  %v7417_v56 = vpop.xlane.xlu2 %3355  ;;  %v2057_v10 = vor.u32 1.1754944e-38, %v2056_v34  ;;  %v7431_v29 = vpop.f32.mrf.mxu3 }
 0x25b   : > { %8927 = vst [vmem:[#allocation47_spill] sm:$0xff] %v7417_v56  ;;  %v2998_v38 = vpop.f32.mrf.mxu2 }
 0x25c   : > { %v1330_v32 = vsel %vm1329_vm4, %v5168_v0, %v1326_v28  ;;  %v7421_v0 = vpop.xlane.xlu1 %3353  ;;  %v2058_v13 = vsel %vm2055_vm13, %v2057_v10, %v2053_v5  ;;  %v3191_v28 = vmul.f32 %v7431_v29, %v2998_v38 }
 0x25d   : > { %v1335_v50 = vsel %vm1332_vm12, %v1334_v63, %v1330_v32  ;;  %8929 = vst [vmem:[#allocation48_spill] sm:$0xff] %v7421_v0  ;;  %v2259_v42 = vmul.f32 %v2058_v13, %v7326_v27  ;;  %vm8937_vm12 = vmmov %vm8922_vm0 }
 0x25e   : > { %v1410_v4 = vmul.f32 %v1335_v50, %v7350_v22  ;;  %v765_v22 = vpop.f32.mrf.mxu0 }
 0x25f   : > { %v7429_v55 = vadd.f32 %v7049_v31, %v765_v22  ;;  %v2295_v54 = vmul.f32 %v7191_v40, %v2259_v42 }
 0x260   : > { %4557 = vmatmul.msk.f32.gmra.mxu1 %vm8922_vm0, %v1410_v4 }
 0x261   : > { %3246 = vadd.xlane.f32.xlu2 %v3189_v62  ;;  %v2294_v62 = vmul.f32 %v7191_v40, %v2258_v39  ;;  %v4526_v63 = vmul.f32 -1.442695, %v7429_v55  ;;  %v2365_v27 = vsel %vm8931_vm5, %v2295_v54, 0.0 }
 0x262   : > { %v7438_v39 = vpop.xlane.xlu2 %3228  ;;  %v7454_v5 = vpop.f32.mrf.mxu3 }
 0x263   : > { %v2362_v59 = vsel %vm8930_vm8, %v2294_v62, 0.0  ;;  %5169 = vpow2.f32 %v4526_v63  ;;  %v2411_v62 = vadd.f32 %v7294_v43, %v7375_v9  ;;  %v3323_v42 = vsel %vm3292_vm2, %v7454_v5, 0.0 }
 0x264   : > { %v7440_v32 = vpop.xlane.xlu1 %3226 }
 0x265   : > { %3248 = vadd.xlane.f32.xlu0 %v3190_v44  ;;  %v3321_v44 = vsel %vm3292_vm2, %v3149_v49, 0.0  ;;  %v7470_v9 = vadd.f32 %v7166_v20, %v2411_v62 }
 0x266   : > { %v768_v34 = vpop.f32.mrf.mxu0 }
 0x267   : > { %v7443_v50 = vadd.f32 %v7049_v31, %v768_v34  ;;  %8932 = vst [vmem:[#allocation49_spill] sm:$0xff] %v7470_v9 }
 0x269   : > { %2360 = vadd.xlane.f32.xlu2 %v2359_v26  ;;  %v5170_v41 = vpop.eup %5169  ;;  %v4527_v49 = vmul.f32 -1.442695, %v7443_v50  ;;  %v1599_v26 = vpop.f32.mrf.mxu1 }
 0x26a   : > { %v899_v4 = vadd.f32 1.0, %v5170_v41  ;;  %v7452_v10 = vpop.xlane.xlu2 %2333 }
 0x26b   : > { %5171 = vpow2.f32 %v4527_v49 }
 0x26c   : > { %5173 = vrcp.f32 %v899_v4  ;;  %v7456_v22 = vpop.xlane.xlu1 %2330  ;;  %vm1342_vm6 = vweird.f32 %v899_v4  ;;  %v1346_v20 = vand.u32 2147483647, %v899_v4 }
 0x26d   : > { %2363 = vadd.xlane.f32.xlu0 %v2362_v59  ;;  %v7461_v59 = vld [vmem:[%s8610_s8] ss:$0 sm:$0xff] }
 0x26e   : > { %v7464_v13 = vadd.f32 %v7461_v59, %v1596_v18  ;;  %v7467_v63 = vadd.f32 %v7461_v59, %v1599_v26  ;;  %v1348_v18 = vand.u32 2147483648, %v899_v4  ;;  %v7480_v26 = vpop.xlane.xlu0 %3351  ;;  %vm1347_vm1 = vcmp.eq.f32.partialorder %v1346_v20, 8.507059e+37 }
 0x26f   : > { %8933 = vst [vmem:[#allocation50_spill] sm:$0xff] %v7480_v26 }
 0x270   : > { %v4581_v54 = vmul.f32 -1.442695, %v7464_v13  ;;  %v4582_v41 = vmul.f32 -1.442695, %v7467_v63 }
 0x271   : > { %3379 = vadd.xlane.f32.xlu2 %v3321_v44  ;;  %v5172_v38 = vpop.eup %5171 }
 0x272   : > { %3250 = vadd.xlane.f32.xlu1 %v3191_v28  ;;  %v5174_v44 = vpop.eup %5173  ;;  %v900_v28 = vadd.f32 1.0, %v5172_v38  ;;  %v1349_v38 = vor.u32 1.1754944e-38, %v1348_v18  ;;  %v7482_v56 = vpop.xlane.xlu2 %3361 }
 0x273   : > { %v1338_v34 = vmul.f32 %v5174_v44, %v899_v4  ;;  %vm1343_vm11 = vweird.f32 %v5174_v44  ;;  %8934 = vst [vmem:[#allocation51_spill] sm:$0xff] %v7482_v56 }
 0x274   : > { %5175 = vrcp.f32 %v900_v28  ;;  %vm1344_vm15 = vmor %vm1342_vm6, %vm1343_vm11  ;;  %vm1357_vm14 = vweird.f32 %v900_v28 }
 0x275   : > { %v1339_v49 = vsub.f32 1.0, %v1338_v34  ;;  %5177 = vpow2.f32 %v4581_v54  ;;  %v7487_v34 = vpop.xlane.xlu1 %3359  ;;  %v1363_v54 = vand.u32 2147483648, %v900_v28 }
 0x276   : > { %5179 = vpow2.f32 %v4582_v41  ;;  %8936 = vst [vmem:[#allocation53_spill] sm:$0xff] %v7487_v34  ;;  %v1361_v41 = vand.u32 2147483647, %v900_v28 }
 0x277   : > { %v1340_v62 = vmul.f32 %v5174_v44, %v1339_v49  ;;  %v771_v20 = vpop.f32.mrf.mxu0 }
 0x278   : > { %vm1362_vm7 = vcmp.eq.f32.partialorder %v1361_v41, 8.507059e+37 }
 0x279   : > { %v1341_v0 = vadd.f32 %v5174_v44, %v1340_v62 }
 0x27a   : > { %2366 = vadd.xlane.f32.xlu1 %v2365_v27  ;;  %v2412_v27 = vadd.f32 %v7294_v43, %v7354_v58  ;;  %v5176_v48 = vpop.eup %5175 }
 0x27b   : > { %v1345_v4 = vsel %vm1344_vm15, %v5174_v44, %v1341_v0  ;;  %v1353_v8 = vmul.f32 %v5176_v48, %v900_v28  ;;  %vm1358_vm4 = vweird.f32 %v5176_v48  ;;  %v5178_v62 = vpop.eup %5177  ;;  %v7495_v0 = vpop.xlane.xlu0 %3224 }
 0x27c   : > { %v1350_v58 = vsel %vm1347_vm1, %v1349_v38, %v1345_v4  ;;  %v5180_v26 = vpop.eup %5179  ;;  %v1602_v44 = vpop.f32.mrf.mxu1  ;;  %vm1359_vm9 = vmor %vm1357_vm14, %vm1358_vm4  ;;  %v7497_v38 = vadd.f32 1.0, %v5178_v62 }
 0x27d   : > { %v1411_v18 = vmul.f32 %v1350_v58, %v7429_v55  ;;  %v1354_v49 = vsub.f32 1.0, %v1353_v8  ;;  %v7500_v28 = vadd.f32 1.0, %v5180_v26  ;;  %v7502_v4 = vpop.xlane.xlu2 %3234  ;;  %v2413_v26 = vadd.f32 %v7294_v43, %v7398_v47 }
 0x27e   : > { %8938 = vst [vmem:[#allocation54_spill] sm:$0xff] %v7502_v4  ;;  %vm2065_vm13 = vweird.f32 %v7497_v38 }
 0x27f   : > { %v1355_v56 = vmul.f32 %v5176_v48, %v1354_v49  ;;  %4558 = vmatmul.msk.f32.gmra.mxu1 %vm8937_vm12, %v1411_v18  ;;  %v7507_v18 = vpop.xlane.xlu1 %3232  ;;  %vm2080_vm6 = vweird.f32 %v7500_v28 }
 0x281   : > { %3408 = vperm.xlu0 %4887, %v7470_v9   ;;  %v1356_v55 = vadd.f32 %v5176_v48, %v1355_v56 }
 0x282   : > { %3383 = vadd.xlane.f32.xlu1 %v3323_v42  ;;  %v7485_v42 = vadd.f32 %v7232_v57, %v2412_v27  ;;  %v7492_v57 = vadd.f32 %v7049_v31, %v771_v20  ;;  %v1364_v27 = vor.u32 1.1754944e-38, %v1363_v54  ;;  %v7505_v31 = vadd.f32 %v7461_v59, %v1602_v44 }
 0x283   : > { %v1360_v58 = vsel %vm1359_vm9, %v5176_v48, %v1356_v55  ;;  %v7516_v62 = vpop.xlane.xlu0 %2327  ;;  %vm8950_vm9 = vmmov %vm8939_vm3 }
 0x284   : > { %8935 = vst [vmem:[#allocation52_spill] sm:$0xff] %v7485_v42  ;;  %v4528_v8 = vmul.f32 -1.442695, %v7492_v57  ;;  %v1365_v49 = vsel %vm1362_vm7, %v1364_v27, %v1360_v58  ;;  %v4583_v56 = vmul.f32 -1.442695, %v7505_v31  ;;  %v7521_v27 = vadd.f32 %v7137_v46, %v2413_v26 }
 0x285   : > { %v1412_v54 = vmul.f32 %v1365_v49, %v7443_v50  ;;  %v7523_v50 = vpop.xlane.xlu2 %2342 }
 0x286   : > { %5181 = vpow2.f32 %v4528_v8  ;;  %8940 = vst [vmem:[#allocation55_spill] sm:$0xff] %v7521_v27 }
 0x287   : > { %5183 = vrcp.f32 %v7497_v38  ;;  %4559 = vmatmul.msk.f32.gmra.mxu1 %vm8939_vm3, %v1412_v54  ;;  %v7526_v8 = vpop.xlane.xlu1 %2339 }
 0x288   : > { %5185 = vrcp.f32 %v7500_v28 }
 0x289   : > { %3413 = vperm.xlu2 %4886, %v7485_v42   ;;  %5187 = vpow2.f32 %v4583_v56 }
 0x28b   : > { %v7531_v34 = vpop.xlane.xlu0 %3357 }
 0x28c   : > { %v5182_v41 = vpop.eup %5181  ;;  %8941 = vst [vmem:[#allocation56_spill] sm:$0xff] %v7531_v34  ;;  %v2086_v34 = vand.u32 2147483648, %v7500_v28 }
 0x28d   : > { %v901_v48 = vadd.f32 1.0, %v5182_v41  ;;  %v5184_v20 = vpop.eup %5183  ;;  %v7537_v1 = vpop.xlane.xlu2 %3367 }
 0x28e   : > { %v7518_v44 = vpop.eup %5185  ;;  %v2061_v55 = vmul.f32 %v5184_v20, %v7497_v38  ;;  %8942 = vst [vmem:[#allocation57_spill] sm:$0xff] %v7537_v1  ;;  %vm2066_vm8 = vweird.f32 %v5184_v20 }
 0x28f   : > { %5189 = vrcp.f32 %v901_v48  ;;  %v2076_v47 = vmul.f32 %v7518_v44, %v7500_v28  ;;  %v5188_v58 = vpop.eup %5187  ;;  %v1378_v26 = vand.u32 2147483648, %v901_v48  ;;  %vm1372_vm10 = vweird.f32 %v901_v48  ;;  %vm7553_vm1 = vmor %vm2065_vm13, %vm2066_vm8 }
 0x290   : > { %v2062_v54 = vsub.f32 1.0, %v2061_v55  ;;  %v7533_v46 = vadd.f32 1.0, %v5188_v58  ;;  %v1376_v42 = vand.u32 2147483647, %v901_v48  ;;  %v2071_v55 = vand.u32 2147483648, %v7497_v38 }
 0x291   : > { %v2077_v56 = vsub.f32 1.0, %v2076_v47  ;;  %v7540_v47 = vpop.xlane.xlu1 %3365  ;;  %vm2081_vm11 = vweird.f32 %v7518_v44 }
 0x292   : > { %v2063_v45 = vmul.f32 %v5184_v20, %v2062_v54  ;;  %8943 = vst [vmem:[#allocation58_spill] sm:$0xff] %v7540_v47  ;;  %5191 = vrcp.f32 %v7533_v46  ;;  %v3001_v54 = vpop.f32.mrf.mxu2  ;;  %vm1377_vm15 = vcmp.eq.f32.partialorder %v1376_v42, 8.507059e+37  ;;  %v2084_v47 = vand.u32 2147483647, %v7500_v28  ;;  %vm7561_vm14 = vmor %vm2080_vm6, %vm2081_vm11 }
 0x293   : > { %v2072_v42 = vor.u32 1.1754944e-38, %v2071_v55  ;;  %v7569_v4 = vpop.xlane.xlu0 %3230  ;;  %vm2095_vm7 = vweird.f32 %v7533_v46 }
 0x294   : > { %vm2085_vm12 = vcmp.eq.f32.partialorder %v2084_v47, 8.507059e+37 }
 0x295   : > { %v5190_v49 = vpop.eup %5189  ;;  %v7578_v55 = vpop.xlane.xlu2 %3240 }
 0x296   : > { %v1368_v41 = vmul.f32 %v5190_v49, %v901_v48  ;;  %vm1373_vm0 = vweird.f32 %v5190_v49  ;;  %v1379_v48 = vor.u32 1.1754944e-38, %v1378_v26 }
 0x297   : > { %vm7543_vm5 = vmor %vm1372_vm10, %vm1373_vm0 }
 0x298   : > { %v1369_v9 = vsub.f32 1.0, %v1368_v41  ;;  %v2069_v41 = vand.u32 2147483647, %v7497_v38  ;;  %v3322_v38 = vsel %vm3292_vm2, %v7431_v29, 0.0  ;;  %v5192_v37 = vpop.eup %5191  ;;  %vm8951_vm10 = vmmov %vm8950_vm9 }
 0x299   : > { %v2091_v29 = vmul.f32 %v5192_v37, %v7533_v46  ;;  %vm2096_vm3 = vweird.f32 %v5192_v37  ;;  %vm8952_vm0 = vmmov %vm8950_vm9 }
 0x29a   : > { %v1370_v19 = vmul.f32 %v5190_v49, %v1369_v9  ;;  %v2064_v9 = vadd.f32 %v5184_v20, %v2063_v45  ;;  %vm2070_vm4 = vcmp.eq.f32.partialorder %v2069_v41, 8.507059e+37  ;;  %v3003_v1 = vpop.f32.mrf.mxu2  ;;  %vm2097_vm13 = vmor %vm2095_vm7, %vm2096_vm3 }
 0x29b   : > { %3418 = vperm.xlu1 %4888, %v7521_v27   ;;  %v2078_v27 = vmul.f32 %v7518_v44, %v2077_v56  ;;  %v2092_v47 = vsub.f32 1.0, %v2091_v29 }
 0x29c   : > { %v1371_v56 = vadd.f32 %v5190_v49, %v1370_v19  ;;  %v2068_v28 = vsel %vm7553_vm1, %v5184_v20, %v2064_v9  ;;  %v1605_v19 = vpop.f32.mrf.mxu1  ;;  %vm8966_vm1 = vcmp.eq.s32.totalorder %v5606_v7, %v5612_v12 }
 0x29d   : > { %v2079_v26 = vadd.f32 %v7518_v44, %v2078_v27  ;;  %v2087_v27 = vor.u32 1.1754944e-38, %v2086_v34  ;;  %v3192_v34 = vmul.f32 %v7454_v5, %v3001_v54  ;;  %v2093_v41 = vmul.f32 %v5192_v37, %v2092_v47  ;;  %v7590_v5 = vpop.xlane.xlu2 %2351 }
 0x29e   : > { %v1375_v53 = vsel %vm7543_vm5, %v5190_v49, %v1371_v56  ;;  %v2073_v49 = vsel %vm2070_vm4, %v2072_v42, %v2068_v28  ;;  %v2099_v42 = vand.u32 2147483647, %v7533_v46  ;;  %vm8957_vm5 = vmmov %vm8952_vm0 }
 0x29f   : > { %v1380_v45 = vsel %vm1377_vm15, %v1379_v48, %v1375_v53  ;;  %v2083_v53 = vsel %vm7561_vm14, %v7518_v44, %v2079_v26  ;;  %v7580_v48 = vpop.xlane.xlu1 %3238  ;;  %v2260_v20 = vmul.f32 %v2073_v49, %v7464_v13  ;;  %v2101_v13 = vand.u32 2147483648, %v7533_v46 }
 0x2a0   : > { %v1413_v3 = vmul.f32 %v1380_v45, %v7492_v57  ;;  %v3156_v57 = vpop.f32.mrf.mxu3  ;;  %v2088_v58 = vsel %vm2085_vm12, %v2087_v27, %v2083_v53  ;;  %v2094_v45 = vadd.f32 %v5192_v37, %v2093_v41  ;;  %vm2100_vm8 = vcmp.eq.f32.partialorder %v2099_v42, 8.507059e+37 }
 0x2a1   : > { %v3193_v56 = vmul.f32 %v3156_v57, %v3003_v1  ;;  %v2261_v44 = vmul.f32 %v2088_v58, %v7467_v63  ;;  %v2296_v9 = vmul.f32 %v7191_v40, %v2260_v20  ;;  %v2102_v28 = vor.u32 1.1754944e-38, %v2101_v13 }
 0x2a2   : > { %4560 = vmatmul.msk.f32.gmra.mxu1 %vm8950_vm9, %v1413_v3  ;;  %v7585_v3 = vpop.xlane.xlu0 %2336  ;;  %v2098_v27 = vsel %vm2097_vm13, %v5192_v37, %v2094_v45  ;;  %v3324_v1 = vsel %vm3292_vm2, %v3156_v57, 0.0  ;;  %v2414_v57 = vadd.f32 %v7294_v43, %v7516_v62  ;;  %v7626_v45 = vadd.f32 %v7461_v59, %v1605_v19 }
 0x2a3   : > { %v2297_v26 = vmul.f32 %v7191_v40, %v2261_v44  ;;  %v2368_v63 = vsel %vm8951_vm10, %v2296_v9, 0.0  ;;  %v2103_v29 = vsel %vm2100_vm8, %v2102_v28, %v2098_v27  ;;  %v2415_v28 = vadd.f32 %v7294_v43, %v7456_v22 }
 0x2a4   : > { %v1608_v58 = vpop.f32.mrf.mxu1  ;;  %v2262_v37 = vmul.f32 %v2103_v29, %v7505_v31  ;;  %v4584_v62 = vmul.f32 -1.442695, %v7626_v45  ;;  %vm8965_vm15 = vcmp.eq.s32.totalorder %v5592_v61, %v5612_v12 }
 0x2a5   : > { %v7604_v20 = vpop.xlane.xlu2 %3373  ;;  %v7611_v44 = vadd.f32 %v7461_v59, %v1608_v58  ;;  %v7644_v58 = vadd.f32 %v7276_v30, %v2415_v28  ;;  %v2416_v28 = vadd.f32 %v7294_v43, %v7452_v10 }
 0x2a6   : > { %8954 = vst [vmem:[#allocation60_spill] sm:$0xff] %v7604_v20  ;;  %v2298_v9 = vmul.f32 %v7191_v40, %v2262_v37 }
 0x2a7   : > { %v7593_v54 = vpop.xlane.xlu1 %2348  ;;  %v4585_v47 = vmul.f32 -1.442695, %v7611_v44  ;;  %8959 = vst [vmem:[#allocation64_spill] sm:$0xff] %v7644_v58  ;;  %v7666_v20 = vadd.f32 %v7243_v33, %v2416_v28 }
 0x2a8   : > { %v7600_v49 = vpop.f32.mrf.mxu3  ;;  %v2374_v13 = vsel %vm8957_vm5, %v2298_v9, 0.0 }
 0x2a9   : > { %5193 = vpow2.f32 %v4585_v47  ;;  %8964 = vst [vmem:[#allocation69_spill] sm:$0xff] %v7666_v20 }
 0x2aa   : > { %v7598_v53 = vpop.xlane.xlu0 %3363  ;;  %5195 = vpow2.f32 %v4584_v62 }
 0x2ab   : > { %3381 = vadd.xlane.f32.xlu0 %v3322_v38  ;;  %v2371_v38 = vsel %vm8952_vm0, %v2297_v26, 0.0  ;;  %8953 = vst [vmem:[#allocation59_spill] sm:$0xff] %v7598_v53 }
 0x2ad   : > { %v3394_v26 = vpop.permute.xlu2 %3393 }
 0x2af   : > { %v5194_v42 = vpop.eup %5193 }
 0x2b0   : > { %v7629_v40 = vpop.f32.mrf.mxu3  ;;  %v1752_v19 = vadd.f32 1.0, %v5194_v42 }
 0x2b2   : > { %3252 = vadd.xlane.f32.xlu2 %v3192_v34  ;;  %v3006_v34 = vpop.f32.mrf.mxu2  ;;  %v7617_v41 = vpop.xlane.xlu0 %3236  ;;  %5197 = vrcp.f32 %v1752_v19  ;;  %vm2125_vm6 = vweird.f32 %v1752_v19  ;;  %v2131_v10 = vand.u32 2147483648, %v1752_v19 }
 0x2b3   : > { %3254 = vadd.xlane.f32.xlu0 %v3193_v56  ;;  %v3194_v46 = vmul.f32 %v7600_v49, %v3006_v34  ;;  %v7607_v56 = vpop.xlane.xlu1 %3371  ;;  %8956 = vst [vmem:[#allocation62_spill] sm:$0xff] %v7617_v41  ;;  %v5196_v34 = vpop.eup %5195 }
 0x2b4   : > { %8955 = vst [vmem:[#allocation61_spill] sm:$0xff] %v7607_v56  ;;  %v1751_v47 = vadd.f32 1.0, %v5196_v34 }
 0x2b6   : > { %5199 = vrcp.f32 %v1751_v47  ;;  %vm2110_vm12 = vweird.f32 %v1751_v47  ;;  %v2114_v41 = vand.u32 2147483647, %v1751_v47 }
 0x2b8   : > { %v5198_v9 = vpop.eup %5197  ;;  %vm2115_vm3 = vcmp.eq.f32.partialorder %v2114_v41, 8.507059e+37 }
 0x2b9   : > { %v2121_v30 = vmul.f32 %v5198_v9, %v1752_v19  ;;  %vm2126_vm11 = vweird.f32 %v5198_v9 }
 0x2ba   : > { %2369 = vadd.xlane.f32.xlu2 %v2368_v63  ;;  %v7621_v63 = vadd.f32 %v7263_v52, %v2414_v57  ;;  %v3326_v52 = vsel %vm3292_vm2, %v7629_v40, 0.0  ;;  %vm2127_vm14 = vmor %vm2125_vm6, %vm2126_vm11  ;;  %vm8971_vm6 = vcmp.eq.s32.totalorder %v5617_v15, %v5612_v12  ;;  %vm8972_vm11 = vcmp.eq.s32.totalorder %v5643_v23, %v5612_v12 }
 0x2bb   : > { %2372 = vadd.xlane.f32.xlu0 %v2371_v38  ;;  %v7623_v31 = vpop.xlane.xlu1 %3244  ;;  %v7632_v38 = vpop.xlane.xlu0 %2345  ;;  %v2122_v42 = vsub.f32 1.0, %v2121_v30  ;;  %v7671_v30 = vsel %vm8965_vm15, %v3394_v26, -1e+30  ;;  %v2132_v26 = vor.u32 1.1754944e-38, %v2131_v10 }
 0x2bc   : > { %8958 = vst [vmem:[#allocation63_spill] sm:$0xff] %v7621_v63 }
 0x2bd   : > { %v2123_v34 = vmul.f32 %v5198_v9, %v2122_v42 }
 0x2bf   : > { %v2124_v42 = vadd.f32 %v5198_v9, %v2123_v34 }
 0x2c1   : > { %v2128_v61 = vsel %vm2127_vm14, %v5198_v9, %v2124_v42 }
 0x2c2   : > { %3385 = vadd.xlane.f32.xlu2 %v3324_v1  ;;  %v1611_v1 = vpop.f32.mrf.mxu1 }
 0x2c3   : > { %v7641_v29 = vpop.xlane.xlu1 %2357  ;;  %v7648_v22 = vadd.f32 %v7461_v59, %v1611_v1  ;;  %v7652_v37 = vpop.xlane.xlu0 %3369 }
 0x2c4   : > { %8960 = vst [vmem:[#allocation65_spill] sm:$0xff] %v7652_v37  ;;  %v5200_v1 = vpop.eup %5199 }
 0x2c5   : > { %3256 = vadd.xlane.f32.xlu1 %v3194_v46  ;;  %v4586_v57 = vmul.f32 -1.442695, %v7648_v22  ;;  %vm2111_vm9 = vweird.f32 %v5200_v1 }
 0x2c6   : > { %vm2112_vm7 = vmor %vm2110_vm12, %vm2111_vm9 }
 0x2c7   : > { %5201 = vpow2.f32 %v4586_v57 }
 0x2cd   : > { %2375 = vadd.xlane.f32.xlu1 %v2374_v13  ;;  %v7655_v13 = vpop.xlane.xlu1 %3377  ;;  %v5202_v53 = vpop.eup %5201 }
 0x2ce   : > { %8961 = vst [vmem:[#allocation66_spill] sm:$0xff] %v7655_v13  ;;  %v2106_v13 = vmul.f32 %v5200_v1, %v1751_v47  ;;  %v1753_v57 = vadd.f32 1.0, %v5202_v53 }
 0x2cf   : > { %3423 = vperm.xlu0 %4887, %v7621_v63   ;;  %v2129_v63 = vand.u32 2147483647, %v1752_v19  ;;  %v2116_v19 = vand.u32 2147483648, %v1751_v47 }
 0x2d0   : > { %v2107_v53 = vsub.f32 1.0, %v2106_v13  ;;  %5203 = vrcp.f32 %v1753_v57  ;;  %v3325_v13 = vsel %vm3292_vm2, %v7600_v49, 0.0  ;;  %vm8968_vm2 = vmmov %vm8952_vm0  ;;  %vm2140_vm10 = vweird.f32 %v1753_v57 }
 0x2d1   : > { %vm2130_vm4 = vcmp.eq.f32.partialorder %v2129_v63, 8.507059e+37  ;;  %v2117_v63 = vor.u32 1.1754944e-38, %v2116_v19  ;;  %vm8970_vm5 = vmmov %vm8968_vm2 }
 0x2d2   : > { %v2108_v7 = vmul.f32 %v5200_v1, %v2107_v53  ;;  %vm8974_vm15 = vmmov %vm8968_vm2 }
 0x2d4   : > { %v7639_v27 = vpop.xlane.xlu2 %3246  ;;  %v2109_v33 = vadd.f32 %v5200_v1, %v2108_v7  ;;  %v7696_v7 = vld [vmem:[%s8611_s9] ss:$0 sm:$0xff] }
 0x2d5   : > { %3389 = vadd.xlane.f32.xlu1 %v3326_v52  ;;  %v7661_v52 = vpop.xlane.xlu0 %3242  ;;  %v7663_v37 = vpop.permute.xlu1 %3403 }
 0x2d6   : > { %8963 = vst [vmem:[#allocation68_spill] sm:$0xff] %v7661_v52  ;;  %v1614_v52 = vpop.f32.mrf.mxu1  ;;  %v5204_v34 = vpop.eup %5203  ;;  %v2113_v42 = vsel %vm2112_vm7, %v5200_v1, %v2109_v33 }
 0x2d7   : > { %v2136_v10 = vmul.f32 %v5204_v34, %v1753_v57  ;;  %v2118_v53 = vsel %vm2115_vm3, %v2117_v63, %v2113_v42  ;;  %vm2141_vm0 = vweird.f32 %v5204_v34  ;;  %v2144_v63 = vand.u32 2147483647, %v1753_v57 }
 0x2d8   : > { %v2263_v1 = vmul.f32 %v2118_v53, %v7626_v45  ;;  %vm2142_vm13 = vmor %vm2140_vm10, %vm2141_vm0  ;;  %vm8981_vm10 = vcmp.eq.s32.totalorder %v5599_v2, %v5612_v12  ;;  %vm8982_vm0 = vcmp.eq.s32.totalorder %v5670_v35, %v5612_v12 }
 0x2d9   : > { %v2137_v47 = vsub.f32 1.0, %v2136_v10  ;;  %vm2145_vm8 = vcmp.eq.f32.partialorder %v2144_v63, 8.507059e+37 }
 0x2da   : > { %3428 = vperm.xlu2 %4886, %v7644_v58  }
 0x2db   : > { %v2138_v19 = vmul.f32 %v5204_v34, %v2137_v47 }
 0x2dc   : > { %v7650_v46 = vpop.xlane.xlu2 %2360 }
 0x2dd   : > { %v7681_v28 = vpop.xlane.xlu0 %2354  ;;  %v2139_v10 = vadd.f32 %v5204_v34, %v2138_v19  ;;  %v2417_v19 = vadd.f32 %v7294_v43, %v7585_v3 }
 0x2de   : > { %v1617_v49 = vpop.f32.mrf.mxu1 }
 0x2df   : > { %v7703_v41 = vadd.f32 %v7461_v59, %v1617_v49  ;;  %v7732_v63 = vadd.f32 %v7285_v6, %v2417_v19 }
 0x2e1   : > { %8973 = vst [vmem:[#allocation72_spill] sm:$0xff] %v7732_v63 }
 0x2e4   : > { %v7657_v62 = vpop.xlane.xlu2 %3379 }
 0x2e5   : > { %8962 = vst [vmem:[#allocation67_spill] sm:$0xff] %v7657_v62  ;;  %v7683_v58 = vpop.xlane.xlu1 %3250  ;;  %v7689_v9 = vpop.xlane.xlu0 %3375 }
 0x2e6   : > { %8967 = vst [vmem:[#allocation70_spill] sm:$0xff] %v7689_v9 }
 0x2ec   : > { %v3414_v56 = vpop.permute.xlu2 %3413 }
 0x2ed   : > { %v7676_v62 = vsel %vm8966_vm1, %v3414_v56, -1e+30  ;;  %v2133_v56 = vsel %vm2130_vm4, %v2132_v26, %v2128_v61  ;;  %v7691_v61 = vpop.xlane.xlu1 %2366  ;;  %v3008_v26 = vpop.f32.mrf.mxu2 }
 0x2ee   : > { %3433 = vperm.xlu1 %4888, %v7666_v20   ;;  %v2264_v20 = vmul.f32 %v2133_v56, %v7611_v44  ;;  %v3399_v33 = vpop.permute.xlu0 %3398 }
 0x2f0   : > { %v2300_v44 = vmul.f32 %v7696_v7, %v2264_v20  ;;  %v2146_v20 = vand.u32 2147483648, %v1753_v57  ;;  %v7715_v57 = vsel %vm8971_vm6, %v3399_v33, -1e+30 }
 0x2f2   : > { %v2380_v56 = vsel %vm8968_vm2, %v2300_v44, 0.0  ;;  %v4588_v44 = vmul.f32 -1.442695, %v7703_v41  ;;  %v2147_v47 = vor.u32 1.1754944e-38, %v2146_v20 }
 0x2f4   : > { %5205 = vpow2.f32 %v4588_v44 }
 0x2f5   : > { %v7705_v42 = vpop.xlane.xlu1 %3383 }
 0x2f6   : > { %8969 = vst [vmem:[#allocation71_spill] sm:$0xff] %v7705_v42  ;;  %v7710_v53 = vpop.xlane.xlu0 %3248 }
 0x2f9   : > { %3387 = vadd.xlane.f32.xlu0 %v3325_v13  ;;  %v3195_v13 = vmul.f32 %v7629_v40, %v3008_v26  ;;  %v2299_v40 = vmul.f32 %v7696_v7, %v2263_v1  ;;  %v2143_v26 = vsel %vm2142_vm13, %v5204_v34, %v2139_v10  ;;  %vm8983_vm13 = vmmov %vm8970_vm5 }
 0x2fa   : > { %v2148_v49 = vsel %vm2145_vm8, %v2147_v47, %v2143_v26  ;;  %v5206_v10 = vpop.eup %5205  ;;  %vm8984_vm8 = vcmp.eq.s32.totalorder %v5615_v14, %v5612_v12 }
 0x2fb   : > { %v2377_v45 = vsel %vm8970_vm5, %v2299_v40, 0.0  ;;  %v2265_v1 = vmul.f32 %v2148_v49, %v7648_v22  ;;  %v1620_v22 = vpop.f32.mrf.mxu1  ;;  %vm8985_vm5 = vcmp.eq.s32.totalorder %v5619_v16, %v5612_v12 }
 0x2fc   : > { %v7742_v49 = vadd.f32 %v7461_v59, %v1620_v22  ;;  %v7753_v22 = vld [vmem:[#allocation4] ss:$0 sm:$0xff] }
 0x2fd   : > { %v2301_v44 = vmul.f32 %v7696_v7, %v2265_v1 }
 0x2fe   : > { %v7735_v40 = vpop.xlane.xlu0 %2363 }
 0x2ff   : > { %v2383_v3 = vsel %vm8974_vm15, %v2301_v44, 0.0 }
 0x301   : > { %2381 = vadd.xlane.f32.xlu0 %v2380_v56 }
 0x303   : > { %3258 = vadd.xlane.f32.xlu2 %v3195_v13  ;;  %v7718_v13 = vadd.f32 %v7461_v59, %v1614_v52  ;;  %v1755_v52 = vadd.f32 1.0, %v5206_v10  ;;  %v4589_v10 = vmul.f32 -1.442695, %v7742_v49 }
 0x305   : > { %v4587_v33 = vmul.f32 -1.442695, %v7718_v13  ;;  %vm2170_vm1 = vweird.f32 %v1755_v52  ;;  %v2174_v9 = vand.u32 2147483647, %v1755_v52 }
 0x306   : > { %v3409_v6 = vpop.permute.xlu0 %3408 }
 0x307   : > { %5207 = vpow2.f32 %v4587_v33  ;;  %vm2175_vm12 = vcmp.eq.f32.partialorder %v2174_v9, 8.507059e+37 }
 0x308   : > { %5209 = vrcp.f32 %v1755_v52 }
 0x30b   : > { %2378 = vadd.xlane.f32.xlu2 %v2377_v45  ;;  %v2418_v45 = vadd.f32 %v7294_v43, %v7526_v8 }
 0x30d   : > { %v3419_v56 = vpop.permute.xlu1 %3418  ;;  %v5208_v47 = vpop.eup %5207  ;;  %v7745_v1 = vadd.f32 %v7315_v60, %v2418_v45  ;;  %v2419_v60 = vadd.f32 %v7753_v22, %v7523_v50 }
 0x30e   : > { %v7723_v34 = vsel %vm8972_vm11, %v3419_v56, -1e+30  ;;  %v5210_v26 = vpop.eup %5209  ;;  %v1754_v56 = vadd.f32 1.0, %v5208_v47  ;;  %v2176_v47 = vand.u32 2147483648, %v1755_v52 }
 0x30f   : > { %v2166_v19 = vmul.f32 %v5210_v26, %v1755_v52  ;;  %8975 = vst [vmem:[#allocation73_spill] sm:$0xff] %v7745_v1  ;;  %vm2171_vm14 = vweird.f32 %v5210_v26 }
 0x310   : > { %5211 = vrcp.f32 %v1754_v56  ;;  %vm2172_vm4 = vmor %vm2170_vm1, %vm2171_vm14  ;;  %vm2155_vm9 = vweird.f32 %v1754_v56 }
 0x311   : > { %v2167_v33 = vsub.f32 1.0, %v2166_v19  ;;  %5213 = vpow2.f32 %v4589_v10  ;;  %v2177_v10 = vor.u32 1.1754944e-38, %v2176_v47  ;;  %vm8986_vm1 = vmmov %vm8983_vm13 }
 0x313   : > { %v2168_v43 = vmul.f32 %v5210_v26, %v2167_v33 }
 0x315   : > { %3438 = vperm.xlu0 %4887, %v7732_v63   ;;  %v2169_v20 = vadd.f32 %v5210_v26, %v2168_v43  ;;  %v1623_v43 = vpop.f32.mrf.mxu1 }
 0x316   : > { %v5212_v8 = vpop.eup %5211 }
 0x317   : > { %v5214_v45 = vpop.eup %5213  ;;  %v2151_v42 = vmul.f32 %v5212_v8, %v1754_v56  ;;  %vm2156_vm7 = vweird.f32 %v5212_v8 }
 0x318   : > { %2384 = vadd.xlane.f32.xlu1 %v2383_v3  ;;  %v1756_v33 = vadd.f32 1.0, %v5214_v45  ;;  %v2159_v45 = vand.u32 2147483647, %v1754_v56  ;;  %vm2157_vm3 = vmor %vm2155_vm9, %vm2156_vm7 }
 0x319   : > { %v2152_v23 = vsub.f32 1.0, %v2151_v42 }
 0x31a   : > { %5215 = vrcp.f32 %v1756_v33  ;;  %vm2160_vm2 = vcmp.eq.f32.partialorder %v2159_v45, 8.507059e+37  ;;  %vm2185_vm6 = vweird.f32 %v1756_v33 }
 0x31b   : > { %v2153_v52 = vmul.f32 %v5212_v8, %v2152_v23 }
 0x31d   : > { %v2154_v47 = vadd.f32 %v5212_v8, %v2153_v52  ;;  %v1626_v23 = vpop.f32.mrf.mxu1 }
 0x31e   : > { %v7749_v44 = vpop.xlane.xlu0 %3381  ;;  %v7785_v52 = vadd.f32 %v7461_v59, %v1626_v23  ;;  %v2191_v23 = vand.u32 2147483648, %v1756_v33 }
 0x31f   : > { %8976 = vst [vmem:[#allocation74_spill] sm:$0xff] %v7749_v44  ;;  %v7760_v44 = vadd.f32 %v7447_v11, %v2419_v60  ;;  %v2161_v11 = vand.u32 2147483648, %v1754_v56 }
 0x320   : > { %v5216_v60 = vpop.eup %5215 }
 0x321   : > { %8978 = vst [vmem:[#allocation76_spill] sm:$0xff] %v7760_v44  ;;  %v2162_v42 = vor.u32 1.1754944e-38, %v2161_v11  ;;  %vm2186_vm11 = vweird.f32 %v5216_v60 }
 0x322   : > { %vm2187_vm15 = vmor %vm2185_vm6, %vm2186_vm11  ;;  %vm8993_vm6 = vcmp.eq.s32.totalorder %v5717_v51, %v5612_v12  ;;  %vm8995_vm11 = vcmp.eq.s32.totalorder %v5647_v25, %v5612_v12 }
 0x323   : > { %3443 = vperm.xlu2 %4886, %v7745_v1   ;;  %v2173_v1 = vsel %vm2172_vm4, %v5210_v26, %v2169_v20  ;;  %v2181_v20 = vmul.f32 %v5216_v60, %v1756_v33  ;;  %v2158_v26 = vsel %vm2157_vm3, %v5212_v8, %v2154_v47  ;;  %vm8988_vm4 = vmmov %vm8986_vm1 }
 0x324   : > { %v2178_v50 = vsel %vm2175_vm12, %v2177_v10, %v2173_v1  ;;  %v2163_v8 = vsel %vm2160_vm2, %v2162_v42, %v2158_v26  ;;  %vm8989_vm12 = vcmp.eq.s32.totalorder %v5645_v24, %v5612_v12 }
 0x325   : > { %v7751_v3 = vpop.xlane.xlu2 %3252  ;;  %v2266_v45 = vmul.f32 %v2163_v8, %v7718_v13 }
 0x326   : > { %8977 = vst [vmem:[#allocation75_spill] sm:$0xff] %v7751_v3  ;;  %v7762_v63 = vpop.xlane.xlu0 %3254  ;;  %v2267_v3 = vmul.f32 %v2178_v50, %v7703_v41  ;;  %v7774_v41 = vsel %vm8981_vm10, %v3409_v6, -1e+30  ;;  %v2182_v50 = vsub.f32 1.0, %v2181_v20  ;;  %v7791_v6 = vsel %vm8984_vm8, %v7663_v37, -1e+30  ;;  %vm8992_vm8 = vmmov %vm8986_vm1 }
 0x327   : > { %8979 = vst [vmem:[#allocation77_spill] sm:$0xff] %v7762_v63  ;;  %v4591_v20 = vmul.f32 -1.442695, %v7785_v52  ;;  %v2302_v37 = vmul.f32 %v7696_v7, %v2266_v45 }
 0x328   : > { %v2303_v9 = vmul.f32 %v7696_v7, %v2267_v3  ;;  %v2183_v42 = vmul.f32 %v5216_v60, %v2182_v50  ;;  %v2420_v50 = vadd.f32 %v7753_v22, %v7632_v38 }
 0x329   : > { %5217 = vpow2.f32 %v4591_v20  ;;  %v2386_v13 = vsel %vm8986_vm1, %v2302_v37, 0.0 }
 0x32a   : > { %v2389_v10 = vsel %vm8983_vm13, %v2303_v9, 0.0 }
 0x32d   : > { %v7757_v19 = vpop.xlane.xlu2 %2369 }
 0x32e   : > { %v7768_v63 = vpop.xlane.xlu0 %2372 }
 0x32f   : > { %v5218_v3 = vpop.eup %5217 }
 0x330   : > { %v1758_v45 = vadd.f32 1.0, %v5218_v3 }
 0x331   : > { %3448 = vperm.xlu1 %4888, %v7760_v44   ;;  %v7811_v44 = vadd.f32 %v7461_v59, %v1623_v43 }
 0x332   : > { %5219 = vrcp.f32 %v1758_v45  ;;  %vm2215_vm9 = vweird.f32 %v1758_v45 }
 0x335   : > { %v7765_v15 = vpop.xlane.xlu2 %3385 }
 0x336   : > { %8980 = vst [vmem:[#allocation78_spill] sm:$0xff] %v7765_v15 }
 0x338   : > { %v7802_v26 = vpop.xlane.xlu1 %3256  ;;  %v5220_v43 = vpop.eup %5219 }
 0x339   : > { %v2211_v3 = vmul.f32 %v5220_v43, %v1758_v45  ;;  %vm2216_vm7 = vweird.f32 %v5220_v43 }
 0x33a   : > { %vm2217_vm3 = vmor %vm2215_vm9, %vm2216_vm7  ;;  %vm8998_vm7 = vcmp.eq.s32.totalorder %v5672_v36, %v5612_v12 }
 0x33b   : > { %vm8997_vm9 = vmmov %vm8988_vm4 }
 0x33d   : > { %v3429_v1 = vpop.permute.xlu2 %3428 }
 0x33e   : > { %v7779_v56 = vsel %vm8982_vm0, %v3429_v1, -1e+30  ;;  %v2184_v1 = vadd.f32 %v5216_v60, %v2183_v42 }
 0x33f   : > { %2390 = vadd.xlane.f32.xlu0 %v2389_v10  ;;  %v2189_v10 = vand.u32 2147483647, %v1756_v33  ;;  %v7814_v33 = vadd.f32 %v7401_v17, %v2420_v50  ;;  %v2421_v17 = vadd.f32 %v7753_v22, %v7593_v54  ;;  %v8990_v50 = vmax.f32 %v7671_v30, %v7676_v62 }
 0x340   : > { %v2188_v8 = vsel %vm2187_vm15, %v5216_v60, %v2184_v1  ;;  %v7808_v9 = vpop.xlane.xlu1 %2375  ;;  %v4590_v60 = vmul.f32 -1.442695, %v7811_v44  ;;  %v2422_v62 = vadd.f32 %v7753_v22, %v7590_v5 }
 0x341   : > { %v3424_v11 = vpop.permute.xlu0 %3423  ;;  %vm2190_vm14 = vcmp.eq.f32.partialorder %v2189_v10, 8.507059e+37 }
 0x342   : > { %v7796_v47 = vsel %vm8985_vm5, %v3424_v11, -1e+30  ;;  %v2192_v11 = vor.u32 1.1754944e-38, %v2191_v23  ;;  %5221 = vpow2.f32 %v4590_v60  ;;  %v2221_v60 = vand.u32 2147483648, %v1758_v45 }
 0x344   : > { %v2193_v15 = vsel %vm2190_vm14, %v2192_v11, %v2188_v8  ;;  %v2212_v8 = vsub.f32 1.0, %v2211_v3 }
 0x345   : > { %v2268_v42 = vmul.f32 %v2193_v15, %v7742_v49  ;;  %v1629_v15 = vpop.f32.mrf.mxu1 }
 0x346   : > { %v7826_v10 = vadd.f32 %v7461_v59, %v1629_v15  ;;  %v2213_v59 = vmul.f32 %v5220_v43, %v2212_v8 }
 0x347   : > { %v2304_v38 = vmul.f32 %v7696_v7, %v2268_v42 }
 0x348   : > { %v7820_v20 = vpop.xlane.xlu1 %3389  ;;  %v5222_v37 = vpop.eup %5221  ;;  %v4592_v54 = vmul.f32 -1.442695, %v7826_v10 }
 0x349   : > { %8987 = vst [vmem:[#allocation79_spill] sm:$0xff] %v7820_v20  ;;  %v2392_v23 = vsel %vm8988_vm4, %v2304_v38, 0.0  ;;  %v1757_v1 = vadd.f32 1.0, %v5222_v37  ;;  %v2214_v38 = vadd.f32 %v5220_v43, %v2213_v59  ;;  %v2222_v37 = vor.u32 1.1754944e-38, %v2221_v60 }
 0x34b   : > { %5223 = vrcp.f32 %v1757_v1  ;;  %vm2200_vm10 = vweird.f32 %v1757_v1 }
 0x34c   : > { %2387 = vadd.xlane.f32.xlu2 %v2386_v13  ;;  %v7832_v13 = vadd.f32 %v7371_v21, %v2421_v17  ;;  %5225 = vpow2.f32 %v4592_v54  ;;  %v2218_v17 = vsel %vm2217_vm3, %v5220_v43, %v2214_v38  ;;  %v2206_v43 = vand.u32 2147483648, %v1757_v1 }
 0x351   : > { %v5224_v21 = vpop.eup %5223 }
 0x352   : > { %v2196_v30 = vmul.f32 %v5224_v21, %v1757_v1  ;;  %v5226_v3 = vpop.eup %5225  ;;  %vm2201_vm0 = vweird.f32 %v5224_v21 }
 0x353   : > { %3453 = vperm.xlu0 %4887, %v7814_v33   ;;  %v1759_v8 = vadd.f32 1.0, %v5226_v3  ;;  %vm2202_vm13 = vmor %vm2200_vm10, %vm2201_vm0 }
 0x355   : > { %5227 = vrcp.f32 %v1759_v8  ;;  %vm2230_vm15 = vweird.f32 %v1759_v8 }
 0x35b   : > { %2393 = vadd.xlane.f32.xlu1 %v2392_v23  ;;  %v2219_v23 = vand.u32 2147483647, %v1758_v45  ;;  %v5228_v38 = vpop.eup %5227 }
 0x35c   : > { %vm2231_vm1 = vweird.f32 %v5228_v38 }
 0x35d   : > { %vm2220_vm2 = vcmp.eq.f32.partialorder %v2219_v23, 8.507059e+37  ;;  %vm2232_vm14 = vmor %vm2230_vm15, %vm2231_vm1 }
 0x35e   : > { %v2223_v15 = vsel %vm2220_vm2, %v2222_v37, %v2218_v17 }
 0x360   : > { %v3434_v49 = vpop.permute.xlu1 %3433 }
 0x361   : > { %v3559_v11 = vsel %vm8989_vm12, %v3434_v49, -1e+30  ;;  %v7844_v49 = vadd.f32 %v7495_v0, %v2422_v62  ;;  %v2204_v0 = vand.u32 2147483647, %v1757_v1 }
 0x362   : > { %v7837_v42 = vmax.f32 %v8990_v50, %v3559_v11  ;;  %v2197_v11 = vsub.f32 1.0, %v2196_v30  ;;  %v2270_v50 = vmul.f32 %v2223_v15, %v7785_v52  ;;  %v2207_v52 = vor.u32 1.1754944e-38, %v2206_v43 }
 0x363   : > { %vm2205_vm5 = vcmp.eq.f32.partialorder %v2204_v0, 8.507059e+37  ;;  %v2226_v30 = vmul.f32 %v5228_v38, %v1759_v8 }
 0x364   : > { %3458 = vperm.xlu2 %4886, %v7832_v13   ;;  %v2198_v54 = vmul.f32 %v5224_v21, %v2197_v11  ;;  %v2306_v5 = vmul.f32 %v7696_v7, %v2270_v50 }
 0x365   : > { %v2227_v15 = vsub.f32 1.0, %v2226_v30 }
 0x366   : > { %v2199_v60 = vadd.f32 %v5224_v21, %v2198_v54  ;;  %v2398_v23 = vsel %vm8992_vm8, %v2306_v5, 0.0  ;;  %v8994_v5 = vmax.f32 %v7791_v6, %v7796_v47  ;;  %v2234_v47 = vand.u32 2147483647, %v1759_v8 }
 0x368   : > { %v2203_v37 = vsel %vm2202_vm13, %v5224_v21, %v2199_v60  ;;  %vm2235_vm12 = vcmp.eq.f32.partialorder %v2234_v47, 8.507059e+37 }
 0x369   : > { %v2208_v3 = vsel %vm2205_vm5, %v2207_v52, %v2203_v37  ;;  %v2423_v52 = vadd.f32 %v7753_v22, %v7681_v28 }
 0x36a   : > { %v2269_v11 = vmul.f32 %v2208_v3, %v7811_v44  ;;  %v8996_v44 = vmax.f32 %v7715_v57, %v7723_v34  ;;  %v2426_v34 = vadd.f32 %v7753_v22, %v7735_v40 }
 0x36b   : > { %v7878_v3 = vadd.f32 %v7440_v32, %v2423_v52  ;;  %v2429_v32 = vadd.f32 %v7753_v22, %v7768_v63  ;;  %v9003_v52 = vld [vmem:[#allocation68_spill] sm:$0xff] }
 0x36c   : > { %v7848_v45 = vpop.xlane.xlu0 %3387  ;;  %v2305_v60 = vmul.f32 %v7696_v7, %v2269_v11 }
 0x36d   : > { %8991 = vst [vmem:[#allocation80_spill] sm:$0xff] %v7848_v45  ;;  %v2228_v45 = vmul.f32 %v5228_v38, %v2227_v15  ;;  %v7895_v40 = vadd.f32 %v7580_v48, %v2429_v32  ;;  %v2427_v48 = vadd.f32 %v7753_v22, %v7691_v61 }
 0x36e   : > { %v2395_v37 = vsel %vm8988_vm4, %v2305_v60, 0.0 }
 0x36f   : > { %v2229_v6 = vadd.f32 %v5228_v38, %v2228_v45 }
 0x371   : > { %v2233_v15 = vsel %vm2232_vm14, %v5228_v38, %v2229_v6 }
 0x374   : > { %3463 = vperm.xlu1 %4888, %v7844_v49   ;;  %v2382_v17 = vpop.xlane.xlu0 %2381 }
 0x376   : > { %v7850_v59 = vpop.xlane.xlu2 %3258 }
 0x37d   : > { %2399 = vadd.xlane.f32.xlu0 %v2398_v23  ;;  %v2236_v23 = vand.u32 2147483648, %v1759_v8  ;;  %v7885_v8 = vadd.f32 %v7507_v18, %v2426_v34 }
 0x37e   : > { %v7854_v62 = vpop.xlane.xlu2 %2378 }
 0x37f   : > { %v2237_v30 = vor.u32 1.1754944e-38, %v2236_v23  ;;  %v2431_v23 = vadd.f32 %v7753_v22, %v7854_v62 }
 0x381   : > { %v2238_v57 = vsel %vm2235_vm12, %v2237_v30, %v2233_v15  ;;  %v7952_v6 = vadd.f32 %v9003_v52, %v2431_v23  ;;  %v9006_v15 = vld [vmem:[#allocation15_spill] sm:$0xff] }
 0x382   : > { %v2271_v28 = vmul.f32 %v2238_v57, %v7826_v10  ;;  %vm9007_vm2 = vcmp.eq.s32.totalorder %v9006_v15, %v5612_v12 }
 0x384   : > { %v2307_v45 = vmul.f32 %v7696_v7, %v2271_v28  ;;  %v2432_v7 = vadd.f32 %v7753_v22, %v2382_v17 }
 0x386   : > { %v3444_v50 = vpop.permute.xlu2 %3443  ;;  %v2401_v11 = vsel %vm8997_vm9, %v2307_v45, 0.0 }
 0x387   : > { %v3561_v1 = vsel %vm8993_vm6, %v3444_v50, -1e+30  ;;  %v3439_v54 = vpop.permute.xlu0 %3438  ;;  %v2424_v50 = vadd.f32 %v7753_v22, %v7641_v29  ;;  %v9000_v29 = vld [vmem:[#allocation54_spill] sm:$0xff] }
 0x388   : > { %v7863_v21 = vmax.f32 %v8994_v5, %v3561_v1  ;;  %v3560_v43 = vsel %vm8995_vm11, %v3439_v54, -1e+30  ;;  %v8999_v1 = vmax.f32 %v7774_v41, %v7779_v56  ;;  %v7918_v17 = vadd.f32 %v9000_v29, %v2427_v48  ;;  %v9013_v29 = vld [vmem:[#allocation77_spill] sm:$0xff] }
 0x389   : > { %v7872_v0 = vmax.f32 %v8996_v44, %v3560_v43  ;;  %v7899_v18 = vadd.f32 %v7438_v39, %v2424_v50  ;;  %v7914_v39 = vadd.f32 %v7623_v31, %v2432_v7  ;;  %v2430_v41 = vadd.f32 %v7753_v22, %v7808_v9  ;;  %v9002_v9 = vld [vmem:[#allocation62_spill] sm:$0xff]  ;;  %v9010_v50 = vld [vmem:[#allocation13_spill] sm:$0xff] }
 0x38a   : > { %v2425_v56 = vadd.f32 %v7753_v22, %v7650_v46  ;;  %vm9011_vm10 = vcmp.eq.s32.totalorder %v9010_v50, %v5612_v12 }
 0x38b   : > { %v2385_v38 = vpop.xlane.xlu1 %2384  ;;  %v7926_v43 = vadd.f32 %v7578_v55, %v2430_v41  ;;  %v2428_v55 = vadd.f32 %v7753_v22, %v7757_v19 }
 0x38c   : > { %v7930_v61 = vadd.f32 %v7569_v4, %v2425_v56  ;;  %v2433_v44 = vadd.f32 %v7753_v22, %v2385_v38 }
 0x38d   : > { %2396 = vadd.xlane.f32.xlu2 %v2395_v37  ;;  %v7945_v4 = vadd.f32 %v9002_v9, %v2428_v55  ;;  %v9004_v37 = vld [vmem:[#allocation12_spill] sm:$0xff] }
 0x38e   : > { %v7942_v46 = vadd.f32 %v7639_v27, %v2433_v44  ;;  %vm9005_vm3 = vcmp.eq.s32.totalorder %v9004_v37, %v5612_v12 }
 0x391   : > { %3468 = vperm.xlu0 %4887, %v7878_v3  }
 0x399   : > { %3483 = vperm.xlu0 %4887, %v7885_v8  }
 0x39e   : > { %2402 = vadd.xlane.f32.xlu1 %v2401_v11 }
 0x3a1   : > { %3498 = vperm.xlu0 %4887, %v7895_v40  }
 0x3a3   : > { %v3449_v10 = vpop.permute.xlu1 %3448 }
 0x3a4   : > { %v3562_v63 = vsel %vm8998_vm7, %v3449_v10, -1e+30 }
 0x3a5   : > { %v7908_v54 = vmax.f32 %v8999_v1, %v3562_v63  ;;  %3473 = vperm.xlu2 %4886, %v7899_v18  }
 0x3a9   : > { %3513 = vperm.xlu0 %4887, %v7914_v39  }
 0x3ad   : > { %3488 = vperm.xlu2 %4886, %v7918_v17  }
 0x3b2   : > { %v2391_v5 = vpop.xlane.xlu0 %2390 }
 0x3b3   : > { %v2435_v31 = vadd.f32 %v7753_v22, %v2391_v5 }
 0x3b5   : > { %v7933_v60 = vadd.f32 %v7683_v58, %v2435_v31  ;;  %3503 = vperm.xlu2 %4886, %v7926_v43  }
 0x3b7   : > { %9001 = vst [vmem:[#allocation54_spill] sm:$0xff] %v7933_v60  ;;  %3478 = vperm.xlu1 %4888, %v7930_v61   ;;  %3528 = vperm.xlu0 %4887, %v7933_v60  }
 0x3bd   : > { %3518 = vperm.xlu2 %4886, %v7942_v46  }
 0x3bf   : > { %v2388_v58 = vpop.xlane.xlu2 %2387  ;;  %3493 = vperm.xlu1 %4888, %v7945_v4  }
 0x3c0   : > { %v2434_v34 = vadd.f32 %v7753_v22, %v2388_v58 }
 0x3c2   : > { %v7965_v28 = vadd.f32 %v7710_v53, %v2434_v34  ;;  %v9016_v34 = vld [vmem:[#allocation14_spill] sm:$0xff] }
 0x3c3   : > { %vm9017_vm0 = vcmp.eq.s32.totalorder %v9016_v34, %v5612_v12 }
 0x3c5   : > { %v3454_v47 = vpop.permute.xlu0 %3453 }
 0x3c6   : > { %v3563_v27 = vsel %vm9005_vm3, %v3454_v47, -1e+30 }
 0x3c7   : > { %v3591_v19 = vmax.f32 %v7837_v42, %v3563_v27  ;;  %v3459_v30 = vpop.permute.xlu2 %3458  ;;  %3508 = vperm.xlu1 %4888, %v7952_v6   ;;  %v9008_v42 = vld [vmem:[#allocation75_spill] sm:$0xff] }
 0x3c8   : > { %v3564_v57 = vsel %vm9007_vm2, %v3459_v30, -1e+30 }
 0x3c9   : > { %v3592_v62 = vmax.f32 %v7872_v0, %v3564_v57 }
 0x3ce   : > { %v2394_v45 = vpop.xlane.xlu1 %2393 }
 0x3cf   : > { %v2436_v32 = vadd.f32 %v7753_v22, %v2394_v45  ;;  %3523 = vperm.xlu1 %4888, %v7965_v28  }
 0x3d1   : > { %v7970_v38 = vadd.f32 %v9008_v42, %v2436_v32 }
 0x3d3   : > { %9009 = vst [vmem:[#allocation62_spill] sm:$0xff] %v7970_v38  ;;  %3533 = vperm.xlu2 %4886, %v7970_v38   ;;  %v9034_v38 = vld [vmem:[#allocation26_spill] sm:$0xff] }
 0x3d4   : > { %vm9035_vm4 = vcmp.eq.s32.totalorder %v9034_v38, %v5612_v12 }
 0x3e6   : > { %v3464_v11 = vpop.permute.xlu1 %3463 }
 0x3e7   : > { %v3565_v7 = vsel %vm9011_vm10, %v3464_v11, -1e+30  ;;  %v9020_v11 = vld [vmem:[#allocation17_spill] sm:$0xff] }
 0x3e8   : > { %v3593_v0 = vmax.f32 %v7863_v21, %v3565_v7  ;;  %vm9021_vm8 = vcmp.eq.s32.totalorder %v9020_v11, %v5612_v12 }
 0x3f0   : > { %v2400_v10 = vpop.xlane.xlu0 %2399 }
 0x3f1   : > { %v2438_v53 = vadd.f32 %v7753_v22, %v2400_v10  ;;  %v9022_v10 = vld [vmem:[#allocation22_spill] sm:$0xff] }
 0x3f2   : > { %vm9023_vm5 = vcmp.eq.s32.totalorder %v9022_v10, %v5612_v12 }
 0x3f3   : > { %v7979_v63 = vadd.f32 %v7802_v26, %v2438_v53 }
 0x3f5   : > { %9012 = vst [vmem:[#allocation68_spill] sm:$0xff] %v7979_v63  ;;  %3543 = vperm.xlu0 %4887, %v7979_v63   ;;  %v9030_v63 = vld [vmem:[#allocation25_spill] sm:$0xff] }
 0x3f6   : > { %vm9031_vm1 = vcmp.eq.s32.totalorder %v9030_v63, %v5612_v12 }
 0x400   : > { %v2397_v1 = vpop.xlane.xlu2 %2396 }
 0x401   : > { %v2437_v48 = vadd.f32 %v7753_v22, %v2397_v1 }
 0x403   : > { %v7984_v41 = vadd.f32 %v9013_v29, %v2437_v48  ;;  %v3469_v26 = vpop.permute.xlu0 %3468  ;;  %v9024_v29 = vld [vmem:[#allocation24_spill] sm:$0xff] }
 0x404   : > { %vm9025_vm6 = vcmp.eq.s32.totalorder %v9024_v29, %v5612_v12 }
 0x405   : > { %9014 = vst [vmem:[#allocation12_spill] sm:$0xff] %v7984_v41  ;;  %3538 = vperm.xlu1 %4888, %v7984_v41  }
 0x408   : > { %v3474_v31 = vpop.permute.xlu2 %3473 }
 0x40b   : > { %v3484_v44 = vpop.permute.xlu0 %3483 }
 0x40c   : > { %v3569_v7 = vsel %vm9021_vm8, %v3484_v44, -1e+30 }
 0x410   : > { %v3489_v55 = vpop.permute.xlu2 %3488 }
 0x411   : > { %v2403_v56 = vpop.xlane.xlu1 %2402 }
 0x412   : > { %v2439_v5 = vadd.f32 %v7753_v22, %v2403_v56  ;;  %v3566_v22 = vsel %vm9017_vm0, %v3469_v26, -1e+30 }
 0x413   : > { %v3499_v58 = vpop.permute.xlu0 %3498  ;;  %v3594_v32 = vmax.f32 %v7908_v54, %v3566_v22  ;;  %v3597_v54 = vmax.f32 %v3593_v0, %v3569_v7 }
 0x414   : > { %v7989_v21 = vadd.f32 %v7850_v59, %v2439_v5  ;;  %v9018_v59 = vld [vmem:[#allocation21_spill] sm:$0xff]  ;;  %v9026_v5 = vld [vmem:[#allocation18_spill] sm:$0xff] }
 0x415   : > { %vm9019_vm13 = vcmp.eq.s32.totalorder %v9018_v59, %v5612_v12  ;;  %vm9027_vm11 = vcmp.eq.s32.totalorder %v9026_v5, %v5612_v12 }
 0x416   : > { %9015 = vst [vmem:[#allocation15_spill] sm:$0xff] %v7989_v21  ;;  %3548 = vperm.xlu2 %4886, %v7989_v21   ;;  %v3570_v45 = vsel %vm9019_vm13, %v3489_v55, -1e+30  ;;  %v3567_v26 = vsel %vm9027_vm11, %v3474_v31, -1e+30  ;;  %v9028_v55 = vld [vmem:[#allocation16_spill] sm:$0xff]  ;;  %vm9050_vm13 = vcmp.eq.s32.totalorder %v5615_v14, %v5612_v12 }
 0x417   : > { %v3598_v1 = vmax.f32 %v3594_v32, %v3570_v45  ;;  %vm9029_vm15 = vcmp.eq.s32.totalorder %v9028_v55, %v5612_v12  ;;  %v9032_v32 = vld [vmem:[#allocation19_spill] sm:$0xff]  ;;  %v3595_v21 = vmax.f32 %v3591_v19, %v3567_v26  ;;  %v9036_v31 = vld [vmem:[#allocation29_spill] sm:$0xff] }
 0x418   : > { %v3504_v23 = vpop.permute.xlu2 %3503  ;;  %vm9033_vm14 = vcmp.eq.s32.totalorder %v9032_v32, %v5612_v12  ;;  %vm9037_vm12 = vcmp.eq.s32.totalorder %v9036_v31, %v5612_v12  ;;  %v9057_v14 = vld [vmem:[#allocation9_spill] sm:$0xff] }
 0x419   : > { %v3573_v56 = vsel %vm9025_vm6, %v3504_v23, -1e+30  ;;  %vm9058_vm11 = vcmp.eq.s32.totalorder %v9057_v14, %v5612_v12 }
 0x41a   : > { %v3601_v45 = vmax.f32 %v3597_v54, %v3573_v56  ;;  %v9040_v54 = vld [vmem:[#allocation20_spill] sm:$0xff] }
 0x41b   : > { %v3514_v47 = vpop.permute.xlu0 %3513  ;;  %vm9041_vm7 = vcmp.eq.s32.totalorder %v9040_v54, %v5612_v12 }
 0x41c   : > { %v3572_v19 = vsel %vm9041_vm7, %v3499_v58, -1e+30  ;;  %v9048_v58 = vld [vmem:[#allocation28_spill] sm:$0xff]  ;;  %vm9065_vm7 = vcmp.eq.s32.totalorder %v5647_v25, %v5612_v12 }
 0x41d   : > { %vm9049_vm0 = vcmp.eq.s32.totalorder %v9048_v58, %v5612_v12 }
 0x420   : > { %v3519_v27 = vpop.permute.xlu2 %3518 }
 0x429   : > { %v3479_v9 = vpop.permute.xlu1 %3478  ;;  %v3529_v57 = vpop.permute.xlu0 %3528 }
 0x42a   : > { %v3568_v22 = vsel %vm9029_vm15, %v3479_v9, -1e+30  ;;  %v3578_v0 = vsel %vm9035_vm4, %v3529_v57, -1e+30  ;;  %v9042_v57 = vld [vmem:[#allocation23_spill] sm:$0xff]  ;;  %vm9059_vm15 = vcmp.eq.s32.totalorder %v5599_v2, %v5612_v12  ;;  %vm9062_vm4 = vcmp.eq.s32.totalorder %v5619_v16, %v5612_v12 }
 0x42b   : > { %v3596_v60 = vmax.f32 %v3592_v62, %v3568_v22  ;;  %vm9043_vm3 = vcmp.eq.s32.totalorder %v9042_v57, %v5612_v12 }
 0x42c   : > { %v3575_v22 = vsel %vm9043_vm3, %v3514_v47, -1e+30  ;;  %vm9066_vm3 = vcmp.eq.s32.totalorder %v9010_v50, %v5612_v12 }
 0x42d   : > { %v3534_v42 = vpop.permute.xlu2 %3533  ;;  %v3600_v26 = vmax.f32 %v3596_v60, %v3572_v19 }
 0x431   : > { %v3494_v52 = vpop.permute.xlu1 %3493 }
 0x432   : > { %v3571_v23 = vsel %vm9033_vm14, %v3494_v52, -1e+30  ;;  %vm9061_vm14 = vcmp.eq.s32.totalorder %v5670_v35, %v5612_v12 }
 0x433   : > { %v3599_v41 = vmax.f32 %v3595_v21, %v3571_v23 }
 0x439   : > { %v3509_v30 = vpop.permute.xlu1 %3508 }
 0x43a   : > { %v3574_v53 = vsel %vm9023_vm5, %v3509_v30, -1e+30 }
 0x43b   : > { %v3602_v44 = vmax.f32 %v3598_v1, %v3574_v53 }
 0x43d   : > { %v3606_v1 = vmax.f32 %v3602_v44, %v3578_v0  ;;  %v9046_v0 = vld [vmem:[#allocation30_spill] sm:$0xff] }
 0x43e   : > { %vm9047_vm10 = vcmp.eq.s32.totalorder %v9046_v0, %v5612_v12 }
 0x441   : > { %v3524_v48 = vpop.permute.xlu1 %3523 }
 0x442   : > { %v3577_v30 = vsel %vm9031_vm1, %v3524_v48, -1e+30  ;;  %v9038_v48 = vld [vmem:[#allocation31_spill] sm:$0xff]  ;;  %vm9060_vm1 = vcmp.eq.s32.totalorder %v5645_v24, %v5612_v12 }
 0x443   : > { %v3605_v7 = vmax.f32 %v3601_v45, %v3577_v30  ;;  %vm9039_vm9 = vcmp.eq.s32.totalorder %v9038_v48, %v5612_v12  ;;  %v3603_v30 = vmax.f32 %v3599_v41, %v3575_v22  ;;  %v9044_v45 = vld [vmem:[#allocation27_spill] sm:$0xff] }
 0x444   : > { %vm9045_vm2 = vcmp.eq.s32.totalorder %v9044_v45, %v5612_v12 }
 0x445   : > { %v3576_v21 = vsel %vm9045_vm2, %v3519_v27, -1e+30  ;;  %v8044_v27 = vld [vmem:[#allocation2] sm:$0x1]  ;;  %vm9067_vm2 = vcmp.eq.s32.totalorder %v9006_v15, %v5612_v12 }
 0x446   : > { %v3604_v23 = vmax.f32 %v3600_v26, %v3576_v21  ;;  %v9051_v21 = vld [vmem:[#allocation10_spill] sm:$0xff] }
 0x447   : > { %vm9052_vm8 = vcmp.eq.s32.totalorder %v9051_v21, %v5612_v12 }
 0x467   : > { %v3544_v20 = vpop.permute.xlu0 %3543 }
 0x468   : > { %v3581_v9 = vsel %vm9037_vm12, %v3544_v20, -1e+30  ;;  %vm9063_vm12 = vcmp.eq.s32.totalorder %v5672_v36, %v5612_v12 }
 0x469   : > { %v3609_v62 = vmax.f32 %v3605_v7, %v3581_v9 }
 0x470   : > { %v3549_v53 = vpop.permute.xlu2 %3548 }
 0x471   : > { %v3582_v56 = vsel %vm9039_vm9, %v3549_v53, -1e+30  ;;  %v3579_v53 = vsel %vm9047_vm10, %v3534_v42, -1e+30  ;;  %vm9064_vm9 = vcmp.eq.s32.totalorder %v5717_v51, %v5612_v12  ;;  %vm9068_vm10 = vcmp.eq.s32.totalorder %v9004_v37, %v5612_v12 }
 0x472   : > { %v3610_v52 = vmax.f32 %v3606_v1, %v3582_v56  ;;  %v3607_v9 = vmax.f32 %v3603_v30, %v3579_v53 }
 0x474   : > { %v3612_v20 = vmax.f32 %v3609_v62, %v3610_v52 }
 0x477   : > { %v3539_v44 = vpop.permute.xlu1 %3538 }
 0x478   : > { %v3580_v60 = vsel %vm9049_vm0, %v3539_v44, -1e+30  ;;  %vm9069_vm0 = vcmp.eq.s32.totalorder %v9028_v55, %v5612_v12 }
 0x479   : > { %v3608_v7 = vmax.f32 %v3604_v23, %v3580_v60  ;;  %v9053_v23 = vld [vmem:[#allocation8_spill] sm:$0xff]  ;;  %v9055_v60 = vld [vmem:[#allocation11_spill] sm:$0xff] }
 0x47a   : > { %vm9054_vm5 = vcmp.eq.s32.totalorder %v9053_v23, %v5612_v12  ;;  %vm9056_vm6 = vcmp.eq.s32.totalorder %v9055_v60, %v5612_v12  ;;  %v9088_v23 = vld [vmem:[#allocation43_spill] sm:$0xff] }
 0x47b   : > { %v3611_v1 = vmax.f32 %v3607_v9, %v3608_v7 }
 0x47d   : > { %v3613_v47 = vmax.f32 %v3611_v1, %v3612_v20 }
 0x47f   : > { %v3614_v56 = vrot.slane %v3613_v47, 4 }
 0x481   : > { %v3615_v41 = vmax.f32 %v3613_v47, %v3614_v56 }
 0x483   : > { %v3616_v19 = vrot.slane %v3615_v41, 2 }
 0x485   : > { %v3617_v62 = vmax.f32 %v3615_v41, %v3616_v19  ;;  %v5303_v19 = vld [vmem:[%s5498_s27 + $0x8] sm:$0xff] }
 0x487   : > { %v3618_v52 = vrot.slane %v3617_v62, 1 }
 0x489   : > { %v3619_v26 = vmax.f32 %v3617_v62, %v3618_v52  ;;  %v5304_v52 = vld [vmem:[%s5498_s27] sm:$0xff] }
 0x48b   : > { %v8047_v22 = vmax.f32 %v8044_v27, %v3619_v26  ;;  %v9086_v26 = vld [vmem:[#allocation46_spill] sm:$0xff] }
 0x48d   : > { %v8050_v42 = vperm.slane %v8047_v22, 0  ;;  %4352 = vst [vmem:[#allocation2] sm:$0x1] %v8047_v22  ;;  %v3622_v30 = vsub.f32 %v8044_v27, %v8047_v22 }
 0x48f   : > { %v3630_v20 = vsel %vm9050_vm13, %v8050_v42, -1e+30  ;;  %v3629_v44 = vsel %vm9052_vm8, %v8050_v42, -1e+30  ;;  %v3628_v53 = vsel %vm9054_vm5, %v8050_v42, -1e+30  ;;  %vm9070_vm13 = vcmp.eq.s32.totalorder %v9026_v5, %v5612_v12 }
 0x490   : > { %3664 = vmax.xlane.f32.xlu2 %v3630_v20  ;;  %3662 = vmax.xlane.f32.xlu0 %v3629_v44  ;;  %v3633_v9 = vsel %vm9056_vm6, %v8050_v42, -1e+30  ;;  %v3632_v7 = vsel %vm9058_vm11, %v8050_v42, -1e+30  ;;  %v3631_v1 = vsel %vm9059_vm15, %v8050_v42, -1e+30  ;;  %vm9071_vm8 = vcmp.eq.s32.totalorder %v9016_v34, %v5612_v12 }
 0x491   : > { %3660 = vmax.xlane.f32.xlu1 %v3628_v53  ;;  %v3636_v47 = vsel %vm9060_vm1, %v8050_v42, -1e+30  ;;  %v3635_v56 = vsel %vm9061_vm14, %v8050_v42, -1e+30  ;;  %v3634_v41 = vsel %vm9062_vm4, %v8050_v42, -1e+30  ;;  %vm9072_vm5 = vcmp.eq.s32.totalorder %v9032_v32, %v5612_v12 }
 0x492   : > { %v3639_v2 = vsel %vm9063_vm12, %v8050_v42, -1e+30  ;;  %v3638_v24 = vsel %vm9064_vm9, %v8050_v42, -1e+30  ;;  %v3637_v35 = vsel %vm9065_vm7, %v8050_v42, -1e+30  ;;  %vm9073_vm6 = vcmp.eq.s32.totalorder %v9018_v59, %v5612_v12 }
 0x493   : > { %v3642_v16 = vsel %vm9066_vm3, %v8050_v42, -1e+30  ;;  %v3641_v36 = vsel %vm9067_vm2, %v8050_v42, -1e+30  ;;  %v3640_v51 = vsel %vm9068_vm10, %v8050_v42, -1e+30  ;;  %vm9074_vm11 = vcmp.eq.s32.totalorder %v9020_v11, %v5612_v12 }
 0x494   : > { %v3645_v25 = vsel %vm9069_vm0, %v8050_v42, -1e+30  ;;  %v3644_v50 = vsel %vm9070_vm13, %v8050_v42, -1e+30  ;;  %v3643_v15 = vsel %vm9071_vm8, %v8050_v42, -1e+30  ;;  %vm9075_vm15 = vcmp.eq.s32.totalorder %v9022_v10, %v5612_v12 }
 0x495   : > { %v3648_v37 = vsel %vm9072_vm5, %v8050_v42, -1e+30  ;;  %v3647_v55 = vsel %vm9073_vm6, %v8050_v42, -1e+30  ;;  %v3646_v5 = vsel %vm9074_vm11, %v8050_v42, -1e+30  ;;  %vm9076_vm1 = vcmp.eq.s32.totalorder %v9024_v29, %v5612_v12 }
 0x496   : > { %v3651_v34 = vsel %vm9075_vm15, %v8050_v42, -1e+30  ;;  %v3650_v32 = vsel %vm9076_vm1, %v8050_v42, -1e+30  ;;  %vm9077_vm14 = vcmp.eq.s32.totalorder %v9040_v54, %v5612_v12  ;;  %vm9078_vm4 = vcmp.eq.s32.totalorder %v9030_v63, %v5612_v12  ;;  %v9087_v20 = vld [vmem:[#allocation44_spill] sm:$0xff] }
 0x497   : > { %v3649_v59 = vsel %vm9077_vm14, %v8050_v42, -1e+30  ;;  %v3654_v11 = vsel %vm9078_vm4, %v8050_v42, -1e+30  ;;  %vm9079_vm12 = vcmp.eq.s32.totalorder %v9044_v45, %v5612_v12  ;;  %vm9080_vm9 = vcmp.eq.s32.totalorder %v9042_v57, %v5612_v12 }
 0x498   : > { %3670 = vmax.xlane.f32.xlu2 %v3633_v9  ;;  %3668 = vmax.xlane.f32.xlu0 %v3632_v7  ;;  %v3653_v10 = vsel %vm9079_vm12, %v8050_v42, -1e+30  ;;  %v3652_v29 = vsel %vm9080_vm9, %v8050_v42, -1e+30  ;;  %vm9081_vm7 = vcmp.eq.s32.totalorder %v9048_v58, %v5612_v12  ;;  %vm9082_vm3 = vcmp.eq.s32.totalorder %v9046_v0, %v5612_v12  ;;  %v5302_v58 = vld [vmem:[%s5498_s27 + $0x10] sm:$0xff]  ;;  %v5305_v7 = vld [vmem:[%s5498_s27 + $0x28] sm:$0xff] }
 0x499   : > { %3666 = vmax.xlane.f32.xlu1 %v3631_v1  ;;  %v3657_v63 = vsel %vm9081_vm7, %v8050_v42, -1e+30  ;;  %v3656_v54 = vsel %vm9082_vm3, %v8050_v42, -1e+30  ;;  %vm9083_vm2 = vcmp.eq.s32.totalorder %v9034_v38, %v5612_v12  ;;  %vm9084_vm10 = vcmp.eq.s32.totalorder %v9038_v48, %v5612_v12  ;;  %v5306_v1 = vld [vmem:[%s5498_s27 + $0x20] sm:$0xff] }
 0x49a   : > { %v3655_v57 = vsel %vm9083_vm2, %v8050_v42, -1e+30  ;;  %v3659_v45 = vsel %vm9084_vm10, %v8050_v42, -1e+30  ;;  %vm9085_vm0 = vcmp.eq.s32.totalorder %v9036_v31, %v5612_v12  ;;  %vm525_vm13 = vcmp.ge.s32.totalorder %v5302_v58, 0 }
 0x49b   : > { %v3658_v0 = vsel %vm9085_vm0, %v8050_v42, -1e+30  ;;  %vm524_vm8 = vcmp.ge.s32.totalorder %v5303_v19, 0  ;;  %vm523_vm5 = vcmp.ge.s32.totalorder %v5304_v52, 0  ;;  %vm528_vm6 = vcmp.ge.s32.totalorder %v5305_v7, 0  ;;  %v9093_v19 = vld [vmem:[#allocation64_spill] sm:$0xff] }
 0x49c   : > { %vm527_vm11 = vcmp.ge.s32.totalorder %v5306_v1, 0  ;;  %v9094_v52 = vld [vmem:[#allocation63_spill] sm:$0xff]  ;;  %v5311_v7 = vld [vmem:[%s5498_s27 + $0x58] sm:$0xff]  ;;  %v5312_v1 = vld [vmem:[%s5498_s27 + $0x50] sm:$0xff] }
 0x49d   : > { %vm534_vm12 = vcmp.ge.s32.totalorder %v5311_v7, 0  ;;  %vm533_vm9 = vcmp.ge.s32.totalorder %v5312_v1, 0 }
 0x4a0   : > { %3676 = vmax.xlane.f32.xlu2 %v3636_v47  ;;  %3674 = vmax.xlane.f32.xlu0 %v3635_v56 }
 0x4a1   : > { %3672 = vmax.xlane.f32.xlu1 %v3634_v41  ;;  %v5307_v41 = vld [vmem:[%s5498_s27 + $0x18] sm:$0xff] }
 0x4a2   : > { %vm526_vm15 = vcmp.ge.s32.totalorder %v5307_v41, 0  ;;  %v5313_v41 = vld [vmem:[%s5498_s27 + $0x48] sm:$0xff] }
 0x4a3   : > { %vm532_vm7 = vcmp.ge.s32.totalorder %v5313_v41, 0  ;;  %v5318_v41 = vld [vmem:[%s5498_s27 + $0x80] sm:$0xff] }
 0x4a8   : > { %3682 = vmax.xlane.f32.xlu2 %v3639_v2  ;;  %3680 = vmax.xlane.f32.xlu0 %v3638_v24  ;;  %v9089_v24 = vld [vmem:[#allocation55_spill] sm:$0xff] }
 0x4a9   : > { %3678 = vmax.xlane.f32.xlu1 %v3637_v35 }
 0x4b0   : > { %3688 = vmax.xlane.f32.xlu2 %v3642_v16  ;;  %3686 = vmax.xlane.f32.xlu0 %v3641_v36  ;;  %v9090_v16 = vld [vmem:[#allocation52_spill] sm:$0xff] }
 0x4b1   : > { %3684 = vmax.xlane.f32.xlu1 %v3640_v51 }
 0x4b8   : > { %3694 = vmax.xlane.f32.xlu2 %v3645_v25  ;;  %3692 = vmax.xlane.f32.xlu0 %v3644_v50  ;;  %v9091_v25 = vld [vmem:[#allocation49_spill] sm:$0xff] }
 0x4b9   : > { %3690 = vmax.xlane.f32.xlu1 %v3643_v15 }
 0x4c0   : > { %3700 = vmax.xlane.f32.xlu2 %v3648_v37  ;;  %3698 = vmax.xlane.f32.xlu0 %v3647_v55 }
 0x4c1   : > { %3696 = vmax.xlane.f32.xlu1 %v3646_v5 }
 0x4c8   : > { %3706 = vmax.xlane.f32.xlu2 %v3651_v34  ;;  %3704 = vmax.xlane.f32.xlu0 %v3650_v32 }
 0x4c9   : > { %3702 = vmax.xlane.f32.xlu1 %v3649_v59 }
 0x4d0   : > { %3712 = vmax.xlane.f32.xlu2 %v3654_v11  ;;  %3710 = vmax.xlane.f32.xlu0 %v3653_v10 }
 0x4d1   : > { %3708 = vmax.xlane.f32.xlu1 %v3652_v29  ;;  %v5308_v29 = vld [vmem:[%s5498_s27 + $0x40] sm:$0xff] }
 0x4d2   : > { %vm531_vm1 = vcmp.ge.s32.totalorder %v5308_v29, 0 }
 0x4d8   : > { %3718 = vmax.xlane.f32.xlu2 %v3657_v63  ;;  %3716 = vmax.xlane.f32.xlu0 %v3656_v54  ;;  %v5309_v63 = vld [vmem:[%s5498_s27 + $0x38] sm:$0xff] }
 0x4d9   : > { %3714 = vmax.xlane.f32.xlu1 %v3655_v57  ;;  %vm530_vm14 = vcmp.ge.s32.totalorder %v5309_v63, 0 }
 0x4e0   : > { %3722 = vmax.xlane.f32.xlu0 %v3659_v45  ;;  %v5310_v45 = vld [vmem:[%s5498_s27 + $0x30] sm:$0xff] }
 0x4e1   : > { %3720 = vmax.xlane.f32.xlu1 %v3658_v0  ;;  %vm529_vm4 = vcmp.ge.s32.totalorder %v5310_v45, 0  ;;  %v9092_v0 = vld [vmem:[#allocation69_spill] sm:$0xff] }
 0x503   : > { %v3665_v38 = vpop.xlane.xlu2 %3664  ;;  %v3663_v62 = vpop.xlane.xlu0 %3662 }
 0x504   : > { %v3726_v48 = vsub.f32 %v9086_v26, %v3665_v38  ;;  %v3725_v21 = vsub.f32 %v9087_v20, %v3663_v62  ;;  %v3661_v44 = vpop.xlane.xlu1 %3660 }
 0x505   : > { %v3724_v31 = vsub.f32 %v9088_v23, %v3661_v44 }
 0x506   : > { %v3758_v42 = vsel %vm525_vm13, %v3726_v48, -1e+30  ;;  %v3757_v53 = vsel %vm524_vm8, %v3725_v21, -1e+30  ;;  %vm539_vm13 = vcmp.ge.s32.totalorder %v5318_v41, 0 }
 0x507   : > { %v3790_v60 = vmul.f32 1.442695, %v3757_v53  ;;  %v3756_v9 = vsel %vm523_vm5, %v3724_v31, -1e+30  ;;  %v3792_v2 = vmul.f32 1.442695, %v3758_v42 }
 0x508   : > { %v3788_v14 = vmul.f32 1.442695, %v3756_v9 }
 0x509   : > { %5229 = vpow2.f32 %v3790_v60 }
 0x50a   : > { %5231 = vpow2.f32 %v3788_v14 }
 0x50b   : > { %v3671_v47 = vpop.xlane.xlu2 %3670  ;;  %v3669_v56 = vpop.xlane.xlu0 %3668  ;;  %5233 = vpow2.f32 %v3792_v2 }
 0x50c   : > { %v3729_v35 = vsub.f32 %v9089_v24, %v3671_v47  ;;  %v3728_v36 = vsub.f32 %v9090_v16, %v3669_v56  ;;  %v3667_v51 = vpop.xlane.xlu1 %3666  ;;  %v9095_v24 = vld [vmem:[#allocation76_spill] sm:$0xff]  ;;  %v9096_v16 = vld [vmem:[#allocation73_spill] sm:$0xff] }
 0x50d   : > { %v3727_v50 = vsub.f32 %v9091_v25, %v3667_v51  ;;  %v9097_v25 = vld [vmem:[#allocation72_spill] sm:$0xff] }
 0x50e   : > { %v3761_v15 = vsel %vm528_vm6, %v3729_v35, -1e+30  ;;  %v3760_v37 = vsel %vm527_vm11, %v3728_v36, -1e+30 }
 0x50f   : > { %v3798_v55 = vmul.f32 1.442695, %v3761_v15  ;;  %v3796_v5 = vmul.f32 1.442695, %v3760_v37  ;;  %v3759_v34 = vsel %vm526_vm15, %v3727_v50, -1e+30  ;;  %v8195_v32 = vpop.eup %5229 }
 0x510   : > { %v3794_v59 = vmul.f32 1.442695, %v3759_v34  ;;  %v8197_v11 = vpop.eup %5231 }
 0x511   : > { %5235 = vpow2.f32 %v3798_v55  ;;  %v4959_v10 = vpack.i.bf16 %v8195_v32, %v8197_v11  ;;  %v8207_v48 = vpop.eup %5233 }
 0x512   : > { %5237 = vpow2.f32 %v3796_v5 }
 0x513   : > { %5239 = vpow2.f32 %v3794_v59  ;;  %v3677_v54 = vpop.xlane.xlu2 %3676  ;;  %v3675_v57 = vpop.xlane.xlu0 %3674 }
 0x514   : > { %v3732_v58 = vsub.f32 %v9092_v0, %v3677_v54  ;;  %v3731_v38 = vsub.f32 %v9093_v19, %v3675_v57  ;;  %v3673_v62 = vpop.xlane.xlu1 %3672  ;;  %v5314_v57 = vld [vmem:[%s5498_s27 + $0x68] sm:$0xff] }
 0x515   : > { %v3730_v26 = vsub.f32 %v9094_v52, %v3673_v62  ;;  %vm536_vm3 = vcmp.ge.s32.totalorder %v5314_v57, 0 }
 0x516   : > { %v3764_v20 = vsel %vm531_vm1, %v3732_v58, -1e+30  ;;  %v3763_v21 = vsel %vm530_vm14, %v3731_v38, -1e+30  ;;  %v5315_v58 = vld [vmem:[%s5498_s27 + $0x60] sm:$0xff] }
 0x517   : > { %v8209_v44 = vpop.eup %5235  ;;  %v3802_v23 = vmul.f32 1.442695, %v3763_v21  ;;  %v3762_v31 = vsel %vm529_vm4, %v3730_v26, -1e+30  ;;  %v3804_v2 = vmul.f32 1.442695, %v3764_v20 }
 0x518   : > { %v8211_v42 = vpop.eup %5237  ;;  %v3800_v53 = vmul.f32 1.442695, %v3762_v31  ;;  %vm535_vm2 = vcmp.ge.s32.totalorder %v5315_v58, 0  ;;  %v5316_v20 = vld [vmem:[%s5498_s27 + $0x70] sm:$0xff] }
 0x519   : > { %v8213_v60 = vpop.eup %5239  ;;  %v4939_v9 = vpack.i.bf16 %v8209_v44, %v8211_v42  ;;  %5241 = vpow2.f32 %v3802_v23  ;;  %vm537_vm10 = vcmp.ge.s32.totalorder %v5316_v20, 0 }
 0x51a   : > { %v4949_v14 = vpack.i.bf16 %v8213_v60, %v8207_v48  ;;  %5243 = vpow2.f32 %v3800_v53 }
 0x51b   : > { %v3683_v47 = vpop.xlane.xlu2 %3682  ;;  %v3681_v56 = vpop.xlane.xlu0 %3680  ;;  %5245 = vpow2.f32 %v3804_v2 }
 0x51c   : > { %v3735_v35 = vsub.f32 %v9095_v24, %v3683_v47  ;;  %v3734_v36 = vsub.f32 %v9096_v16, %v3681_v56  ;;  %v3679_v51 = vpop.xlane.xlu1 %3678  ;;  %v5317_v56 = vld [vmem:[%s5498_s27 + $0x88] sm:$0xff] }
 0x51d   : > { %v3733_v50 = vsub.f32 %v9097_v25, %v3679_v51  ;;  %vm540_vm0 = vcmp.ge.s32.totalorder %v5317_v56, 0 }
 0x51e   : > { %v3767_v15 = vsel %vm534_vm12, %v3735_v35, -1e+30  ;;  %v3766_v37 = vsel %vm533_vm9, %v3734_v36, -1e+30  ;;  %v5319_v35 = vld [vmem:[%s5498_s27 + $0x78] sm:$0xff] }
 0x51f   : > { %v3810_v55 = vmul.f32 1.442695, %v3767_v15  ;;  %v3808_v5 = vmul.f32 1.442695, %v3766_v37  ;;  %v3765_v34 = vsel %vm532_vm7, %v3733_v50, -1e+30  ;;  %v8225_v59 = vpop.eup %5241 }
 0x520   : > { %v3806_v29 = vmul.f32 1.442695, %v3765_v34  ;;  %v8227_v63 = vpop.eup %5243  ;;  %vm538_vm8 = vcmp.ge.s32.totalorder %v5319_v35, 0  ;;  %v5324_v35 = vld [vmem:[%s5498_s27 + $0xb0] sm:$0xff] }
 0x521   : > { %5247 = vpow2.f32 %v3810_v55  ;;  %v4929_v54 = vpack.i.bf16 %v8225_v59, %v8227_v63  ;;  %v8236_v26 = vpop.eup %5245  ;;  %vm545_vm1 = vcmp.ge.s32.totalorder %v5324_v35, 0 }
 0x522   : > { %5249 = vpow2.f32 %v3808_v5 }
 0x523   : > { %5251 = vpow2.f32 %v3806_v29  ;;  %v3689_v45 = vpop.xlane.xlu2 %3688  ;;  %v3687_v0 = vpop.xlane.xlu0 %3686 }
 0x524   : > { %v3737_v19 = vsub.f32 %v7832_v13, %v3687_v0  ;;  %v3685_v38 = vpop.xlane.xlu1 %3684  ;;  %v3738_v62 = vsub.f32 %v7844_v49, %v3689_v45 }
 0x525   : > { %v3736_v52 = vsub.f32 %v7814_v33, %v3685_v38 }
 0x526   : > { %v3769_v21 = vsel %vm536_vm3, %v3737_v19, -1e+30  ;;  %v3770_v49 = vsel %vm537_vm10, %v3738_v62, -1e+30  ;;  %v5322_v19 = vld [vmem:[%s5498_s27 + $0x90] sm:$0xff] }
 0x527   : > { %v8239_v23 = vpop.eup %5247  ;;  %v3814_v31 = vmul.f32 1.442695, %v3769_v21  ;;  %v3768_v53 = vsel %vm535_vm2, %v3736_v52, -1e+30  ;;  %v3816_v16 = vmul.f32 1.442695, %v3770_v49 }
 0x528   : > { %v8241_v7 = vpop.eup %5249  ;;  %v3812_v13 = vmul.f32 1.442695, %v3768_v53  ;;  %vm541_vm11 = vcmp.ge.s32.totalorder %v5322_v19, 0 }
 0x529   : > { %v8243_v1 = vpop.eup %5251  ;;  %v4909_v33 = vpack.i.bf16 %v8239_v23, %v8241_v7  ;;  %5253 = vpow2.f32 %v3814_v31 }
 0x52a   : > { %v4919_v47 = vpack.i.bf16 %v8243_v1, %v8236_v26  ;;  %5255 = vpow2.f32 %v3812_v13 }
 0x52b   : > { %v3695_v2 = vpop.xlane.xlu2 %3694  ;;  %v3693_v24 = vpop.xlane.xlu0 %3692  ;;  %5257 = vpow2.f32 %v3816_v16 }
 0x52c   : > { %v3741_v36 = vsub.f32 %v7930_v61, %v3695_v2  ;;  %v3740_v51 = vsub.f32 %v7899_v18, %v3693_v24  ;;  %v3691_v25 = vpop.xlane.xlu1 %3690  ;;  %v5320_v61 = vld [vmem:[%s5498_s27 + $0xa0] sm:$0xff]  ;;  %v5323_v24 = vld [vmem:[%s5498_s27 + $0xb8] sm:$0xff] }
 0x52d   : > { %v3739_v50 = vsub.f32 %v7878_v3, %v3691_v25  ;;  %vm543_vm5 = vcmp.ge.s32.totalorder %v5320_v61, 0  ;;  %v5321_v3 = vld [vmem:[%s5498_s27 + $0x98] sm:$0xff]  ;;  %vm546_vm15 = vcmp.ge.s32.totalorder %v5323_v24, 0 }
 0x52e   : > { %v3773_v15 = vsel %vm540_vm0, %v3741_v36, -1e+30  ;;  %v3772_v37 = vsel %vm539_vm13, %v3740_v51, -1e+30  ;;  %vm542_vm6 = vcmp.ge.s32.totalorder %v5321_v3, 0  ;;  %v5325_v51 = vld [vmem:[%s5498_s27 + $0xa8] sm:$0xff] }
 0x52f   : > { %v3822_v55 = vmul.f32 1.442695, %v3773_v15  ;;  %v3820_v5 = vmul.f32 1.442695, %v3772_v37  ;;  %v3771_v34 = vsel %vm538_vm8, %v3739_v50, -1e+30  ;;  %v8255_v29 = vpop.eup %5253 }
 0x530   : > { %v3818_v57 = vmul.f32 1.442695, %v3771_v34  ;;  %v8257_v45 = vpop.eup %5255  ;;  %vm544_vm14 = vcmp.ge.s32.totalorder %v5325_v51, 0  ;;  %vm3852_vm13 = vcmp.eq.s32.totalorder %v5612_v12, 3 }
 0x531   : > { %5259 = vpow2.f32 %v3822_v55  ;;  %v4899_v18 = vpack.i.bf16 %v8255_v29, %v8257_v45  ;;  %v8267_v21 = vpop.eup %5257 }
 0x532   : > { %5261 = vpow2.f32 %v3820_v5 }
 0x533   : > { %5263 = vpow2.f32 %v3818_v57  ;;  %v3701_v0 = vpop.xlane.xlu2 %3700  ;;  %v3699_v58 = vpop.xlane.xlu0 %3698 }
 0x534   : > { %v3744_v38 = vsub.f32 %v7945_v4, %v3701_v0  ;;  %v3743_v62 = vsub.f32 %v7918_v17, %v3699_v58  ;;  %v3697_v52 = vpop.xlane.xlu1 %3696 }
 0x535   : > { %v3742_v20 = vsub.f32 %v7885_v8, %v3697_v52 }
 0x536   : > { %v3776_v31 = vsel %vm543_vm5, %v3744_v38, -1e+30  ;;  %v3775_v53 = vsel %vm542_vm6, %v3743_v62, -1e+30  ;;  %v5327_v62 = vld [vmem:[%s5498_s27 + $0xc0] sm:$0xff] }
 0x537   : > { %v8269_v13 = vpop.eup %5259  ;;  %v3826_v49 = vmul.f32 1.442695, %v3775_v53  ;;  %v3774_v56 = vsel %vm541_vm11, %v3742_v20, -1e+30  ;;  %v3828_v25 = vmul.f32 1.442695, %v3776_v31 }
 0x538   : > { %v8271_v41 = vpop.eup %5261  ;;  %v3824_v2 = vmul.f32 1.442695, %v3774_v56  ;;  %vm547_vm12 = vcmp.ge.s32.totalorder %v5327_v62, 0  ;;  %v5328_v56 = vld [vmem:[%s5498_s27 + $0xd0] sm:$0xff] }
 0x539   : > { %v8273_v4 = vpop.eup %5263  ;;  %v4964_v17 = vpack.i.bf16 %v8269_v13, %v8271_v41  ;;  %5265 = vpow2.f32 %v3826_v49  ;;  %vm549_vm9 = vcmp.ge.s32.totalorder %v5328_v56, 0 }
 0x53a   : > { %v4889_v8 = vpack.i.bf16 %v8273_v4, %v8267_v21  ;;  %5267 = vpow2.f32 %v3824_v2 }
 0x53b   : > { %v3707_v16 = vpop.xlane.xlu2 %3706  ;;  %v3705_v36 = vpop.xlane.xlu0 %3704  ;;  %5269 = vpow2.f32 %v3828_v25  ;;  %v5329_v25 = vld [vmem:[%s5498_s27 + $0xe8] sm:$0xff] }
 0x53c   : > { %4890 = vperm.xlu1 %4888, %v4889_v8   ;;  %v3747_v50 = vsub.f32 %v7952_v6, %v3707_v16  ;;  %v3746_v15 = vsub.f32 %v7926_v43, %v3705_v36  ;;  %v3703_v37 = vpop.xlane.xlu1 %3702  ;;  %v5326_v6 = vld [vmem:[%s5498_s27 + $0xc8] sm:$0xff]  ;;  %vm552_vm7 = vcmp.ge.s32.totalorder %v5329_v25, 0 }
 0x53d   : > { %v3745_v55 = vsub.f32 %v7895_v40, %v3703_v37  ;;  %vm548_vm4 = vcmp.ge.s32.totalorder %v5326_v6, 0  ;;  %v9100_v6 = vld [vmem:[#allocation54_spill] sm:$0xff]  ;;  %v9101_v25 = vld [vmem:[#allocation15_spill] sm:$0xff] }
 0x53e   : > { %v3779_v5 = vsel %vm546_vm15, %v3747_v50, -1e+30  ;;  %v3778_v34 = vsel %vm545_vm1, %v3746_v15, -1e+30  ;;  %v5330_v50 = vld [vmem:[%s5498_s27 + $0xe0] sm:$0xff] }
 0x53f   : > { %v3834_v57 = vmul.f32 1.442695, %v3779_v5  ;;  %v3832_v61 = vmul.f32 1.442695, %v3778_v34  ;;  %v3777_v3 = vsel %vm544_vm14, %v3745_v55, -1e+30  ;;  %v8285_v0 = vpop.eup %5265 }
 0x540   : > { %v3830_v58 = vmul.f32 1.442695, %v3777_v3  ;;  %v8287_v19 = vpop.eup %5267  ;;  %vm551_vm3 = vcmp.ge.s32.totalorder %v5330_v50, 0  ;;  %v5331_v55 = vld [vmem:[%s5498_s27 + $0xd8] sm:$0xff]  ;;  %v9098_v34 = vld [vmem:[#allocation12_spill] sm:$0xff] }
 0x541   : > { %5271 = vpow2.f32 %v3834_v57  ;;  %v4954_v43 = vpack.i.bf16 %v8285_v0, %v8287_v19  ;;  %v8296_v49 = vpop.eup %5269  ;;  %vm550_vm2 = vcmp.ge.s32.totalorder %v5331_v55, 0 }
 0x542   : > { %5273 = vpow2.f32 %v3832_v61  ;;  %v9099_v61 = vld [vmem:[#allocation62_spill] sm:$0xff] }
 0x543   : > { %5275 = vpow2.f32 %v3830_v58  ;;  %v3713_v40 = vpop.xlane.xlu2 %3712  ;;  %v3711_v38 = vpop.xlane.xlu0 %3710 }
 0x544   : > { %v3749_v52 = vsub.f32 %v7942_v46, %v3711_v38  ;;  %v3709_v20 = vpop.xlane.xlu1 %3708  ;;  %v3750_v31 = vsub.f32 %v7965_v28, %v3713_v40 }
 0x545   : > { %v3748_v53 = vsub.f32 %v7914_v39, %v3709_v20 }
 0x546   : > { %v3781_v2 = vsel %vm548_vm4, %v3749_v52, -1e+30  ;;  %v3782_v28 = vsel %vm549_vm9, %v3750_v31, -1e+30 }
 0x547   : > { %v8299_v8 = vpop.eup %5271  ;;  %v3838_v24 = vmul.f32 1.442695, %v3781_v2  ;;  %v3780_v35 = vsel %vm547_vm12, %v3748_v53, -1e+30  ;;  %v3840_v5 = vmul.f32 1.442695, %v3782_v28 }
 0x548   : > { %v8301_v16 = vpop.eup %5273  ;;  %v3836_v46 = vmul.f32 1.442695, %v3780_v35  ;;  %v5332_v35 = vld [vmem:[%s5498_s27 + $0xf8] sm:$0xff]  ;;  %v5333_v28 = vld [vmem:[%s5498_s27 + $0xf0] sm:$0xff] }
 0x549   : > { %v8303_v36 = vpop.eup %5275  ;;  %v4934_v39 = vpack.i.bf16 %v8299_v8, %v8301_v16  ;;  %5277 = vpow2.f32 %v3838_v24  ;;  %vm554_vm10 = vcmp.ge.s32.totalorder %v5332_v35, 0  ;;  %vm553_vm0 = vcmp.ge.s32.totalorder %v5333_v28, 0 }
 0x54a   : > { %v4944_v51 = vpack.i.bf16 %v8303_v36, %v8296_v49  ;;  %5279 = vpow2.f32 %v3836_v46 }
 0x54b   : > { %v3719_v15 = vpop.xlane.xlu2 %3718  ;;  %v3717_v37 = vpop.xlane.xlu0 %3716  ;;  %5281 = vpow2.f32 %v3840_v5 }
 0x54c   : > { %v3753_v57 = vsub.f32 %v9098_v34, %v3719_v15  ;;  %v3752_v3 = vsub.f32 %v9099_v61, %v3717_v37  ;;  %v3715_v58 = vpop.xlane.xlu1 %3714  ;;  %v9102_v37 = vld [vmem:[#allocation68_spill] sm:$0xff] }
 0x54d   : > { %v3751_v40 = vsub.f32 %v9100_v6, %v3715_v58 }
 0x54e   : > { %v3785_v38 = vsel %vm552_vm7, %v3753_v57, -1e+30  ;;  %v3784_v62 = vsel %vm551_vm3, %v3752_v3, -1e+30 }
 0x54f   : > { %v3846_v52 = vmul.f32 1.442695, %v3785_v38  ;;  %v3844_v20 = vmul.f32 1.442695, %v3784_v62  ;;  %v3783_v31 = vsel %vm550_vm2, %v3751_v40, -1e+30  ;;  %v8315_v53 = vpop.eup %5277 }
 0x550   : > { %v3842_v56 = vmul.f32 1.442695, %v3783_v31  ;;  %v8317_v2 = vpop.eup %5279 }
 0x551   : > { %5283 = vpow2.f32 %v3846_v52  ;;  %v4924_v24 = vpack.i.bf16 %v8315_v53, %v8317_v2  ;;  %v8325_v5 = vpop.eup %5281 }
 0x552   : > { %5285 = vpow2.f32 %v3844_v20 }
 0x553   : > { %5287 = vpow2.f32 %v3842_v56  ;;  %v3723_v46 = vpop.xlane.xlu0 %3722  ;;  %v9103_v56 = vld [vmem:[#allocation34_spill] sm:$0xff] }
 0x554   : > { %v3755_v50 = vsub.f32 %v9101_v25, %v3723_v46  ;;  %v3721_v15 = vpop.xlane.xlu1 %3720  ;;  %v3855_v35 = vmul.f32 %v8207_v48, %v9103_v56  ;;  %v9104_v46 = vld [vmem:[#allocation35_spill] sm:$0xff]  ;;  %v9105_v25 = vld [vmem:[#allocation37_spill] sm:$0xff]  ;;  %v9113_v56 = vld [vmem:[#allocation48_spill] sm:$0xff] }
 0x555   : > { %v3754_v55 = vsub.f32 %v9102_v37, %v3721_v15  ;;  %v3854_v28 = vmul.f32 %v8195_v32, %v9104_v46  ;;  %v9114_v46 = vld [vmem:[#allocation36_spill] sm:$0xff] }
 0x556   : > { %v3787_v34 = vsel %vm554_vm10, %v3755_v50, -1e+30  ;;  %v9106_v50 = vld [vmem:[#allocation38_spill] sm:$0xff] }
 0x557   : > { %v8327_v57 = vpop.eup %5283  ;;  %v3850_v61 = vmul.f32 1.442695, %v3787_v34  ;;  %v3786_v3 = vsel %vm553_vm0, %v3754_v55, -1e+30  ;;  %v3858_v15 = vmul.f32 %v8209_v44, %v9106_v50  ;;  %v9108_v55 = vld [vmem:[#allocation32_spill] sm:$0xff] }
 0x558   : > { %v8329_v58 = vpop.eup %5285  ;;  %v3848_v6 = vmul.f32 1.442695, %v3786_v3  ;;  %v3853_v34 = vmul.f32 %v8197_v11, %v9108_v55  ;;  %v9117_v50 = vld [vmem:[#allocation40_spill] sm:$0xff]  ;;  %v9120_v55 = vld [vmem:[#allocation50_spill] sm:$0xff] }
 0x559   : > { %v8331_v40 = vpop.eup %5287  ;;  %5289 = vpow2.f32 %v3850_v61  ;;  %v4904_v38 = vpack.i.bf16 %v8327_v57, %v8329_v58  ;;  %v9109_v61 = vld [vmem:[#allocation41_spill] sm:$0xff] }
 0x55a   : > { %5291 = vpow2.f32 %v3848_v6  ;;  %v4914_v62 = vpack.i.bf16 %v8331_v40, %v8325_v5  ;;  %v3861_v3 = vmul.f32 %v8236_v26, %v9109_v61  ;;  %v3859_v26 = vmul.f32 %v8227_v63, %v9114_v46 }
 0x55b   : > { %4905 = vperm.xlu0 %4887, %v4904_v38   ;;  %v9111_v38 = vld [vmem:[#allocation33_spill] sm:$0xff] }
 0x55c   : > { %4915 = vperm.xlu1 %4888, %v4914_v62   ;;  %v3856_v62 = vmul.f32 %v8213_v60, %v9111_v38  ;;  %v9124_v38 = vld [vmem:[#allocation60_spill] sm:$0xff] }
 0x55f   : > { %v5290_v52 = vpop.eup %5289 }
 0x560   : > { %v8337_v20 = vpop.eup %5291 }
 0x561   : > { %v4894_v31 = vpack.i.bf16 %v5290_v52, %v8337_v20 }
 0x563   : > { %4910 = vperm.xlu0 %4887, %v4909_v33   ;;  %4895 = vperm.xlu2 %4886, %v4894_v31   ;;  %v3857_v33 = vmul.f32 %v8211_v42, %v9105_v25 }
 0x564   : > { %4920 = vperm.xlu1 %4888, %v4919_v47   ;;  %v9107_v47 = vld [vmem:[#allocation39_spill] sm:$0xff] }
 0x565   : > { %v3860_v37 = vmul.f32 %v8225_v59, %v9107_v47 }
 0x56b   : > { %3897 = vperm.xlu0 %4887, %v3855_v35   ;;  %4900 = vperm.xlu2 %4886, %v4899_v18   ;;  %v9110_v18 = vld [vmem:[#allocation42_spill] sm:$0xff]  ;;  %v3866_v35 = vmul.f32 %v8255_v29, %v9113_v56 }
 0x56c   : > { %3892 = vperm.xlu1 %4888, %v3854_v28   ;;  %v3863_v6 = vmul.f32 %v8241_v7, %v9110_v18  ;;  %v9115_v28 = vld [vmem:[#allocation47_spill] sm:$0xff]  ;;  %v9116_v7 = vld [vmem:[#allocation53_spill] sm:$0xff]  ;;  %v9119_v29 = vld [vmem:[#allocation58_spill] sm:$0xff] }
 0x56d   : > { %v3867_v25 = vmul.f32 %v8267_v21, %v9115_v28  ;;  %v3865_v21 = vmul.f32 %v8257_v45, %v9120_v55  ;;  %v9123_v18 = vld [vmem:[#allocation56_spill] sm:$0xff]  ;;  %v9129_v28 = vld [vmem:[#allocation65_spill] sm:$0xff] }
 0x56e   : > { %v5336_v55 = vld [vmem:[%s5503_s30 + $0x70] sm:$0xff] }
 0x573   : > { %3907 = vperm.xlu0 %4887, %v3857_v33   ;;  %4925 = vperm.xlu2 %4886, %v4924_v24   ;;  %v9112_v24 = vld [vmem:[#allocation45_spill] sm:$0xff]  ;;  %v3869_v33 = vmul.f32 %v8271_v41, %v9116_v7  ;;  %v9130_v7 = vld [vmem:[#allocation67_spill] sm:$0xff] }
 0x574   : > { %3912 = vperm.xlu1 %4888, %v3858_v15   ;;  %v3864_v31 = vmul.f32 %v8239_v23, %v9112_v24  ;;  %v3862_v23 = vmul.f32 %v8243_v1, %v9117_v50  ;;  %v9118_v15 = vld [vmem:[#allocation51_spill] sm:$0xff] }
 0x575   : > { %v3870_v47 = vmul.f32 %v8269_v13, %v9118_v15  ;;  %v9125_v24 = vld [vmem:[#allocation79_spill] sm:$0xff]  ;;  %v9133_v15 = vld [vmem:[#allocation74_spill] sm:$0xff] }
 0x576   : > { %v3884_v45 = vmul.f32 %v5290_v52, %v9125_v24  ;;  %v9131_v52 = vld [vmem:[#allocation66_spill] sm:$0xff] }
 0x577   : > { %v3878_v50 = vmul.f32 %v8315_v53, %v9131_v52 }
 0x57b   : > { %3922 = vperm.xlu0 %4887, %v3860_v37   ;;  %3887 = vperm.xlu2 %4886, %v3853_v34   ;;  %v3872_v37 = vmul.f32 %v8285_v0, %v9119_v29  ;;  %v9121_v34 = vld [vmem:[#allocation57_spill] sm:$0xff]  ;;  %v5335_v29 = vld [vmem:[%s5503_s30 + $0x68] sm:$0xff] }
 0x57c   : > { %3927 = vperm.xlu1 %4888, %v3861_v3   ;;  %v3873_v61 = vmul.f32 %v8296_v49, %v9121_v34  ;;  %v9122_v3 = vld [vmem:[#allocation61_spill] sm:$0xff] }
 0x57d   : > { %v3875_v1 = vmul.f32 %v8301_v16, %v9122_v3  ;;  %v5337_v3 = vld [vmem:[%s5503_s30 + $0x60] sm:$0xff] }
 0x583   : > { %3937 = vperm.xlu0 %4887, %v3863_v6   ;;  %3902 = vperm.xlu2 %4886, %v3856_v62   ;;  %v3868_v6 = vmul.f32 %v8273_v4, %v9123_v18  ;;  %v3876_v62 = vmul.f32 %v8299_v8, %v9124_v38 }
 0x584   : > { %3942 = vperm.xlu1 %4888, %v3864_v31   ;;  %v9126_v31 = vld [vmem:[#allocation59_spill] sm:$0xff] }
 0x585   : > { %v3871_v56 = vmul.f32 %v8287_v19, %v9126_v31 }
 0x58b   : > { %3952 = vperm.xlu0 %4887, %v3866_v35   ;;  %3917 = vperm.xlu2 %4886, %v3859_v26   ;;  %v9127_v35 = vld [vmem:[#allocation78_spill] sm:$0xff]  ;;  %v9128_v26 = vld [vmem:[#allocation71_spill] sm:$0xff] }
 0x58c   : > { %3957 = vperm.xlu1 %4888, %v3867_v25   ;;  %v3882_v46 = vmul.f32 %v8327_v57, %v9127_v35  ;;  %v3881_v4 = vmul.f32 %v8329_v58, %v9128_v26  ;;  %v3874_v25 = vmul.f32 %v8303_v36, %v9129_v28 }
 0x593   : > { %3967 = vperm.xlu0 %4887, %v3869_v33   ;;  %3932 = vperm.xlu2 %4886, %v3862_v23   ;;  %v3879_v33 = vmul.f32 %v8325_v5, %v9130_v7  ;;  %v9132_v23 = vld [vmem:[#allocation80_spill] sm:$0xff]  ;;  %v3880_v5 = vmul.f32 %v8331_v40, %v9133_v15 }
 0x594   : > { %3972 = vperm.xlu1 %4888, %v3870_v47   ;;  %v3883_v57 = vmul.f32 %v8337_v20, %v9132_v23  ;;  %v9134_v47 = vld [vmem:[#allocation70_spill] sm:$0xff] }
 0x595   : > { %v3877_v8 = vmul.f32 %v8317_v2, %v9134_v47 }
 0x59b   : > { %3982 = vperm.xlu0 %4887, %v3872_v37   ;;  %3947 = vperm.xlu2 %4886, %v3865_v21  }
 0x59c   : > { %3987 = vperm.xlu1 %4888, %v3873_v61  }
 0x5a3   : > { %3997 = vperm.xlu0 %4887, %v3875_v1   ;;  %3962 = vperm.xlu2 %4886, %v3868_v6  }
 0x5a4   : > { %4002 = vperm.xlu1 %4888, %v3876_v62   ;;  %v5338_v62 = vld [vmem:[%s5503_s30 + $0x50] sm:$0xff] }
 0x5ab   : > { %4042 = vperm.xlu0 %4887, %v3884_v45   ;;  %3977 = vperm.xlu2 %4886, %v3871_v56   ;;  %v5339_v45 = vld [vmem:[%s5503_s30 + $0x58] sm:$0xff] }
 0x5ac   : > { %4032 = vperm.xlu1 %4888, %v3882_v46  }
 0x5ae   : > { %v4891_v20 = vpop.permute.xlu1 %4890 }
 0x5af   : > { %v4893_v36 = vunpack.i.h.bf16 %v4891_v20  ;;  %v4892_v40 = vunpack.i.l.bf16 %v4891_v20 }
 0x5b3   : > { %4027 = vperm.xlu0 %4887, %v3881_v4   ;;  %3992 = vperm.xlu2 %4886, %v3874_v25  }
 0x5b4   : > { %4017 = vperm.xlu1 %4888, %v3879_v33   ;;  %v5340_v33 = vld [vmem:[%s5503_s30 + $0x48] sm:$0xff] }
 0x5bb   : > { %4012 = vperm.xlu0 %4887, %v3878_v50   ;;  %4037 = vperm.xlu2 %4886, %v3883_v57   ;;  %v5341_v50 = vld [vmem:[%s5503_s30 + $0x40] sm:$0xff] }
 0x5bc   : > { %4935 = vperm.xlu1 %4888, %v4934_v39   ;;  %v5334_v39 = vld [vmem:[%s5503_s30 + $0x78] sm:$0xff] }
 0x5bd   : > { %v8411_v58 = vpop.permute.xlu2 %4895 }
 0x5c3   : > { %4930 = vperm.xlu0 %4887, %v4929_v54   ;;  %4022 = vperm.xlu2 %4886, %v3880_v5  }
 0x5c4   : > { %4950 = vperm.xlu1 %4888, %v4949_v14  }
 0x5c5   : > { %v4901_v53 = vpop.permute.xlu2 %4900 }
 0x5c6   : > { %v4903_v61 = vunpack.i.h.bf16 %v4901_v53  ;;  %v4902_v38 = vunpack.i.l.bf16 %v4901_v53 }
 0x5cb   : > { %4945 = vperm.xlu0 %4887, %v4944_v51   ;;  %4007 = vperm.xlu2 %4886, %v3877_v8  }
 0x5cc   : > { %4965 = vperm.xlu1 %4888, %v4964_v17  }
 0x5cd   : > { %v8429_v59 = vpop.permute.xlu0 %4905  ;;  %v8431_v63 = vpop.permute.xlu2 %4925 }
 0x5ce   : > { %v8433_v48 = vpop.permute.xlu1 %4915 }
 0x5d3   : > { %4960 = vperm.xlu0 %4887, %v4959_v10   ;;  %4940 = vperm.xlu2 %4886, %v4939_v9  }
 0x5d5   : > { %v4911_v60 = vpop.permute.xlu0 %4910  ;;  %v8441_v14 = vpop.permute.xlu2 %3887 }
 0x5d6   : > { %v4921_v54 = vpop.permute.xlu1 %4920  ;;  %v4913_v35 = vunpack.i.h.bf16 %v4911_v60  ;;  %v4912_v46 = vunpack.i.l.bf16 %v4911_v60 }
 0x5d7   : > { %v4923_v5 = vunpack.i.h.bf16 %v4921_v54  ;;  %v4922_v53 = vunpack.i.l.bf16 %v4921_v54 }
 0x5db   : > { %4955 = vperm.xlu2 %4886, %v4954_v43  }
 0x5dd   : > { %v8446_v13 = vpop.permute.xlu0 %3897  ;;  %v8448_v41 = vpop.permute.xlu2 %3902 }
 0x5de   : > { %v8450_v17 = vpop.permute.xlu1 %3892 }
 0x5e5   : > { %v8452_v32 = vpop.permute.xlu0 %3907  ;;  %v8454_v11 = vpop.permute.xlu2 %3917 }
 0x5e6   : > { %v8456_v10 = vpop.permute.xlu1 %3912 }
 0x5ed   : > { %v8458_v44 = vpop.permute.xlu0 %3922  ;;  %v3933_v42 = vpop.permute.xlu2 %3932 }
 0x5ee   : > { %v3928_v9 = vpop.permute.xlu1 %3927  ;;  %v4054_v52 = vmul.f32 %v5340_v33, %v3933_v42 }
 0x5ef   : > { %v4053_v23 = vmul.f32 %v5341_v50, %v3928_v9  ;;  %v5348_v50 = vld [vmem:[%s5503_s30 + $0xc0] sm:$0xff] }
 0x5f0   : > { %v4248_v8 = vsel %vm3852_vm13, %v4923_v5, %v4054_v52  ;;  %v4927_v5 = vunpack.i.l.bf16 %v8431_v63 }
 0x5f1   : > { %v4247_v47 = vsel %vm3852_vm13, %v4922_v53, %v4053_v23  ;;  %v5349_v53 = vld [vmem:[%s5503_s30 + $0x20] sm:$0xff] }
 0x5f5   : > { %v3938_v0 = vpop.permute.xlu0 %3937  ;;  %v3948_v19 = vpop.permute.xlu2 %3947 }
 0x5f6   : > { %v3943_v43 = vpop.permute.xlu1 %3942  ;;  %v4057_v1 = vmul.f32 %v5337_v3, %v3948_v19  ;;  %v4055_v24 = vmul.f32 %v5338_v62, %v3938_v0  ;;  %v4275_v0 = vpack.c.bf16 %v4248_v8, %v4247_v47 }
 0x5f7   : > { %v4056_v31 = vmul.f32 %v5339_v45, %v3943_v43  ;;  %v5346_v45 = vld [vmem:[%s5503_s30 + $0xd0] sm:$0xff] }
 0x5f8   : > { %v4251_v28 = vsel %vm3852_vm13, %v4902_v38, %v4057_v1  ;;  %v4249_v57 = vsel %vm3852_vm13, %v4912_v46, %v4055_v24  ;;  %v5345_v38 = vld [vmem:[%s5503_s30 + $0xe0] sm:$0xff] }
 0x5f9   : > { %v4250_v15 = vsel %vm3852_vm13, %v4913_v35, %v4056_v31  ;;  %v5347_v35 = vld [vmem:[%s5503_s30 + $0xd8] sm:$0xff] }
 0x5fa   : > { %v4276_v20 = vpack.c.bf16 %v4250_v15, %v4249_v57  ;;  %v4928_v15 = vunpack.i.h.bf16 %v8431_v63 }
 0x5fd   : > { %v3953_v49 = vpop.permute.xlu0 %3952  ;;  %v3963_v16 = vpop.permute.xlu2 %3962 }
 0x5fe   : > { %v4060_v51 = vmul.f32 %v5334_v39, %v3963_v16  ;;  %v3958_v2 = vpop.permute.xlu1 %3957  ;;  %v4058_v37 = vmul.f32 %v5335_v29, %v3953_v49  ;;  %v5342_v49 = vld [vmem:[%s5503_s30 + $0xf0] sm:$0xff] }
 0x5ff   : > { %v4059_v21 = vmul.f32 %v5336_v55, %v3958_v2  ;;  %v4897_v2 = vunpack.i.l.bf16 %v8411_v58 }
 0x600   : > { %v4254_v34 = vsel %vm3852_vm13, %v4893_v36, %v4060_v51  ;;  %v4252_v56 = vsel %vm3852_vm13, %v4903_v61, %v4058_v37  ;;  %v4898_v51 = vunpack.i.h.bf16 %v8411_v58  ;;  %v5344_v61 = vld [vmem:[%s5503_s30 + $0xe8] sm:$0xff]  ;;  %v4907_v58 = vunpack.i.l.bf16 %v8429_v59 }
 0x601   : > { %v4253_v18 = vsel %vm3852_vm13, %v4892_v40, %v4059_v21  ;;  %v4277_v7 = vpack.c.bf16 %v4252_v56, %v4251_v28  ;;  %v5343_v40 = vld [vmem:[%s5503_s30 + $0xf8] sm:$0xff]  ;;  %v4917_v56 = vunpack.i.l.bf16 %v8433_v48 }
 0x602   : > { %v4278_v6 = vpack.c.bf16 %v4254_v34, %v4253_v18 }
 0x604   : > { %4841 = vmatpush.lsf.bf16.msrb.mxu0 %v4278_v6  ;;  %v4908_v6 = vunpack.i.h.bf16 %v8429_v59  ;;  %v4918_v59 = vunpack.i.h.bf16 %v8433_v48 }
 0x605   : > { %v8473_v26 = vpop.permute.xlu0 %3967  ;;  %v8475_v4 = vpop.permute.xlu2 %3977 }
 0x606   : > { %v8479_v25 = vpop.permute.xlu1 %3972 }
 0x608   : > { %4842 = vmatpush.lsf.bf16.msrb.mxu0 %v4277_v7 }
 0x60c   : > { %4843 = vmatpush.lsf.bf16.msrb.mxu0 %v4276_v20  ;;  %v4049_v20 = vmul.f32 %v5349_v53, %v8452_v32 }
 0x60d   : > { %v8491_v60 = vpop.permute.xlu0 %3982  ;;  %v8493_v42 = vpop.permute.xlu2 %3992 }
 0x60e   : > { %v8495_v9 = vpop.permute.xlu1 %3987 }
 0x610   : > { %4844 = vmatpush.lsf.bf16.msrb.mxu0 %v4275_v0  ;;  %v5350_v0 = vld [vmem:[%s5503_s30 + $0x28] sm:$0xff] }
 0x615   : > { %v3998_v19 = vpop.permute.xlu0 %3997  ;;  %v4038_v54 = vpop.permute.xlu2 %4037 }
 0x616   : > { %v4003_v43 = vpop.permute.xlu1 %4002  ;;  %v4075_v16 = vmul.f32 %v5342_v49, %v4038_v54  ;;  %v4050_v54 = vmul.f32 %v5350_v0, %v8456_v10  ;;  %v5351_v49 = vld [vmem:[%s5503_s30 + $0xc8] sm:$0xff] }
 0x618   : > { %v4269_v55 = vsel %vm3852_vm13, %v4897_v2, %v4075_v16  ;;  %v5352_v2 = vld [vmem:[%s5503_s30 + $0xb0] sm:$0xff] }
 0x61d   : > { %v4043_v36 = vpop.permute.xlu0 %4042  ;;  %v4023_v39 = vpop.permute.xlu2 %4022 }
 0x61e   : > { %v4076_v29 = vmul.f32 %v5343_v40, %v4043_v36  ;;  %v4033_v37 = vpop.permute.xlu1 %4032  ;;  %v4072_v46 = vmul.f32 %v5347_v35, %v4023_v39  ;;  %v4067_v40 = vmul.f32 %v5352_v2, %v3998_v19 }
 0x61f   : > { %v4074_v3 = vmul.f32 %v5344_v61, %v4033_v37 }
 0x620   : > { %v4270_v21 = vsel %vm3852_vm13, %v4898_v51, %v4076_v29  ;;  %v4266_v57 = vsel %vm3852_vm13, %v4918_v59, %v4072_v46  ;;  %v5353_v29 = vld [vmem:[%s5503_s30 + $0xb8] sm:$0xff] }
 0x621   : > { %v4286_v34 = vpack.c.bf16 %v4270_v21, %v4269_v55  ;;  %v4268_v7 = vsel %vm3852_vm13, %v4908_v6, %v4074_v3  ;;  %v4068_v37 = vmul.f32 %v5353_v29, %v4003_v43  ;;  %v5354_v6 = vld [vmem:[%s5503_s30 + $0x30] sm:$0xff]  ;;  %v5357_v46 = vld [vmem:[%s5503_s30 + $0x18] sm:$0xff]  ;;  %v5362_v29 = vld [vmem:[%s5503_s30 + $0x80] sm:$0xff] }
 0x623   : > { %4855 = vmatpush.lsf.bf16.msrb.mxu1 %v4286_v34 }
 0x625   : > { %v4028_v1 = vpop.permute.xlu0 %4027  ;;  %v4008_v18 = vpop.permute.xlu2 %4007 }
 0x626   : > { %v4073_v62 = vmul.f32 %v5345_v38, %v4028_v1  ;;  %v4018_v24 = vpop.permute.xlu1 %4017  ;;  %v4069_v23 = vmul.f32 %v5348_v50, %v4008_v18  ;;  %v5355_v38 = vld [vmem:[%s5503_s30 + $0x38] sm:$0xff] }
 0x627   : > { %v4071_v31 = vmul.f32 %v5346_v45, %v4018_v24 }
 0x628   : > { %v4267_v28 = vsel %vm3852_vm13, %v4907_v58, %v4073_v62  ;;  %v4263_v32 = vsel %vm3852_vm13, %v4927_v5, %v4069_v23  ;;  %v4051_v58 = vmul.f32 %v5354_v6, %v8454_v11  ;;  %v4052_v62 = vmul.f32 %v5355_v38, %v8458_v44  ;;  %v5358_v23 = vld [vmem:[%s5503_s30 + $0xa8] sm:$0xff]  ;;  %v4345_v38 = vld [vmem:[#allocation3] sm:$0xf] }
 0x629   : > { %v4285_v33 = vpack.c.bf16 %v4268_v7, %v4267_v28  ;;  %v4265_v52 = vsel %vm3852_vm13, %v4917_v56, %v4071_v31  ;;  %v5356_v56 = vld [vmem:[%s5503_s30 + $0x10] sm:$0xff]  ;;  %v4048_v28 = vmul.f32 %v5357_v46, %v8448_v41 }
 0x62a   : > { %v4284_v8 = vpack.c.bf16 %v4266_v57, %v4265_v52  ;;  %v4047_v35 = vmul.f32 %v5356_v56, %v8446_v13  ;;  %v4066_v57 = vmul.f32 %v5358_v23, %v8493_v42 }
 0x62b   : > { %4856 = vmatpush.lsf.bf16.msrb.mxu1 %v4285_v33 }
 0x62d   : > { %v4013_v47 = vpop.permute.xlu0 %4012  ;;  %v4941_v48 = vpop.permute.xlu2 %4940 }
 0x62e   : > { %v4070_v16 = vmul.f32 %v5351_v49, %v4013_v47  ;;  %v4943_v36 = vunpack.i.h.bf16 %v4941_v48  ;;  %v4942_v39 = vunpack.i.l.bf16 %v4941_v48  ;;  %v4936_v51 = vpop.permute.xlu1 %4935 }
 0x62f   : > { %v4938_v63 = vunpack.i.h.bf16 %v4936_v51  ;;  %v4937_v55 = vunpack.i.l.bf16 %v4936_v51  ;;  %4857 = vmatpush.lsf.bf16.msrb.mxu1 %v4284_v8 }
 0x630   : > { %v4264_v10 = vsel %vm3852_vm13, %v4928_v15, %v4070_v16  ;;  %v4243_v21 = vsel %vm3852_vm13, %v4942_v39, %v4049_v20  ;;  %v4244_v19 = vsel %vm3852_vm13, %v4943_v36, %v4050_v54  ;;  %v5359_v15 = vld [vmem:[%s5503_s30 + $0xa0] sm:$0xff]  ;;  %v5360_v54 = vld [vmem:[%s5503_s30 + $0x90] sm:$0xff]  ;;  %v5361_v16 = vld [vmem:[%s5503_s30 + $0x98] sm:$0xff] }
 0x631   : > { %v4283_v34 = vpack.c.bf16 %v4264_v10, %v4263_v32  ;;  %v4273_v43 = vpack.c.bf16 %v4244_v19, %v4243_v21  ;;  %v4261_v61 = vsel %vm3852_vm13, %v4937_v55, %v4067_v40  ;;  %v4262_v3 = vsel %vm3852_vm13, %v4938_v63, %v4068_v37  ;;  %v5363_v37 = vld [vmem:[%s5503_s30 + $0x88] sm:$0xff]  ;;  %v5364_v55 = vld [vmem:[%s5503_s30] sm:$0xff] }
 0x632   : > { %v4282_v18 = vpack.c.bf16 %v4262_v3, %v4261_v61  ;;  %v4065_v5 = vmul.f32 %v5359_v15, %v8495_v9  ;;  %v4063_v49 = vmul.f32 %v5360_v54, %v8475_v4  ;;  %v4064_v36 = vmul.f32 %v5361_v16, %v8491_v60  ;;  %v5365_v10 = vld [vmem:[%s5503_s30 + $0x8] sm:$0xff] }
 0x633   : > { %4858 = vmatpush.lsf.bf16.msrb.mxu1 %v4283_v34  ;;  %v4061_v60 = vmul.f32 %v5362_v29, %v8473_v26  ;;  %v4062_v63 = vmul.f32 %v5363_v37, %v8479_v25  ;;  %v4045_v32 = vmul.f32 %v5364_v55, %v8441_v14  ;;  %v4046_v21 = vmul.f32 %v5365_v10, %v8450_v17 }
 0x634   : > { %v3623_v17 = vmul.f32 1.442695, %v3622_v30 }
 0x635   : > { %v4931_v1 = vpop.permute.xlu0 %4930  ;;  %v4956_v41 = vpop.permute.xlu2 %4955 }
 0x636   : > { %v4933_v24 = vunpack.i.h.bf16 %v4931_v1  ;;  %v4932_v45 = vunpack.i.l.bf16 %v4931_v1  ;;  %v4951_v31 = vpop.permute.xlu1 %4950  ;;  %v4958_v20 = vunpack.i.h.bf16 %v4956_v41  ;;  %v4957_v47 = vunpack.i.l.bf16 %v4956_v41 }
 0x637   : > { %v4953_v7 = vunpack.i.h.bf16 %v4951_v31  ;;  %v4952_v33 = vunpack.i.l.bf16 %v4951_v31  ;;  %4859 = vmatpush.lsf.bf16.msrb.mxu1 %v4282_v18  ;;  %5293 = vpow2.f32 %v3623_v17 }
 0x638   : > { %v4245_v11 = vsel %vm3852_vm13, %v4932_v45, %v4051_v58  ;;  %v4246_v44 = vsel %vm3852_vm13, %v4933_v24, %v4052_v62  ;;  %v4257_v40 = vsel %vm3852_vm13, %v4957_v47, %v4063_v49  ;;  %v4258_v4 = vsel %vm3852_vm13, %v4958_v20, %v4064_v36 }
 0x639   : > { %v4274_v59 = vpack.c.bf16 %v4246_v44, %v4245_v11  ;;  %v4241_v52 = vsel %vm3852_vm13, %v4952_v33, %v4047_v35  ;;  %v4242_v13 = vsel %vm3852_vm13, %v4953_v7, %v4048_v28  ;;  %v4280_v34 = vpack.c.bf16 %v4258_v4, %v4257_v40 }
 0x63a   : > { %v4272_v50 = vpack.c.bf16 %v4242_v13, %v4241_v52 }
 0x63b   : > { %4845 = vmatpush.lsf.bf16.msrb.mxu0 %v4274_v59 }
 0x63d   : > { %v4946_v53 = vpop.permute.xlu0 %4945  ;;  %v5294_v6 = vpop.eup %5293 }
 0x63e   : > { %v4948_v48 = vunpack.i.h.bf16 %v4946_v53  ;;  %v4947_v8 = vunpack.i.l.bf16 %v4946_v53  ;;  %v4966_v0 = vpop.permute.xlu1 %4965  ;;  %v4347_v58 = vperm.slane %v5294_v6, 0 }
 0x63f   : > { %4846 = vmatpush.lsf.bf16.msrb.mxu0 %v4273_v43  ;;  %v4968_v51 = vunpack.i.h.bf16 %v4966_v0  ;;  %v4967_v2 = vunpack.i.l.bf16 %v4966_v0 }
 0x640   : > { %v4259_v42 = vsel %vm3852_vm13, %v4947_v8, %v4065_v5  ;;  %v4260_v9 = vsel %vm3852_vm13, %v4948_v48, %v4066_v57  ;;  %v4349_v45 = vmul.f32 %v4347_v58, %v4345_v38 }
 0x641   : > { %v4281_v39 = vpack.c.bf16 %v4260_v9, %v4259_v42  ;;  %v4255_v3 = vsel %vm3852_vm13, %v4967_v2, %v4061_v60  ;;  %v4256_v1 = vsel %vm3852_vm13, %v4968_v51, %v4062_v63 }
 0x642   : > { %v4279_v18 = vpack.c.bf16 %v4256_v1, %v4255_v3 }
 0x643   : > { %4847 = vmatpush.lsf.bf16.msrb.mxu0 %v4272_v50  ;;  %4860 = vmatpush.lsf.bf16.msrb.mxu1 %v4281_v39 }
 0x645   : > { %v4961_v19 = vpop.permute.xlu0 %4960 }
 0x646   : > { %v4963_v43 = vunpack.i.h.bf16 %v4961_v19  ;;  %v4962_v61 = vunpack.i.l.bf16 %v4961_v19 }
 0x647   : > { %4861 = vmatpush.lsf.bf16.msrb.mxu1 %v4280_v34 }
 0x648   : > { %v4239_v26 = vsel %vm3852_vm13, %v4962_v61, %v4045_v32  ;;  %v4240_v14 = vsel %vm3852_vm13, %v4963_v43, %v4046_v21 }
 0x649   : > { %v4271_v25 = vpack.c.bf16 %v4240_v14, %v4239_v26 }
 0x64b   : > { %4848 = vmatpush.lsf.bf16.msrb.mxu0 %v4271_v25  ;;  %4862 = vmatpush.lsf.bf16.msrb.mxu1 %v4279_v18 }
 0x64d   : > { %4849 = vllmr.2.mxu0  ;;  %4863 = vllmr.2.mxu1 }
 0x66e   : > { %4850 = vmatmul.lmr.bf16.vlgmr.msra.gmra.2.mxu0  ;;  %4864 = vmatmul.lmr.bf16.vlgmr.msra.gmra.2.mxu1 }
 0x676   : > { %4851 = vmatmul.lmr.bf16.gmra.2.mxu0  ;;  %4865 = vmatmul.lmr.bf16.gmra.2.mxu1 }
 0x6eb   : > { %v4328_v12 = vpop.f32.mrf.mxu0  ;;  %v4341_v62 = vpop.f32.mrf.mxu1 }
 0x6ec   : > { %v4342_v24 = vadd.f32 %v4341_v62, %v4328_v12 }
 0x6ee   : > { %v4350_v31 = vadd.f32 %v4349_v45, %v4342_v24 }
 0x6ef   : > { %4356 = sbr.rel (%p4817_p5) target bundleno = 1809 (0x711), region = 72 }
 0x6f0   : > { %4351 = vst [vmem:[#allocation3] sm:$0xf] %v4350_v31 }
 0x6f3   : > { %v4330_v56 = vpop.f32.mrf.mxu0  ;;  %v4343_v35 = vpop.f32.mrf.mxu1 }
 0x6f4   : > { %v5412_v44 = vmov 0  }
 0x6f7   : > { %v4357_v46 = vld [vmem:[#allocation3] sm:$0xf] }
 0x6f8   : > { %vm4358_vm8 = vcmp.gt.f32.partialorder %v4357_v46, 0.0 }
 0x6f9   : > { %v4359_v28 = vsel %vm4358_vm8, %v4357_v46, 1.0  ;;  %v4376_v59 = vsel %vm4358_vm8, 1, %v5412_v44 }
 0x6fa   : > { %5366 = vrcp.f32 %v4359_v28  ;;  %v4371_v30 = vand.u32 2147483648, %v4359_v28  ;;  %vm4365_vm5 = vweird.f32 %v4359_v28  ;;  %v4369_v33 = vand.u32 2147483647, %v4359_v28 }
 0x6fb   : > { %v4377_v50 = vperm.slane %v4376_v59, 3 }
 0x6fc   : > { %v4372_v52 = vor.u32 1.1754944e-38, %v4371_v30  ;;  %vm4370_vm15 = vcmp.eq.f32.partialorder %v4369_v33, 8.507059e+37 }
 0x6fd   : > { %vm4378_vm1 = vcmp.eq.s32.totalorder %v4377_v50, 1 }
 0x700   : > { %v5367_v27 = vpop.eup %5366 }
 0x701   : > { %v4361_v22 = vmul.f32 %v5367_v27, %v4359_v28  ;;  %vm4366_vm6 = vweird.f32 %v5367_v27 }
 0x702   : > { %vm4367_vm11 = vmor %vm4365_vm5, %vm4366_vm6 }
 0x703   : > { %v4362_v7 = vsub.f32 1.0, %v4361_v22 }
 0x705   : > { %v4363_v11 = vmul.f32 %v5367_v27, %v4362_v7 }
 0x707   : > { %v4364_v13 = vadd.f32 %v5367_v27, %v4363_v11 }
 0x709   : > { %v4368_v41 = vsel %vm4367_vm11, %v5367_v27, %v4364_v13 }
 0x70a   : > { %v4373_v23 = vsel %vm4370_vm15, %v4372_v52, %v4368_v41 }
 0x70b   : > { %v4374_v57 = vperm.slane %v4373_v23, 3 }
 0x70d   : > { %v4375_v15 = vmul.f32 %v4374_v57, %v4357_v46 }
 0x70f   : > { %v4379_v5 = vsel %vm4378_vm1, %v4375_v15, 0.0 }
 0x710   : > { %4380 = vst [vmem:[#allocation5] sm:$0xf] %v4379_v5 }
 0x711 PF: > { %p4870_p6 = scmp.eq.s32.totalorder %s5485_s20, 2  ;;  %s5413_s27 = smov [#allocation5]  }
 0x712   : > { %s4387_s30 = sshll.u32 %s5413_s27, 4  ;;  %s4389_s12 = sshll.u32 %s8613_s11, 4  ;;  %s4388_s30 = int_to_ptr.vmem [resolvable:$true] %s4387_s30  ;;  %s4390_s12 = int_to_ptr.hbm [resolvable:$true] %s4389_s12 }
 0x713   : > { %4867 = dma.vmem_to_hbm [thread:$0]  (%p4870_p6), %s4388_s30, 64, %s4390_s12, [#allocation6]  }
 0x714   : > { %5401 = dma.done.wait (%p4870_p6), [#allocation6], 64  }
 0x715   : > { %5403 = vsyncadd (%p4870_p6), [#allocation6], 4294967232 }
 0x716 PF: > { %s24_s19 = sadd.s32 1, %s5406_s19  }
 0x717   : > { %p21_p7 = scmp.ge.s32.totalorder %s24_s19, 5  }
 0x719   :  { %23 = sbr.rel (!%p21_p7) target bundleno = 4 (0x4), region = 105 }
 0x71e   :  { %4403 = vsyncpa [#allocation6], 1 }
 0x71f   :  { %4405 = vsyncpa [#allocation6 + $0x1], 1 }

</bundles_post_ra>
